<compile_context>
chip_gen: v7x
topology: tpu7x:2x2x1
jax: 0.10.0
libtpu: 0.0.40
codegen_flags: <defaults>
</compile_context>

<pallas_src>
import functools

import jax
import jax.numpy as jnp
from jax.experimental import pallas as pl
from jax.experimental.pallas import tpu as pltpu


# ----------------------------------------------------------------------------
# Fused kernel: 6 stacked LSTM layers + residual + fc + relu, single launch
# per batch tile.  PyTorch gate order: i, f, g, o.
# ----------------------------------------------------------------------------
def _fused_kernel(x_ref, wih0_ref, wih_ref, whh_ref, b_ref, res_ref,
                  wfc_ref, bfc_ref, out_ref, proj, seq):
    T, bt, _ = x_ref.shape
    H = seq.shape[-1]
    n_layers = whh_ref.shape[0]
    f32 = jnp.float32
    unroll = min(T, 8)

    # Full-width gate activation constants (hoisted out of all loops):
    #   sigmoid(x) = 0.5 * tanh(0.5 * x) + 0.5   for the i / f / o segments,
    #   tanh(x)                                   for the g segment.
    halfs = jnp.full((1, H), 0.5, f32)
    ones = jnp.full((1, H), 1.0, f32)
    zeros = jnp.full((1, H), 0.0, f32)
    pre_scale = jnp.concatenate([halfs, halfs, ones, halfs], axis=1)   # (1, 4H)
    post_scale = pre_scale
    post_bias = jnp.concatenate([halfs, halfs, zeros, halfs], axis=1)  # (1, 4H)

    def run_layer(in_get, wih, layer_idx, write_seq):
        whh = whh_ref[layer_idx]          # (H, 4H), static index -> loaded once
        bias = b_ref[layer_idx]           # (1, 4H), f32

        # (1) Batched input projection — the parallel part, one big MXU matmul
        #     completely off the serial dependency chain.
        x2d = in_get().reshape(T * bt, -1).astype(wih.dtype)          # (T*bt, In)
        p = jnp.dot(x2d, wih, preferred_element_type=f32) + bias      # (T*bt, 4H)
        proj[...] = p.reshape(T, bt, 4 * H)

        # (2) Serial recurrence — h, c carried in registers, only h @ Whh plus
        #     gate math on the critical path.
        def rec_step(t, carry):
            h, c = carry
            gates = proj[t] + jnp.dot(h.astype(whh.dtype), whh,
                                      preferred_element_type=f32)     # (bt, 4H)
            act = jnp.tanh(gates * pre_scale) * post_scale + post_bias
            i_g = act[:, 0 * H:1 * H]
            f_g = act[:, 1 * H:2 * H]
            g_g = act[:, 2 * H:3 * H]
            o_g = act[:, 3 * H:4 * H]
            c_new = f_g * c + i_g * g_g
            h_new = o_g * jnp.tanh(c_new)
            if write_seq:                 # last layer skips the sequence write
                seq[t] = h_new
            return (h_new, c_new)

        init = (jnp.zeros((bt, H), f32), jnp.zeros((bt, H), f32))
        h_fin, _ = jax.lax.fori_loop(0, T, rec_step, init, unroll=unroll)
        return h_fin

    # Layer 0 (lstm1 layer 0): input size I -> hidden H; writes seq.
    h_last = run_layer(lambda: x_ref[...], wih0_ref[...], 0, True)

    # Layers 1..L-1: the batched projection fully consumes `seq` into `proj`,
    # so the recurrence may overwrite `seq` in place (single buffer).
    for l in range(1, n_layers):
        is_last = (l == n_layers - 1)
        h_last = run_layer(lambda: seq[...], wih_ref[l - 1], l, not is_last)

    # Head: relu((h_T + residual) @ Wfc + bfc), kept in f32.  Wfc/bfc are
    # lane-padded so the final store is lane-dense.
    z = h_last + res_ref[...]
    y = jnp.dot(z, wfc_ref[...], preferred_element_type=f32) + bfc_ref[...]
    out_ref[...] = jnp.maximum(y, 0.0).astype(out_ref.dtype)


# ----------------------------------------------------------------------------
# Parameter init / packing
# ----------------------------------------------------------------------------
def init_params(key, input_size, hidden_size, output_size, num_layers=3):
    """Deterministic PyTorch-style uniform(-1/sqrt(H), 1/sqrt(H)) init."""
    k = 1.0 / jnp.sqrt(jnp.float32(hidden_size))
    params = {"lstm1": [], "lstm2": []}

    def u(key, shape):
        return jax.random.uniform(key, shape, jnp.float32, -k, k)

    for name, in0 in (("lstm1", input_size), ("lstm2", hidden_size)):
        for layer in range(num_layers):
            in_sz = in0 if layer == 0 else hidden_size
            key, k1, k2, k3, k4 = jax.random.split(key, 5)
            params[name].append({
                "w_ih": u(k1, (4 * hidden_size, in_sz)),
                "w_hh": u(k2, (4 * hidden_size, hidden_size)),
                "b_ih": u(k3, (4 * hidden_size,)),
                "b_hh": u(k4, (4 * hidden_size,)),
            })
    key, k1, k2 = jax.random.split(key, 3)
    params["fc_w"] = u(k1, (output_size, hidden_size))
    params["fc_b"] = u(k2, (output_size,))
    return params


def pack_params(params, mxu_dtype=jnp.float32):
    """One-time packing: transpose weights, fold biases, stack layers.

    `mxu_dtype=jnp.bfloat16` casts the LSTM matmul weights only (gate
    accumulation, c/h state and the fc head stay f32)."""
    H = params["lstm1"][0]["w_hh"].shape[1]
    layers = list(params["lstm1"]) + list(params["lstm2"])
    wih0_t = jnp.transpose(layers[0]["w_ih"]).astype(mxu_dtype)             # (I, 4H)
    wih_rest = jnp.stack([jnp.transpose(l["w_ih"])
                          for l in layers[1:]]).astype(mxu_dtype)           # (L-1, H, 4H)
    whh_all = jnp.stack([jnp.transpose(l["w_hh"])
                         for l in layers]).astype(mxu_dtype)                # (L, H, 4H)
    b_all = jnp.stack([(l["b_ih"] + l["b_hh"]).reshape(1, 4 * H)
                       for l in layers]).astype(jnp.float32)                # (L, 1, 4H)

    O = params["fc_w"].shape[0]
    Op = ((O + 127) // 128) * 128                  # lane-dense fc output
    wfc_t = jnp.transpose(params["fc_w"]).astype(jnp.float32)               # (H, O)
    wfc_t = jnp.pad(wfc_t, ((0, 0), (0, Op - O)))                           # (H, Op)
    bfc = jnp.pad(params["fc_b"].astype(jnp.float32),
                  (0, Op - O)).reshape(1, Op)                               # (1, Op)
    return {"wih0": wih0_t, "wih_rest": wih_rest, "whh": whh_all,
            "b": b_all, "wfc": wfc_t, "bfc": bfc}


# ----------------------------------------------------------------------------
# Forward
# ----------------------------------------------------------------------------
@functools.partial(jax.jit, static_argnames=("output_size",))
def residual_lstm_forward(packed, x, *, output_size):
    """x: (B, T, input_size) batch-first, matching PyTorch batch_first=True."""
    B, T, I = x.shape
    H = packed["whh"].shape[1]
    Op = packed["wfc"].shape[1]

    # Pad batch to a sublane multiple; with >= 16 rows, split into two batch
    # tiles so v7x's two TensorCores can each take one ("parallel" grid axis).
    Bp = ((B + 7) // 8) * 8
    if Bp >= 16:
        Bp = ((Bp + 15) // 16) * 16
        n_bt = 2
    else:
        n_bt = 1
    bt = Bp // n_bt

    # Time-major + batch pad for the kernel.
    x_tm = jnp.transpose(x, (1, 0, 2))                        # (T, B, I)
    x_tm = jnp.pad(x_tm, ((0, 0), (0, Bp - B), (0, 0)))        # (T, Bp, I)

    # residual = x[:, -1, :] truncated / zero-padded to hidden size.
    res = x[:, -1, :]
    if I > H:
        res = res[:, :H]
    elif I < H:
        res = jnp.pad(res, ((0, 0), (0, H - I)))
    res = jnp.pad(res, ((0, Bp - B), (0, 0)))                  # (Bp, H)

    grid_spec = pltpu.PrefetchScalarGridSpec(
        num_scalar_prefetch=0,
        grid=(n_bt,),
        in_specs=[
            pl.BlockSpec((T, bt, I), lambda b: (0, b, 0)),             # x
            pl.BlockSpec(packed["wih0"].shape, lambda b: (0, 0)),      # W_ih layer 0
            pl.BlockSpec(packed["wih_rest"].shape, lambda b: (0, 0, 0)),
            pl.BlockSpec(packed["whh"].shape, lambda b: (0, 0, 0)),    # W_hh stacked
            pl.BlockSpec(packed["b"].shape, lambda b: (0, 0, 0)),      # folded biases
            pl.BlockSpec((bt, H), lambda b: (b, 0)),                   # residual
            pl.BlockSpec(packed["wfc"].shape, lambda b: (0, 0)),       # fc weight
            pl.BlockSpec(packed["bfc"].shape, lambda b: (0, 0)),       # fc bias
        ],
        out_specs=pl.BlockSpec((bt, Op), lambda b: (b, 0)),
        scratch_shapes=[
            pltpu.VMEM((T, bt, 4 * H), jnp.float32),   # per-layer batched projection
            pltpu.VMEM((T, bt, H), jnp.float32),       # single hidden-sequence buffer
        ],
    )

    out_full = pl.pallas_call(
        _fused_kernel,
        out_shape=jax.ShapeDtypeStruct((Bp, Op), jnp.float32),
        grid_spec=grid_spec,
        compiler_params=pltpu.CompilerParams(
            dimension_semantics=("parallel",),
            vmem_limit_bytes=64 * 1024 * 1024,         # v7x-safe explicit budget
        ),
    )(x_tm, packed["wih0"], packed["wih_rest"], packed["whh"],
      packed["b"], res, packed["wfc"], packed["bfc"])

    return out_full[:B, :output_size]


# ----------------------------------------------------------------------------
# Pure-JAX reference (for correctness check)
# ----------------------------------------------------------------------------
def _lstm_layer_ref(x_tm, w_ih, w_hh, b_ih, b_hh):
    T, B, _ = x_tm.shape
    H = w_hh.shape[1]

    def step(carry, x_t):
        h, c = carry
        gates = x_t @ w_ih.T + h @ w_hh.T + b_ih + b_hh
        i = jax.nn.sigmoid(gates[:, :H])
        f = jax.nn.sigmoid(gates[:, H:2 * H])
        g = jnp.tanh(gates[:, 2 * H:3 * H])
        o = jax.nn.sigmoid(gates[:, 3 * H:])
        c = f * c + i * g
        h = o * jnp.tanh(c)
        return (h, c), h

    init = (jnp.zeros((B, H), jnp.float32), jnp.zeros((B, H), jnp.float32))
    _, ys = jax.lax.scan(step, init, x_tm)
    return ys


def reference_forward(params, x):
    B, T, I = x.shape
    H = params["lstm1"][0]["w_hh"].shape[1]
    h = jnp.transpose(x, (1, 0, 2))
    for stack in ("lstm1", "lstm2"):
        for lp in params[stack]:
            h = _lstm_layer_ref(h, lp["w_ih"], lp["w_hh"], lp["b_ih"], lp["b_hh"])
    out2_last = h[-1]
    res = x[:, -1, :]
    if I > H:
        res = res[:, :H]
    elif I < H:
        res = jnp.pad(res, ((0, 0), (0, H - I)))
    y = (out2_last + res) @ params["fc_w"].T + params["fc_b"]
    return jnp.maximum(y, 0.0)


if __name__ == "__main__":
    B, T = 2, 8
    input_size, hidden_size, output_size = 16, 32, 8

    key = jax.random.PRNGKey(0)
    key_p, key_x = jax.random.split(key)
    params = init_params(key_p, input_size, hidden_size, output_size, num_layers=3)
    x = jax.random.normal(key_x, (B, T, input_size), dtype=jnp.float32)

    ref = reference_forward(params, x)

    # f32 MXU path (strict correctness check).
    packed = pack_params(params, mxu_dtype=jnp.float32)
    out = residual_lstm_forward(packed, x, output_size=output_size)
    jax.block_until_ready(out)
    assert out.shape == (B, output_size)
    assert bool(jnp.all(out >= 0.0))                       # post-ReLU
    assert bool(jnp.allclose(out, ref, rtol=1e-4, atol=1e-4))

    # bf16 MXU-input path (v6e/v7x feedback): gate math / state / fc stay f32.
    packed_bf16 = pack_params(params, mxu_dtype=jnp.bfloat16)
    out_bf16 = residual_lstm_forward(packed_bf16, x, output_size=output_size)
    jax.block_until_ready(out_bf16)
    assert out_bf16.shape == (B, output_size)
    assert bool(jnp.allclose(out_bf16, ref, rtol=1e-1, atol=1e-1))

    print("KERNEL_OK")
</pallas_src>

<mosaic_0001>
module attributes {stable_mosaic.version = 11 : i64} {
  func.func @_fused_kernel(%arg0: i32, %arg1: memref<8x8x16xf32, #tpu.memory_space<vmem>>, %arg2: memref<16x128xf32, #tpu.memory_space<vmem>>, %arg3: memref<5x32x128xf32, #tpu.memory_space<vmem>>, %arg4: memref<6x32x128xf32, #tpu.memory_space<vmem>>, %arg5: memref<6x1x128xf32, #tpu.memory_space<vmem>>, %arg6: memref<8x32xf32, #tpu.memory_space<vmem>>, %arg7: memref<32x128xf32, #tpu.memory_space<vmem>>, %arg8: memref<1x128xf32, #tpu.memory_space<vmem>>, %arg9: memref<8x128xf32, #tpu.memory_space<vmem>>, %arg10: memref<8x8x128xf32, #tpu.memory_space<vmem>>, %arg11: memref<8x8x32xf32, #tpu.memory_space<vmem>>) attributes {dimension_semantics = [#tpu.dimension_semantics<parallel>], iteration_bounds = array<i64: 1>, scalar_prefetch = 0 : i64, scratch_operands = 2 : i64, tpu.core_type = #tpu.core_type<tc>, window_params = [{transform_indices = @transform_0, window_bounds = array<i64: 8, 8, 16>}, {pipeline_mode = #tpu.pipeline_mode<synchronous>, transform_indices = @transform_1, window_bounds = array<i64: 16, 128>}, {pipeline_mode = #tpu.pipeline_mode<synchronous>, transform_indices = @transform_2, window_bounds = array<i64: 5, 32, 128>}, {pipeline_mode = #tpu.pipeline_mode<synchronous>, transform_indices = @transform_3, window_bounds = array<i64: 6, 32, 128>}, {pipeline_mode = #tpu.pipeline_mode<synchronous>, transform_indices = @transform_4, window_bounds = array<i64: 6, 1, 128>}, {transform_indices = @transform_5, window_bounds = array<i64: 8, 32>}, {pipeline_mode = #tpu.pipeline_mode<synchronous>, transform_indices = @transform_6, window_bounds = array<i64: 32, 128>}, {pipeline_mode = #tpu.pipeline_mode<synchronous>, transform_indices = @transform_7, window_bounds = array<i64: 1, 128>}, {transform_indices = @transform_8, window_bounds = array<i64: 8, 128>}]} {
    %cst = arith.constant 5.000000e-01 : f32
    %0 = vector.broadcast %cst : f32 to vector<1x32xf32>
    %cst_0 = arith.constant 1.000000e+00 : f32
    %1 = vector.broadcast %cst_0 : f32 to vector<1x32xf32>
    %cst_1 = arith.constant 0.000000e+00 : f32
    %2 = vector.broadcast %cst_1 : f32 to vector<1x32xf32>
    %3 = tpu.concatenate %0, %0, %1, %0 in 1 : vector<1x32xf32>, vector<1x32xf32>, vector<1x32xf32>, vector<1x32xf32> -> vector<1x128xf32>
    %4 = tpu.concatenate %0, %0, %2, %0 in 1 : vector<1x32xf32>, vector<1x32xf32>, vector<1x32xf32>, vector<1x32xf32> -> vector<1x128xf32>
    %c0 = arith.constant 0 : index
    %c0_2 = arith.constant 0 : index
    %5 = vector.load %arg2[%c0, %c0_2] : memref<16x128xf32, #tpu.memory_space<vmem>>, vector<16x128xf32>
    %c0_3 = arith.constant 0 : index
    %c0_4 = arith.constant 0 : index
    %c0_5 = arith.constant 0 : index
    %6 = vector.load %arg4[%c0_3, %c0_4, %c0_5] : memref<6x32x128xf32, #tpu.memory_space<vmem>>, vector<1x32x128xf32>
    %7 = vector.shape_cast %6 : vector<1x32x128xf32> to vector<32x128xf32>
    %c0_6 = arith.constant 0 : index
    %c0_7 = arith.constant 0 : index
    %c0_8 = arith.constant 0 : index
    %8 = vector.load %arg5[%c0_6, %c0_7, %c0_8] : memref<6x1x128xf32, #tpu.memory_space<vmem>>, vector<1x1x128xf32>
    %9 = vector.shape_cast %8 : vector<1x1x128xf32> to vector<1x128xf32>
    %c0_9 = arith.constant 0 : index
    %c0_10 = arith.constant 0 : index
    %c0_11 = arith.constant 0 : index
    %10 = vector.load %arg1[%c0_9, %c0_10, %c0_11] : memref<8x8x16xf32, #tpu.memory_space<vmem>>, vector<8x8x16xf32>
    %11 = vector.shape_cast %10 : vector<8x8x16xf32> to vector<64x16xf32>
    %cst_12 = arith.constant dense<0.000000e+00> : vector<64x128xf32>
    %12 = tpu.matmul %11, %5, %cst_12 {dimension_numbers = #tpu.dot_dimension_numbers<[1], [0], [0], [1], [0, 0, 1, 1], [], []>} : vector<64x16xf32>, vector<16x128xf32>, vector<64x128xf32> -> vector<64x128xf32>
    %13 = vector.broadcast %9 : vector<1x128xf32> to vector<64x128xf32>
    %14 = arith.addf %12, %13 : vector<64x128xf32>
    %15 = vector.shape_cast %14 : vector<64x128xf32> to vector<8x8x128xf32>
    %c0_13 = arith.constant 0 : index
    %c0_14 = arith.constant 0 : index
    %c0_15 = arith.constant 0 : index
    %16 = vector.load %arg10[%c0_13, %c0_14, %c0_15] : memref<8x8x128xf32, #tpu.memory_space<vmem>>, vector<8x8x128xf32>
    tpu.vector_store %arg10[%c0_13, %c0_14, %c0_15], %15 {strides = array<i32>} : memref<8x8x128xf32, #tpu.memory_space<vmem>>, vector<8x8x128xf32>,
    %cst_16 = arith.constant 0.000000e+00 : f32
    %17 = vector.broadcast %cst_16 : f32 to vector<8x32xf32>
    %cst_17 = arith.constant 0.000000e+00 : f32
    %18 = vector.broadcast %cst_17 : f32 to vector<8x32xf32>
    %c0_i32 = arith.constant 0 : i32
    %19 = arith.index_cast %c0_i32 : i32 to index
    %c0_18 = arith.constant 0 : index
    %c0_19 = arith.constant 0 : index
    %20 = vector.load %arg10[%19, %c0_18, %c0_19] : memref<8x8x128xf32, #tpu.memory_space<vmem>>, vector<1x8x128xf32>
    %21 = vector.shape_cast %20 : vector<1x8x128xf32> to vector<8x128xf32>
    %cst_20 = arith.constant dense<0.000000e+00> : vector<8x128xf32>
    %22 = tpu.matmul %17, %7, %cst_20 {dimension_numbers = #tpu.dot_dimension_numbers<[1], [0], [0], [1], [0, 0, 1, 1], [], []>} : vector<8x32xf32>, vector<32x128xf32>, vector<8x128xf32> -> vector<8x128xf32>
    %23 = arith.addf %21, %22 : vector<8x128xf32>
    %24 = vector.broadcast %3 : vector<1x128xf32> to vector<8x128xf32>
    %25 = arith.mulf %23, %24 : vector<8x128xf32>
    %26 = math.tanh %25 : vector<8x128xf32>
    %27 = vector.broadcast %3 : vector<1x128xf32> to vector<8x128xf32>
    %28 = arith.mulf %26, %27 : vector<8x128xf32>
    %29 = vector.broadcast %4 : vector<1x128xf32> to vector<8x128xf32>
    %30 = arith.addf %28, %29 : vector<8x128xf32>
    %31 = vector.extract_strided_slice %30 {offsets = [0, 0], sizes = [8, 32], strides = [1, 1]} : vector<8x128xf32> to vector<8x32xf32>
    %32 = vector.extract_strided_slice %30 {offsets = [0, 32], sizes = [8, 32], strides = [1, 1]} : vector<8x128xf32> to vector<8x32xf32>
    %33 = vector.extract_strided_slice %30 {offsets = [0, 64], sizes = [8, 32], strides = [1, 1]} : vector<8x128xf32> to vector<8x32xf32>
    %34 = vector.extract_strided_slice %30 {offsets = [0, 96], sizes = [8, 32], strides = [1, 1]} : vector<8x128xf32> to vector<8x32xf32>
    %35 = arith.mulf %32, %18 : vector<8x32xf32>
    %36 = arith.mulf %31, %33 : vector<8x32xf32>
    %37 = arith.addf %35, %36 : vector<8x32xf32>
    %38 = math.tanh %37 : vector<8x32xf32>
    %39 = arith.mulf %34, %38 : vector<8x32xf32>
    %40 = arith.index_cast %c0_i32 : i32 to index
    %c0_21 = arith.constant 0 : index
    %c0_22 = arith.constant 0 : index
    %41 = vector.load %arg11[%40, %c0_21, %c0_22] : memref<8x8x32xf32, #tpu.memory_space<vmem>>, vector<1x8x32xf32>
    %42 = vector.shape_cast %41 : vector<1x8x32xf32> to vector<8x32xf32>
    %43 = vector.shape_cast %39 : vector<8x32xf32> to vector<1x8x32xf32>
    tpu.vector_store %arg11[%40, %c0_21, %c0_22], %43 {strides = array<i32>} : memref<8x8x32xf32, #tpu.memory_space<vmem>>, vector<1x8x32xf32>,
    %c1_i32 = arith.constant 1 : i32
    %44 = arith.index_cast %c1_i32 : i32 to index
    %c0_23 = arith.constant 0 : index
    %c0_24 = arith.constant 0 : index
    %45 = vector.load %arg10[%44, %c0_23, %c0_24] : memref<8x8x128xf32, #tpu.memory_space<vmem>>, vector<1x8x128xf32>
    %46 = vector.shape_cast %45 : vector<1x8x128xf32> to vector<8x128xf32>
    %cst_25 = arith.constant dense<0.000000e+00> : vector<8x128xf32>
    %47 = tpu.matmul %39, %7, %cst_25 {dimension_numbers = #tpu.dot_dimension_numbers<[1], [0], [0], [1], [0, 0, 1, 1], [], []>} : vector<8x32xf32>, vector<32x128xf32>, vector<8x128xf32> -> vector<8x128xf32>
    %48 = arith.addf %46, %47 : vector<8x128xf32>
    %49 = vector.broadcast %3 : vector<1x128xf32> to vector<8x128xf32>
    %50 = arith.mulf %48, %49 : vector<8x128xf32>
    %51 = math.tanh %50 : vector<8x128xf32>
    %52 = vector.broadcast %3 : vector<1x128xf32> to vector<8x128xf32>
    %53 = arith.mulf %51, %52 : vector<8x128xf32>
    %54 = vector.broadcast %4 : vector<1x128xf32> to vector<8x128xf32>
    %55 = arith.addf %53, %54 : vector<8x128xf32>
    %56 = vector.extract_strided_slice %55 {offsets = [0, 0], sizes = [8, 32], strides = [1, 1]} : vector<8x128xf32> to vector<8x32xf32>
    %57 = vector.extract_strided_slice %55 {offsets = [0, 32], sizes = [8, 32], strides = [1, 1]} : vector<8x128xf32> to vector<8x32xf32>
    %58 = vector.extract_strided_slice %55 {offsets = [0, 64], sizes = [8, 32], strides = [1, 1]} : vector<8x128xf32> to vector<8x32xf32>
    %59 = vector.extract_strided_slice %55 {offsets = [0, 96], sizes = [8, 32], strides = [1, 1]} : vector<8x128xf32> to vector<8x32xf32>
    %60 = arith.mulf %57, %37 : vector<8x32xf32>
    %61 = arith.mulf %56, %58 : vector<8x32xf32>
    %62 = arith.addf %60, %61 : vector<8x32xf32>
    %63 = math.tanh %62 : vector<8x32xf32>
    %64 = arith.mulf %59, %63 : vector<8x32xf32>
    %65 = arith.index_cast %c1_i32 : i32 to index
    %c0_26 = arith.constant 0 : index
    %c0_27 = arith.constant 0 : index
    %66 = vector.load %arg11[%65, %c0_26, %c0_27] : memref<8x8x32xf32, #tpu.memory_space<vmem>>, vector<1x8x32xf32>
    %67 = vector.shape_cast %66 : vector<1x8x32xf32> to vector<8x32xf32>
    %68 = vector.shape_cast %64 : vector<8x32xf32> to vector<1x8x32xf32>
    tpu.vector_store %arg11[%65, %c0_26, %c0_27], %68 {strides = array<i32>} : memref<8x8x32xf32, #tpu.memory_space<vmem>>, vector<1x8x32xf32>,
    %c2_i32 = arith.constant 2 : i32
    %69 = arith.index_cast %c2_i32 : i32 to index
    %c0_28 = arith.constant 0 : index
    %c0_29 = arith.constant 0 : index
    %70 = vector.load %arg10[%69, %c0_28, %c0_29] : memref<8x8x128xf32, #tpu.memory_space<vmem>>, vector<1x8x128xf32>
    %71 = vector.shape_cast %70 : vector<1x8x128xf32> to vector<8x128xf32>
    %cst_30 = arith.constant dense<0.000000e+00> : vector<8x128xf32>
    %72 = tpu.matmul %64, %7, %cst_30 {dimension_numbers = #tpu.dot_dimension_numbers<[1], [0], [0], [1], [0, 0, 1, 1], [], []>} : vector<8x32xf32>, vector<32x128xf32>, vector<8x128xf32> -> vector<8x128xf32>
    %73 = arith.addf %71, %72 : vector<8x128xf32>
    %74 = vector.broadcast %3 : vector<1x128xf32> to vector<8x128xf32>
    %75 = arith.mulf %73, %74 : vector<8x128xf32>
    %76 = math.tanh %75 : vector<8x128xf32>
    %77 = vector.broadcast %3 : vector<1x128xf32> to vector<8x128xf32>
    %78 = arith.mulf %76, %77 : vector<8x128xf32>
    %79 = vector.broadcast %4 : vector<1x128xf32> to vector<8x128xf32>
    %80 = arith.addf %78, %79 : vector<8x128xf32>
    %81 = vector.extract_strided_slice %80 {offsets = [0, 0], sizes = [8, 32], strides = [1, 1]} : vector<8x128xf32> to vector<8x32xf32>
    %82 = vector.extract_strided_slice %80 {offsets = [0, 32], sizes = [8, 32], strides = [1, 1]} : vector<8x128xf32> to vector<8x32xf32>
    %83 = vector.extract_strided_slice %80 {offsets = [0, 64], sizes = [8, 32], strides = [1, 1]} : vector<8x128xf32> to vector<8x32xf32>
    %84 = vector.extract_strided_slice %80 {offsets = [0, 96], sizes = [8, 32], strides = [1, 1]} : vector<8x128xf32> to vector<8x32xf32>
    %85 = arith.mulf %82, %62 : vector<8x32xf32>
    %86 = arith.mulf %81, %83 : vector<8x32xf32>
    %87 = arith.addf %85, %86 : vector<8x32xf32>
    %88 = math.tanh %87 : vector<8x32xf32>
    %89 = arith.mulf %84, %88 : vector<8x32xf32>
    %90 = arith.index_cast %c2_i32 : i32 to index
    %c0_31 = arith.constant 0 : index
    %c0_32 = arith.constant 0 : index
    %91 = vector.load %arg11[%90, %c0_31, %c0_32] : memref<8x8x32xf32, #tpu.memory_space<vmem>>, vector<1x8x32xf32>
    %92 = vector.shape_cast %91 : vector<1x8x32xf32> to vector<8x32xf32>
    %93 = vector.shape_cast %89 : vector<8x32xf32> to vector<1x8x32xf32>
    tpu.vector_store %arg11[%90, %c0_31, %c0_32], %93 {strides = array<i32>} : memref<8x8x32xf32, #tpu.memory_space<vmem>>, vector<1x8x32xf32>,
    %c3_i32 = arith.constant 3 : i32
    %94 = arith.index_cast %c3_i32 : i32 to index
    %c0_33 = arith.constant 0 : index
    %c0_34 = arith.constant 0 : index
    %95 = vector.load %arg10[%94, %c0_33, %c0_34] : memref<8x8x128xf32, #tpu.memory_space<vmem>>, vector<1x8x128xf32>
    %96 = vector.shape_cast %95 : vector<1x8x128xf32> to vector<8x128xf32>
    %cst_35 = arith.constant dense<0.000000e+00> : vector<8x128xf32>
    %97 = tpu.matmul %89, %7, %cst_35 {dimension_numbers = #tpu.dot_dimension_numbers<[1], [0], [0], [1], [0, 0, 1, 1], [], []>} : vector<8x32xf32>, vector<32x128xf32>, vector<8x128xf32> -> vector<8x128xf32>
    %98 = arith.addf %96, %97 : vector<8x128xf32>
    %99 = vector.broadcast %3 : vector<1x128xf32> to vector<8x128xf32>
    %100 = arith.mulf %98, %99 : vector<8x128xf32>
    %101 = math.tanh %100 : vector<8x128xf32>
    %102 = vector.broadcast %3 : vector<1x128xf32> to vector<8x128xf32>
    %103 = arith.mulf %101, %102 : vector<8x128xf32>
    %104 = vector.broadcast %4 : vector<1x128xf32> to vector<8x128xf32>
    %105 = arith.addf %103, %104 : vector<8x128xf32>
    %106 = vector.extract_strided_slice %105 {offsets = [0, 0], sizes = [8, 32], strides = [1, 1]} : vector<8x128xf32> to vector<8x32xf32>
    %107 = vector.extract_strided_slice %105 {offsets = [0, 32], sizes = [8, 32], strides = [1, 1]} : vector<8x128xf32> to vector<8x32xf32>
    %108 = vector.extract_strided_slice %105 {offsets = [0, 64], sizes = [8, 32], strides = [1, 1]} : vector<8x128xf32> to vector<8x32xf32>
    %109 = vector.extract_strided_slice %105 {offsets = [0, 96], sizes = [8, 32], strides = [1, 1]} : vector<8x128xf32> to vector<8x32xf32>
    %110 = arith.mulf %107, %87 : vector<8x32xf32>
    %111 = arith.mulf %106, %108 : vector<8x32xf32>
    %112 = arith.addf %110, %111 : vector<8x32xf32>
    %113 = math.tanh %112 : vector<8x32xf32>
    %114 = arith.mulf %109, %113 : vector<8x32xf32>
    %115 = arith.index_cast %c3_i32 : i32 to index
    %c0_36 = arith.constant 0 : index
    %c0_37 = arith.constant 0 : index
    %116 = vector.load %arg11[%115, %c0_36, %c0_37] : memref<8x8x32xf32, #tpu.memory_space<vmem>>, vector<1x8x32xf32>
    %117 = vector.shape_cast %116 : vector<1x8x32xf32> to vector<8x32xf32>
    %118 = vector.shape_cast %114 : vector<8x32xf32> to vector<1x8x32xf32>
    tpu.vector_store %arg11[%115, %c0_36, %c0_37], %118 {strides = array<i32>} : memref<8x8x32xf32, #tpu.memory_space<vmem>>, vector<1x8x32xf32>,
    %c4_i32 = arith.constant 4 : i32
    %119 = arith.index_cast %c4_i32 : i32 to index
    %c0_38 = arith.constant 0 : index
    %c0_39 = arith.constant 0 : index
    %120 = vector.load %arg10[%119, %c0_38, %c0_39] : memref<8x8x128xf32, #tpu.memory_space<vmem>>, vector<1x8x128xf32>
    %121 = vector.shape_cast %120 : vector<1x8x128xf32> to vector<8x128xf32>
    %cst_40 = arith.constant dense<0.000000e+00> : vector<8x128xf32>
    %122 = tpu.matmul %114, %7, %cst_40 {dimension_numbers = #tpu.dot_dimension_numbers<[1], [0], [0], [1], [0, 0, 1, 1], [], []>} : vector<8x32xf32>, vector<32x128xf32>, vector<8x128xf32> -> vector<8x128xf32>
    %123 = arith.addf %121, %122 : vector<8x128xf32>
    %124 = vector.broadcast %3 : vector<1x128xf32> to vector<8x128xf32>
    %125 = arith.mulf %123, %124 : vector<8x128xf32>
    %126 = math.tanh %125 : vector<8x128xf32>
    %127 = vector.broadcast %3 : vector<1x128xf32> to vector<8x128xf32>
    %128 = arith.mulf %126, %127 : vector<8x128xf32>
    %129 = vector.broadcast %4 : vector<1x128xf32> to vector<8x128xf32>
    %130 = arith.addf %128, %129 : vector<8x128xf32>
    %131 = vector.extract_strided_slice %130 {offsets = [0, 0], sizes = [8, 32], strides = [1, 1]} : vector<8x128xf32> to vector<8x32xf32>
    %132 = vector.extract_strided_slice %130 {offsets = [0, 32], sizes = [8, 32], strides = [1, 1]} : vector<8x128xf32> to vector<8x32xf32>
    %133 = vector.extract_strided_slice %130 {offsets = [0, 64], sizes = [8, 32], strides = [1, 1]} : vector<8x128xf32> to vector<8x32xf32>
    %134 = vector.extract_strided_slice %130 {offsets = [0, 96], sizes = [8, 32], strides = [1, 1]} : vector<8x128xf32> to vector<8x32xf32>
    %135 = arith.mulf %132, %112 : vector<8x32xf32>
    %136 = arith.mulf %131, %133 : vector<8x32xf32>
    %137 = arith.addf %135, %136 : vector<8x32xf32>
    %138 = math.tanh %137 : vector<8x32xf32>
    %139 = arith.mulf %134, %138 : vector<8x32xf32>
    %140 = arith.index_cast %c4_i32 : i32 to index
    %c0_41 = arith.constant 0 : index
    %c0_42 = arith.constant 0 : index
    %141 = vector.load %arg11[%140, %c0_41, %c0_42] : memref<8x8x32xf32, #tpu.memory_space<vmem>>, vector<1x8x32xf32>
    %142 = vector.shape_cast %141 : vector<1x8x32xf32> to vector<8x32xf32>
    %143 = vector.shape_cast %139 : vector<8x32xf32> to vector<1x8x32xf32>
    tpu.vector_store %arg11[%140, %c0_41, %c0_42], %143 {strides = array<i32>} : memref<8x8x32xf32, #tpu.memory_space<vmem>>, vector<1x8x32xf32>,
    %c5_i32 = arith.constant 5 : i32
    %144 = arith.index_cast %c5_i32 : i32 to index
    %c0_43 = arith.constant 0 : index
    %c0_44 = arith.constant 0 : index
    %145 = vector.load %arg10[%144, %c0_43, %c0_44] : memref<8x8x128xf32, #tpu.memory_space<vmem>>, vector<1x8x128xf32>
    %146 = vector.shape_cast %145 : vector<1x8x128xf32> to vector<8x128xf32>
    %cst_45 = arith.constant dense<0.000000e+00> : vector<8x128xf32>
    %147 = tpu.matmul %139, %7, %cst_45 {dimension_numbers = #tpu.dot_dimension_numbers<[1], [0], [0], [1], [0, 0, 1, 1], [], []>} : vector<8x32xf32>, vector<32x128xf32>, vector<8x128xf32> -> vector<8x128xf32>
    %148 = arith.addf %146, %147 : vector<8x128xf32>
    %149 = vector.broadcast %3 : vector<1x128xf32> to vector<8x128xf32>
    %150 = arith.mulf %148, %149 : vector<8x128xf32>
    %151 = math.tanh %150 : vector<8x128xf32>
    %152 = vector.broadcast %3 : vector<1x128xf32> to vector<8x128xf32>
    %153 = arith.mulf %151, %152 : vector<8x128xf32>
    %154 = vector.broadcast %4 : vector<1x128xf32> to vector<8x128xf32>
    %155 = arith.addf %153, %154 : vector<8x128xf32>
    %156 = vector.extract_strided_slice %155 {offsets = [0, 0], sizes = [8, 32], strides = [1, 1]} : vector<8x128xf32> to vector<8x32xf32>
    %157 = vector.extract_strided_slice %155 {offsets = [0, 32], sizes = [8, 32], strides = [1, 1]} : vector<8x128xf32> to vector<8x32xf32>
    %158 = vector.extract_strided_slice %155 {offsets = [0, 64], sizes = [8, 32], strides = [1, 1]} : vector<8x128xf32> to vector<8x32xf32>
    %159 = vector.extract_strided_slice %155 {offsets = [0, 96], sizes = [8, 32], strides = [1, 1]} : vector<8x128xf32> to vector<8x32xf32>
    %160 = arith.mulf %157, %137 : vector<8x32xf32>
    %161 = arith.mulf %156, %158 : vector<8x32xf32>
    %162 = arith.addf %160, %161 : vector<8x32xf32>
    %163 = math.tanh %162 : vector<8x32xf32>
    %164 = arith.mulf %159, %163 : vector<8x32xf32>
    %165 = arith.index_cast %c5_i32 : i32 to index
    %c0_46 = arith.constant 0 : index
    %c0_47 = arith.constant 0 : index
    %166 = vector.load %arg11[%165, %c0_46, %c0_47] : memref<8x8x32xf32, #tpu.memory_space<vmem>>, vector<1x8x32xf32>
    %167 = vector.shape_cast %166 : vector<1x8x32xf32> to vector<8x32xf32>
    %168 = vector.shape_cast %164 : vector<8x32xf32> to vector<1x8x32xf32>
    tpu.vector_store %arg11[%165, %c0_46, %c0_47], %168 {strides = array<i32>} : memref<8x8x32xf32, #tpu.memory_space<vmem>>, vector<1x8x32xf32>,
    %c6_i32 = arith.constant 6 : i32
    %169 = arith.index_cast %c6_i32 : i32 to index
    %c0_48 = arith.constant 0 : index
    %c0_49 = arith.constant 0 : index
    %170 = vector.load %arg10[%169, %c0_48, %c0_49] : memref<8x8x128xf32, #tpu.memory_space<vmem>>, vector<1x8x128xf32>
    %171 = vector.shape_cast %170 : vector<1x8x128xf32> to vector<8x128xf32>
    %cst_50 = arith.constant dense<0.000000e+00> : vector<8x128xf32>
    %172 = tpu.matmul %164, %7, %cst_50 {dimension_numbers = #tpu.dot_dimension_numbers<[1], [0], [0], [1], [0, 0, 1, 1], [], []>} : vector<8x32xf32>, vector<32x128xf32>, vector<8x128xf32> -> vector<8x128xf32>
    %173 = arith.addf %171, %172 : vector<8x128xf32>
    %174 = vector.broadcast %3 : vector<1x128xf32> to vector<8x128xf32>
    %175 = arith.mulf %173, %174 : vector<8x128xf32>
    %176 = math.tanh %175 : vector<8x128xf32>
    %177 = vector.broadcast %3 : vector<1x128xf32> to vector<8x128xf32>
    %178 = arith.mulf %176, %177 : vector<8x128xf32>
    %179 = vector.broadcast %4 : vector<1x128xf32> to vector<8x128xf32>
    %180 = arith.addf %178, %179 : vector<8x128xf32>
    %181 = vector.extract_strided_slice %180 {offsets = [0, 0], sizes = [8, 32], strides = [1, 1]} : vector<8x128xf32> to vector<8x32xf32>
    %182 = vector.extract_strided_slice %180 {offsets = [0, 32], sizes = [8, 32], strides = [1, 1]} : vector<8x128xf32> to vector<8x32xf32>
    %183 = vector.extract_strided_slice %180 {offsets = [0, 64], sizes = [8, 32], strides = [1, 1]} : vector<8x128xf32> to vector<8x32xf32>
    %184 = vector.extract_strided_slice %180 {offsets = [0, 96], sizes = [8, 32], strides = [1, 1]} : vector<8x128xf32> to vector<8x32xf32>
    %185 = arith.mulf %182, %162 : vector<8x32xf32>
    %186 = arith.mulf %181, %183 : vector<8x32xf32>
    %187 = arith.addf %185, %186 : vector<8x32xf32>
    %188 = math.tanh %187 : vector<8x32xf32>
    %189 = arith.mulf %184, %188 : vector<8x32xf32>
    %190 = arith.index_cast %c6_i32 : i32 to index
    %c0_51 = arith.constant 0 : index
    %c0_52 = arith.constant 0 : index
    %191 = vector.load %arg11[%190, %c0_51, %c0_52] : memref<8x8x32xf32, #tpu.memory_space<vmem>>, vector<1x8x32xf32>
    %192 = vector.shape_cast %191 : vector<1x8x32xf32> to vector<8x32xf32>
    %193 = vector.shape_cast %189 : vector<8x32xf32> to vector<1x8x32xf32>
    tpu.vector_store %arg11[%190, %c0_51, %c0_52], %193 {strides = array<i32>} : memref<8x8x32xf32, #tpu.memory_space<vmem>>, vector<1x8x32xf32>,
    %c7_i32 = arith.constant 7 : i32
    %194 = arith.index_cast %c7_i32 : i32 to index
    %c0_53 = arith.constant 0 : index
    %c0_54 = arith.constant 0 : index
    %195 = vector.load %arg10[%194, %c0_53, %c0_54] : memref<8x8x128xf32, #tpu.memory_space<vmem>>, vector<1x8x128xf32>
    %196 = vector.shape_cast %195 : vector<1x8x128xf32> to vector<8x128xf32>
    %cst_55 = arith.constant dense<0.000000e+00> : vector<8x128xf32>
    %197 = tpu.matmul %189, %7, %cst_55 {dimension_numbers = #tpu.dot_dimension_numbers<[1], [0], [0], [1], [0, 0, 1, 1], [], []>} : vector<8x32xf32>, vector<32x128xf32>, vector<8x128xf32> -> vector<8x128xf32>
    %198 = arith.addf %196, %197 : vector<8x128xf32>
    %199 = vector.broadcast %3 : vector<1x128xf32> to vector<8x128xf32>
    %200 = arith.mulf %198, %199 : vector<8x128xf32>
    %201 = math.tanh %200 : vector<8x128xf32>
    %202 = vector.broadcast %3 : vector<1x128xf32> to vector<8x128xf32>
    %203 = arith.mulf %201, %202 : vector<8x128xf32>
    %204 = vector.broadcast %4 : vector<1x128xf32> to vector<8x128xf32>
    %205 = arith.addf %203, %204 : vector<8x128xf32>
    %206 = vector.extract_strided_slice %205 {offsets = [0, 0], sizes = [8, 32], strides = [1, 1]} : vector<8x128xf32> to vector<8x32xf32>
    %207 = vector.extract_strided_slice %205 {offsets = [0, 32], sizes = [8, 32], strides = [1, 1]} : vector<8x128xf32> to vector<8x32xf32>
    %208 = vector.extract_strided_slice %205 {offsets = [0, 64], sizes = [8, 32], strides = [1, 1]} : vector<8x128xf32> to vector<8x32xf32>
    %209 = vector.extract_strided_slice %205 {offsets = [0, 96], sizes = [8, 32], strides = [1, 1]} : vector<8x128xf32> to vector<8x32xf32>
    %210 = arith.mulf %207, %187 : vector<8x32xf32>
    %211 = arith.mulf %206, %208 : vector<8x32xf32>
    %212 = arith.addf %210, %211 : vector<8x32xf32>
    %213 = math.tanh %212 : vector<8x32xf32>
    %214 = arith.mulf %209, %213 : vector<8x32xf32>
    %215 = arith.index_cast %c7_i32 : i32 to index
    %c0_56 = arith.constant 0 : index
    %c0_57 = arith.constant 0 : index
    %216 = vector.load %arg11[%215, %c0_56, %c0_57] : memref<8x8x32xf32, #tpu.memory_space<vmem>>, vector<1x8x32xf32>
    %217 = vector.shape_cast %216 : vector<1x8x32xf32> to vector<8x32xf32>
    %218 = vector.shape_cast %214 : vector<8x32xf32> to vector<1x8x32xf32>
    tpu.vector_store %arg11[%215, %c0_56, %c0_57], %218 {strides = array<i32>} : memref<8x8x32xf32, #tpu.memory_space<vmem>>, vector<1x8x32xf32>,
    %c8_i32 = arith.constant 8 : i32
    %c0_58 = arith.constant 0 : index
    %c0_59 = arith.constant 0 : index
    %c0_60 = arith.constant 0 : index
    %219 = vector.load %arg3[%c0_58, %c0_59, %c0_60] : memref<5x32x128xf32, #tpu.memory_space<vmem>>, vector<1x32x128xf32>
    %220 = vector.shape_cast %219 : vector<1x32x128xf32> to vector<32x128xf32>
    %c1 = arith.constant 1 : index
    %c0_61 = arith.constant 0 : index
    %c0_62 = arith.constant 0 : index
    %221 = vector.load %arg4[%c1, %c0_61, %c0_62] : memref<6x32x128xf32, #tpu.memory_space<vmem>>, vector<1x32x128xf32>
    %222 = vector.shape_cast %221 : vector<1x32x128xf32> to vector<32x128xf32>
    %c1_63 = arith.constant 1 : index
    %c0_64 = arith.constant 0 : index
    %c0_65 = arith.constant 0 : index
    %223 = vector.load %arg5[%c1_63, %c0_64, %c0_65] : memref<6x1x128xf32, #tpu.memory_space<vmem>>, vector<1x1x128xf32>
    %224 = vector.shape_cast %223 : vector<1x1x128xf32> to vector<1x128xf32>
    %c0_66 = arith.constant 0 : index
    %c0_67 = arith.constant 0 : index
    %c0_68 = arith.constant 0 : index
    %225 = vector.load %arg11[%c0_66, %c0_67, %c0_68] : memref<8x8x32xf32, #tpu.memory_space<vmem>>, vector<8x8x32xf32>
    %226 = vector.shape_cast %225 : vector<8x8x32xf32> to vector<64x32xf32>
    %cst_69 = arith.constant dense<0.000000e+00> : vector<64x128xf32>
    %227 = tpu.matmul %226, %220, %cst_69 {dimension_numbers = #tpu.dot_dimension_numbers<[1], [0], [0], [1], [0, 0, 1, 1], [], []>} : vector<64x32xf32>, vector<32x128xf32>, vector<64x128xf32> -> vector<64x128xf32>
    %228 = vector.broadcast %224 : vector<1x128xf32> to vector<64x128xf32>
    %229 = arith.addf %227, %228 : vector<64x128xf32>
    %230 = vector.shape_cast %229 : vector<64x128xf32> to vector<8x8x128xf32>
    %c0_70 = arith.constant 0 : index
    %c0_71 = arith.constant 0 : index
    %c0_72 = arith.constant 0 : index
    %231 = vector.load %arg10[%c0_70, %c0_71, %c0_72] : memref<8x8x128xf32, #tpu.memory_space<vmem>>, vector<8x8x128xf32>
    tpu.vector_store %arg10[%c0_70, %c0_71, %c0_72], %230 {strides = array<i32>} : memref<8x8x128xf32, #tpu.memory_space<vmem>>, vector<8x8x128xf32>,
    %cst_73 = arith.constant 0.000000e+00 : f32
    %232 = vector.broadcast %cst_73 : f32 to vector<8x32xf32>
    %cst_74 = arith.constant 0.000000e+00 : f32
    %233 = vector.broadcast %cst_74 : f32 to vector<8x32xf32>
    %c0_i32_75 = arith.constant 0 : i32
    %234 = arith.index_cast %c0_i32_75 : i32 to index
    %c0_76 = arith.constant 0 : index
    %c0_77 = arith.constant 0 : index
    %235 = vector.load %arg10[%234, %c0_76, %c0_77] : memref<8x8x128xf32, #tpu.memory_space<vmem>>, vector<1x8x128xf32>
    %236 = vector.shape_cast %235 : vector<1x8x128xf32> to vector<8x128xf32>
    %cst_78 = arith.constant dense<0.000000e+00> : vector<8x128xf32>
    %237 = tpu.matmul %232, %222, %cst_78 {dimension_numbers = #tpu.dot_dimension_numbers<[1], [0], [0], [1], [0, 0, 1, 1], [], []>} : vector<8x32xf32>, vector<32x128xf32>, vector<8x128xf32> -> vector<8x128xf32>
    %238 = arith.addf %236, %237 : vector<8x128xf32>
    %239 = vector.broadcast %3 : vector<1x128xf32> to vector<8x128xf32>
    %240 = arith.mulf %238, %239 : vector<8x128xf32>
    %241 = math.tanh %240 : vector<8x128xf32>
    %242 = vector.broadcast %3 : vector<1x128xf32> to vector<8x128xf32>
    %243 = arith.mulf %241, %242 : vector<8x128xf32>
    %244 = vector.broadcast %4 : vector<1x128xf32> to vector<8x128xf32>
    %245 = arith.addf %243, %244 : vector<8x128xf32>
    %246 = vector.extract_strided_slice %245 {offsets = [0, 0], sizes = [8, 32], strides = [1, 1]} : vector<8x128xf32> to vector<8x32xf32>
    %247 = vector.extract_strided_slice %245 {offsets = [0, 32], sizes = [8, 32], strides = [1, 1]} : vector<8x128xf32> to vector<8x32xf32>
    %248 = vector.extract_strided_slice %245 {offsets = [0, 64], sizes = [8, 32], strides = [1, 1]} : vector<8x128xf32> to vector<8x32xf32>
    %249 = vector.extract_strided_slice %245 {offsets = [0, 96], sizes = [8, 32], strides = [1, 1]} : vector<8x128xf32> to vector<8x32xf32>
    %250 = arith.mulf %247, %233 : vector<8x32xf32>
    %251 = arith.mulf %246, %248 : vector<8x32xf32>
    %252 = arith.addf %250, %251 : vector<8x32xf32>
    %253 = math.tanh %252 : vector<8x32xf32>
    %254 = arith.mulf %249, %253 : vector<8x32xf32>
    %255 = arith.index_cast %c0_i32_75 : i32 to index
    %c0_79 = arith.constant 0 : index
    %c0_80 = arith.constant 0 : index
    %256 = vector.load %arg11[%255, %c0_79, %c0_80] : memref<8x8x32xf32, #tpu.memory_space<vmem>>, vector<1x8x32xf32>
    %257 = vector.shape_cast %256 : vector<1x8x32xf32> to vector<8x32xf32>
    %258 = vector.shape_cast %254 : vector<8x32xf32> to vector<1x8x32xf32>
    tpu.vector_store %arg11[%255, %c0_79, %c0_80], %258 {strides = array<i32>} : memref<8x8x32xf32, #tpu.memory_space<vmem>>, vector<1x8x32xf32>,
    %c1_i32_81 = arith.constant 1 : i32
    %259 = arith.index_cast %c1_i32_81 : i32 to index
    %c0_82 = arith.constant 0 : index
    %c0_83 = arith.constant 0 : index
    %260 = vector.load %arg10[%259, %c0_82, %c0_83] : memref<8x8x128xf32, #tpu.memory_space<vmem>>, vector<1x8x128xf32>
    %261 = vector.shape_cast %260 : vector<1x8x128xf32> to vector<8x128xf32>
    %cst_84 = arith.constant dense<0.000000e+00> : vector<8x128xf32>
    %262 = tpu.matmul %254, %222, %cst_84 {dimension_numbers = #tpu.dot_dimension_numbers<[1], [0], [0], [1], [0, 0, 1, 1], [], []>} : vector<8x32xf32>, vector<32x128xf32>, vector<8x128xf32> -> vector<8x128xf32>
    %263 = arith.addf %261, %262 : vector<8x128xf32>
    %264 = vector.broadcast %3 : vector<1x128xf32> to vector<8x128xf32>
    %265 = arith.mulf %263, %264 : vector<8x128xf32>
    %266 = math.tanh %265 : vector<8x128xf32>
    %267 = vector.broadcast %3 : vector<1x128xf32> to vector<8x128xf32>
    %268 = arith.mulf %266, %267 : vector<8x128xf32>
    %269 = vector.broadcast %4 : vector<1x128xf32> to vector<8x128xf32>
    %270 = arith.addf %268, %269 : vector<8x128xf32>
    %271 = vector.extract_strided_slice %270 {offsets = [0, 0], sizes = [8, 32], strides = [1, 1]} : vector<8x128xf32> to vector<8x32xf32>
    %272 = vector.extract_strided_slice %270 {offsets = [0, 32], sizes = [8, 32], strides = [1, 1]} : vector<8x128xf32> to vector<8x32xf32>
    %273 = vector.extract_strided_slice %270 {offsets = [0, 64], sizes = [8, 32], strides = [1, 1]} : vector<8x128xf32> to vector<8x32xf32>
    %274 = vector.extract_strided_slice %270 {offsets = [0, 96], sizes = [8, 32], strides = [1, 1]} : vector<8x128xf32> to vector<8x32xf32>
    %275 = arith.mulf %272, %252 : vector<8x32xf32>
    %276 = arith.mulf %271, %273 : vector<8x32xf32>
    %277 = arith.addf %275, %276 : vector<8x32xf32>
    %278 = math.tanh %277 : vector<8x32xf32>
    %279 = arith.mulf %274, %278 : vector<8x32xf32>
    %280 = arith.index_cast %c1_i32_81 : i32 to index
    %c0_85 = arith.constant 0 : index
    %c0_86 = arith.constant 0 : index
    %281 = vector.load %arg11[%280, %c0_85, %c0_86] : memref<8x8x32xf32, #tpu.memory_space<vmem>>, vector<1x8x32xf32>
    %282 = vector.shape_cast %281 : vector<1x8x32xf32> to vector<8x32xf32>
    %283 = vector.shape_cast %279 : vector<8x32xf32> to vector<1x8x32xf32>
    tpu.vector_store %arg11[%280, %c0_85, %c0_86], %283 {strides = array<i32>} : memref<8x8x32xf32, #tpu.memory_space<vmem>>, vector<1x8x32xf32>,
    %c2_i32_87 = arith.constant 2 : i32
    %284 = arith.index_cast %c2_i32_87 : i32 to index
    %c0_88 = arith.constant 0 : index
    %c0_89 = arith.constant 0 : index
    %285 = vector.load %arg10[%284, %c0_88, %c0_89] : memref<8x8x128xf32, #tpu.memory_space<vmem>>, vector<1x8x128xf32>
    %286 = vector.shape_cast %285 : vector<1x8x128xf32> to vector<8x128xf32>
    %cst_90 = arith.constant dense<0.000000e+00> : vector<8x128xf32>
    %287 = tpu.matmul %279, %222, %cst_90 {dimension_numbers = #tpu.dot_dimension_numbers<[1], [0], [0], [1], [0, 0, 1, 1], [], []>} : vector<8x32xf32>, vector<32x128xf32>, vector<8x128xf32> -> vector<8x128xf32>
    %288 = arith.addf %286, %287 : vector<8x128xf32>
    %289 = vector.broadcast %3 : vector<1x128xf32> to vector<8x128xf32>
    %290 = arith.mulf %288, %289 : vector<8x128xf32>
    %291 = math.tanh %290 : vector<8x128xf32>
    %292 = vector.broadcast %3 : vector<1x128xf32> to vector<8x128xf32>
    %293 = arith.mulf %291, %292 : vector<8x128xf32>
    %294 = vector.broadcast %4 : vector<1x128xf32> to vector<8x128xf32>
    %295 = arith.addf %293, %294 : vector<8x128xf32>
    %296 = vector.extract_strided_slice %295 {offsets = [0, 0], sizes = [8, 32], strides = [1, 1]} : vector<8x128xf32> to vector<8x32xf32>
    %297 = vector.extract_strided_slice %295 {offsets = [0, 32], sizes = [8, 32], strides = [1, 1]} : vector<8x128xf32> to vector<8x32xf32>
    %298 = vector.extract_strided_slice %295 {offsets = [0, 64], sizes = [8, 32], strides = [1, 1]} : vector<8x128xf32> to vector<8x32xf32>
    %299 = vector.extract_strided_slice %295 {offsets = [0, 96], sizes = [8, 32], strides = [1, 1]} : vector<8x128xf32> to vector<8x32xf32>
    %300 = arith.mulf %297, %277 : vector<8x32xf32>
    %301 = arith.mulf %296, %298 : vector<8x32xf32>
    %302 = arith.addf %300, %301 : vector<8x32xf32>
    %303 = math.tanh %302 : vector<8x32xf32>
    %304 = arith.mulf %299, %303 : vector<8x32xf32>
    %305 = arith.index_cast %c2_i32_87 : i32 to index
    %c0_91 = arith.constant 0 : index
    %c0_92 = arith.constant 0 : index
    %306 = vector.load %arg11[%305, %c0_91, %c0_92] : memref<8x8x32xf32, #tpu.memory_space<vmem>>, vector<1x8x32xf32>
    %307 = vector.shape_cast %306 : vector<1x8x32xf32> to vector<8x32xf32>
    %308 = vector.shape_cast %304 : vector<8x32xf32> to vector<1x8x32xf32>
    tpu.vector_store %arg11[%305, %c0_91, %c0_92], %308 {strides = array<i32>} : memref<8x8x32xf32, #tpu.memory_space<vmem>>, vector<1x8x32xf32>,
    %c3_i32_93 = arith.constant 3 : i32
    %309 = arith.index_cast %c3_i32_93 : i32 to index
    %c0_94 = arith.constant 0 : index
    %c0_95 = arith.constant 0 : index
    %310 = vector.load %arg10[%309, %c0_94, %c0_95] : memref<8x8x128xf32, #tpu.memory_space<vmem>>, vector<1x8x128xf32>
    %311 = vector.shape_cast %310 : vector<1x8x128xf32> to vector<8x128xf32>
    %cst_96 = arith.constant dense<0.000000e+00> : vector<8x128xf32>
    %312 = tpu.matmul %304, %222, %cst_96 {dimension_numbers = #tpu.dot_dimension_numbers<[1], [0], [0], [1], [0, 0, 1, 1], [], []>} : vector<8x32xf32>, vector<32x128xf32>, vector<8x128xf32> -> vector<8x128xf32>
    %313 = arith.addf %311, %312 : vector<8x128xf32>
    %314 = vector.broadcast %3 : vector<1x128xf32> to vector<8x128xf32>
    %315 = arith.mulf %313, %314 : vector<8x128xf32>
    %316 = math.tanh %315 : vector<8x128xf32>
    %317 = vector.broadcast %3 : vector<1x128xf32> to vector<8x128xf32>
    %318 = arith.mulf %316, %317 : vector<8x128xf32>
    %319 = vector.broadcast %4 : vector<1x128xf32> to vector<8x128xf32>
    %320 = arith.addf %318, %319 : vector<8x128xf32>
    %321 = vector.extract_strided_slice %320 {offsets = [0, 0], sizes = [8, 32], strides = [1, 1]} : vector<8x128xf32> to vector<8x32xf32>
    %322 = vector.extract_strided_slice %320 {offsets = [0, 32], sizes = [8, 32], strides = [1, 1]} : vector<8x128xf32> to vector<8x32xf32>
    %323 = vector.extract_strided_slice %320 {offsets = [0, 64], sizes = [8, 32], strides = [1, 1]} : vector<8x128xf32> to vector<8x32xf32>
    %324 = vector.extract_strided_slice %320 {offsets = [0, 96], sizes = [8, 32], strides = [1, 1]} : vector<8x128xf32> to vector<8x32xf32>
    %325 = arith.mulf %322, %302 : vector<8x32xf32>
    %326 = arith.mulf %321, %323 : vector<8x32xf32>
    %327 = arith.addf %325, %326 : vector<8x32xf32>
    %328 = math.tanh %327 : vector<8x32xf32>
    %329 = arith.mulf %324, %328 : vector<8x32xf32>
    %330 = arith.index_cast %c3_i32_93 : i32 to index
    %c0_97 = arith.constant 0 : index
    %c0_98 = arith.constant 0 : index
    %331 = vector.load %arg11[%330, %c0_97, %c0_98] : memref<8x8x32xf32, #tpu.memory_space<vmem>>, vector<1x8x32xf32>
    %332 = vector.shape_cast %331 : vector<1x8x32xf32> to vector<8x32xf32>
    %333 = vector.shape_cast %329 : vector<8x32xf32> to vector<1x8x32xf32>
    tpu.vector_store %arg11[%330, %c0_97, %c0_98], %333 {strides = array<i32>} : memref<8x8x32xf32, #tpu.memory_space<vmem>>, vector<1x8x32xf32>,
    %c4_i32_99 = arith.constant 4 : i32
    %334 = arith.index_cast %c4_i32_99 : i32 to index
    %c0_100 = arith.constant 0 : index
    %c0_101 = arith.constant 0 : index
    %335 = vector.load %arg10[%334, %c0_100, %c0_101] : memref<8x8x128xf32, #tpu.memory_space<vmem>>, vector<1x8x128xf32>
    %336 = vector.shape_cast %335 : vector<1x8x128xf32> to vector<8x128xf32>
    %cst_102 = arith.constant dense<0.000000e+00> : vector<8x128xf32>
    %337 = tpu.matmul %329, %222, %cst_102 {dimension_numbers = #tpu.dot_dimension_numbers<[1], [0], [0], [1], [0, 0, 1, 1], [], []>} : vector<8x32xf32>, vector<32x128xf32>, vector<8x128xf32> -> vector<8x128xf32>
    %338 = arith.addf %336, %337 : vector<8x128xf32>
    %339 = vector.broadcast %3 : vector<1x128xf32> to vector<8x128xf32>
    %340 = arith.mulf %338, %339 : vector<8x128xf32>
    %341 = math.tanh %340 : vector<8x128xf32>
    %342 = vector.broadcast %3 : vector<1x128xf32> to vector<8x128xf32>
    %343 = arith.mulf %341, %342 : vector<8x128xf32>
    %344 = vector.broadcast %4 : vector<1x128xf32> to vector<8x128xf32>
    %345 = arith.addf %343, %344 : vector<8x128xf32>
    %346 = vector.extract_strided_slice %345 {offsets = [0, 0], sizes = [8, 32], strides = [1, 1]} : vector<8x128xf32> to vector<8x32xf32>
    %347 = vector.extract_strided_slice %345 {offsets = [0, 32], sizes = [8, 32], strides = [1, 1]} : vector<8x128xf32> to vector<8x32xf32>
    %348 = vector.extract_strided_slice %345 {offsets = [0, 64], sizes = [8, 32], strides = [1, 1]} : vector<8x128xf32> to vector<8x32xf32>
    %349 = vector.extract_strided_slice %345 {offsets = [0, 96], sizes = [8, 32], strides = [1, 1]} : vector<8x128xf32> to vector<8x32xf32>
    %350 = arith.mulf %347, %327 : vector<8x32xf32>
    %351 = arith.mulf %346, %348 : vector<8x32xf32>
    %352 = arith.addf %350, %351 : vector<8x32xf32>
    %353 = math.tanh %352 : vector<8x32xf32>
    %354 = arith.mulf %349, %353 : vector<8x32xf32>
    %355 = arith.index_cast %c4_i32_99 : i32 to index
    %c0_103 = arith.constant 0 : index
    %c0_104 = arith.constant 0 : index
    %356 = vector.load %arg11[%355, %c0_103, %c0_104] : memref<8x8x32xf32, #tpu.memory_space<vmem>>, vector<1x8x32xf32>
    %357 = vector.shape_cast %356 : vector<1x8x32xf32> to vector<8x32xf32>
    %358 = vector.shape_cast %354 : vector<8x32xf32> to vector<1x8x32xf32>
    tpu.vector_store %arg11[%355, %c0_103, %c0_104], %358 {strides = array<i32>} : memref<8x8x32xf32, #tpu.memory_space<vmem>>, vector<1x8x32xf32>,
    %c5_i32_105 = arith.constant 5 : i32
    %359 = arith.index_cast %c5_i32_105 : i32 to index
    %c0_106 = arith.constant 0 : index
    %c0_107 = arith.constant 0 : index
    %360 = vector.load %arg10[%359, %c0_106, %c0_107] : memref<8x8x128xf32, #tpu.memory_space<vmem>>, vector<1x8x128xf32>
    %361 = vector.shape_cast %360 : vector<1x8x128xf32> to vector<8x128xf32>
    %cst_108 = arith.constant dense<0.000000e+00> : vector<8x128xf32>
    %362 = tpu.matmul %354, %222, %cst_108 {dimension_numbers = #tpu.dot_dimension_numbers<[1], [0], [0], [1], [0, 0, 1, 1], [], []>} : vector<8x32xf32>, vector<32x128xf32>, vector<8x128xf32> -> vector<8x128xf32>
    %363 = arith.addf %361, %362 : vector<8x128xf32>
    %364 = vector.broadcast %3 : vector<1x128xf32> to vector<8x128xf32>
    %365 = arith.mulf %363, %364 : vector<8x128xf32>
    %366 = math.tanh %365 : vector<8x128xf32>
    %367 = vector.broadcast %3 : vector<1x128xf32> to vector<8x128xf32>
    %368 = arith.mulf %366, %367 : vector<8x128xf32>
    %369 = vector.broadcast %4 : vector<1x128xf32> to vector<8x128xf32>
    %370 = arith.addf %368, %369 : vector<8x128xf32>
    %371 = vector.extract_strided_slice %370 {offsets = [0, 0], sizes = [8, 32], strides = [1, 1]} : vector<8x128xf32> to vector<8x32xf32>
    %372 = vector.extract_strided_slice %370 {offsets = [0, 32], sizes = [8, 32], strides = [1, 1]} : vector<8x128xf32> to vector<8x32xf32>
    %373 = vector.extract_strided_slice %370 {offsets = [0, 64], sizes = [8, 32], strides = [1, 1]} : vector<8x128xf32> to vector<8x32xf32>
    %374 = vector.extract_strided_slice %370 {offsets = [0, 96], sizes = [8, 32], strides = [1, 1]} : vector<8x128xf32> to vector<8x32xf32>
    %375 = arith.mulf %372, %352 : vector<8x32xf32>
    %376 = arith.mulf %371, %373 : vector<8x32xf32>
    %377 = arith.addf %375, %376 : vector<8x32xf32>
    %378 = math.tanh %377 : vector<8x32xf32>
    %379 = arith.mulf %374, %378 : vector<8x32xf32>
    %380 = arith.index_cast %c5_i32_105 : i32 to index
    %c0_109 = arith.constant 0 : index
    %c0_110 = arith.constant 0 : index
    %381 = vector.load %arg11[%380, %c0_109, %c0_110] : memref<8x8x32xf32, #tpu.memory_space<vmem>>, vector<1x8x32xf32>
    %382 = vector.shape_cast %381 : vector<1x8x32xf32> to vector<8x32xf32>
    %383 = vector.shape_cast %379 : vector<8x32xf32> to vector<1x8x32xf32>
    tpu.vector_store %arg11[%380, %c0_109, %c0_110], %383 {strides = array<i32>} : memref<8x8x32xf32, #tpu.memory_space<vmem>>, vector<1x8x32xf32>,
    %c6_i32_111 = arith.constant 6 : i32
    %384 = arith.index_cast %c6_i32_111 : i32 to index
    %c0_112 = arith.constant 0 : index
    %c0_113 = arith.constant 0 : index
    %385 = vector.load %arg10[%384, %c0_112, %c0_113] : memref<8x8x128xf32, #tpu.memory_space<vmem>>, vector<1x8x128xf32>
    %386 = vector.shape_cast %385 : vector<1x8x128xf32> to vector<8x128xf32>
    %cst_114 = arith.constant dense<0.000000e+00> : vector<8x128xf32>
    %387 = tpu.matmul %379, %222, %cst_114 {dimension_numbers = #tpu.dot_dimension_numbers<[1], [0], [0], [1], [0, 0, 1, 1], [], []>} : vector<8x32xf32>, vector<32x128xf32>, vector<8x128xf32> -> vector<8x128xf32>
    %388 = arith.addf %386, %387 : vector<8x128xf32>
    %389 = vector.broadcast %3 : vector<1x128xf32> to vector<8x128xf32>
    %390 = arith.mulf %388, %389 : vector<8x128xf32>
    %391 = math.tanh %390 : vector<8x128xf32>
    %392 = vector.broadcast %3 : vector<1x128xf32> to vector<8x128xf32>
    %393 = arith.mulf %391, %392 : vector<8x128xf32>
    %394 = vector.broadcast %4 : vector<1x128xf32> to vector<8x128xf32>
    %395 = arith.addf %393, %394 : vector<8x128xf32>
    %396 = vector.extract_strided_slice %395 {offsets = [0, 0], sizes = [8, 32], strides = [1, 1]} : vector<8x128xf32> to vector<8x32xf32>
    %397 = vector.extract_strided_slice %395 {offsets = [0, 32], sizes = [8, 32], strides = [1, 1]} : vector<8x128xf32> to vector<8x32xf32>
    %398 = vector.extract_strided_slice %395 {offsets = [0, 64], sizes = [8, 32], strides = [1, 1]} : vector<8x128xf32> to vector<8x32xf32>
    %399 = vector.extract_strided_slice %395 {offsets = [0, 96], sizes = [8, 32], strides = [1, 1]} : vector<8x128xf32> to vector<8x32xf32>
    %400 = arith.mulf %397, %377 : vector<8x32xf32>
    %401 = arith.mulf %396, %398 : vector<8x32xf32>
    %402 = arith.addf %400, %401 : vector<8x32xf32>
    %403 = math.tanh %402 : vector<8x32xf32>
    %404 = arith.mulf %399, %403 : vector<8x32xf32>
    %405 = arith.index_cast %c6_i32_111 : i32 to index
    %c0_115 = arith.constant 0 : index
    %c0_116 = arith.constant 0 : index
    %406 = vector.load %arg11[%405, %c0_115, %c0_116] : memref<8x8x32xf32, #tpu.memory_space<vmem>>, vector<1x8x32xf32>
    %407 = vector.shape_cast %406 : vector<1x8x32xf32> to vector<8x32xf32>
    %408 = vector.shape_cast %404 : vector<8x32xf32> to vector<1x8x32xf32>
    tpu.vector_store %arg11[%405, %c0_115, %c0_116], %408 {strides = array<i32>} : memref<8x8x32xf32, #tpu.memory_space<vmem>>, vector<1x8x32xf32>,
    %c7_i32_117 = arith.constant 7 : i32
    %409 = arith.index_cast %c7_i32_117 : i32 to index
    %c0_118 = arith.constant 0 : index
    %c0_119 = arith.constant 0 : index
    %410 = vector.load %arg10[%409, %c0_118, %c0_119] : memref<8x8x128xf32, #tpu.memory_space<vmem>>, vector<1x8x128xf32>
    %411 = vector.shape_cast %410 : vector<1x8x128xf32> to vector<8x128xf32>
    %cst_120 = arith.constant dense<0.000000e+00> : vector<8x128xf32>
    %412 = tpu.matmul %404, %222, %cst_120 {dimension_numbers = #tpu.dot_dimension_numbers<[1], [0], [0], [1], [0, 0, 1, 1], [], []>} : vector<8x32xf32>, vector<32x128xf32>, vector<8x128xf32> -> vector<8x128xf32>
    %413 = arith.addf %411, %412 : vector<8x128xf32>
    %414 = vector.broadcast %3 : vector<1x128xf32> to vector<8x128xf32>
    %415 = arith.mulf %413, %414 : vector<8x128xf32>
    %416 = math.tanh %415 : vector<8x128xf32>
    %417 = vector.broadcast %3 : vector<1x128xf32> to vector<8x128xf32>
    %418 = arith.mulf %416, %417 : vector<8x128xf32>
    %419 = vector.broadcast %4 : vector<1x128xf32> to vector<8x128xf32>
    %420 = arith.addf %418, %419 : vector<8x128xf32>
    %421 = vector.extract_strided_slice %420 {offsets = [0, 0], sizes = [8, 32], strides = [1, 1]} : vector<8x128xf32> to vector<8x32xf32>
    %422 = vector.extract_strided_slice %420 {offsets = [0, 32], sizes = [8, 32], strides = [1, 1]} : vector<8x128xf32> to vector<8x32xf32>
    %423 = vector.extract_strided_slice %420 {offsets = [0, 64], sizes = [8, 32], strides = [1, 1]} : vector<8x128xf32> to vector<8x32xf32>
    %424 = vector.extract_strided_slice %420 {offsets = [0, 96], sizes = [8, 32], strides = [1, 1]} : vector<8x128xf32> to vector<8x32xf32>
    %425 = arith.mulf %422, %402 : vector<8x32xf32>
    %426 = arith.mulf %421, %423 : vector<8x32xf32>
    %427 = arith.addf %425, %426 : vector<8x32xf32>
    %428 = math.tanh %427 : vector<8x32xf32>
    %429 = arith.mulf %424, %428 : vector<8x32xf32>
    %430 = arith.index_cast %c7_i32_117 : i32 to index
    %c0_121 = arith.constant 0 : index
    %c0_122 = arith.constant 0 : index
    %431 = vector.load %arg11[%430, %c0_121, %c0_122] : memref<8x8x32xf32, #tpu.memory_space<vmem>>, vector<1x8x32xf32>
    %432 = vector.shape_cast %431 : vector<1x8x32xf32> to vector<8x32xf32>
    %433 = vector.shape_cast %429 : vector<8x32xf32> to vector<1x8x32xf32>
    tpu.vector_store %arg11[%430, %c0_121, %c0_122], %433 {strides = array<i32>} : memref<8x8x32xf32, #tpu.memory_space<vmem>>, vector<1x8x32xf32>,
    %c8_i32_123 = arith.constant 8 : i32
    %c1_124 = arith.constant 1 : index
    %c0_125 = arith.constant 0 : index
    %c0_126 = arith.constant 0 : index
    %434 = vector.load %arg3[%c1_124, %c0_125, %c0_126] : memref<5x32x128xf32, #tpu.memory_space<vmem>>, vector<1x32x128xf32>
    %435 = vector.shape_cast %434 : vector<1x32x128xf32> to vector<32x128xf32>
    %c2 = arith.constant 2 : index
    %c0_127 = arith.constant 0 : index
    %c0_128 = arith.constant 0 : index
    %436 = vector.load %arg4[%c2, %c0_127, %c0_128] : memref<6x32x128xf32, #tpu.memory_space<vmem>>, vector<1x32x128xf32>
    %437 = vector.shape_cast %436 : vector<1x32x128xf32> to vector<32x128xf32>
    %c2_129 = arith.constant 2 : index
    %c0_130 = arith.constant 0 : index
    %c0_131 = arith.constant 0 : index
    %438 = vector.load %arg5[%c2_129, %c0_130, %c0_131] : memref<6x1x128xf32, #tpu.memory_space<vmem>>, vector<1x1x128xf32>
    %439 = vector.shape_cast %438 : vector<1x1x128xf32> to vector<1x128xf32>
    %c0_132 = arith.constant 0 : index
    %c0_133 = arith.constant 0 : index
    %c0_134 = arith.constant 0 : index
    %440 = vector.load %arg11[%c0_132, %c0_133, %c0_134] : memref<8x8x32xf32, #tpu.memory_space<vmem>>, vector<8x8x32xf32>
    %441 = vector.shape_cast %440 : vector<8x8x32xf32> to vector<64x32xf32>
    %cst_135 = arith.constant dense<0.000000e+00> : vector<64x128xf32>
    %442 = tpu.matmul %441, %435, %cst_135 {dimension_numbers = #tpu.dot_dimension_numbers<[1], [0], [0], [1], [0, 0, 1, 1], [], []>} : vector<64x32xf32>, vector<32x128xf32>, vector<64x128xf32> -> vector<64x128xf32>
    %443 = vector.broadcast %439 : vector<1x128xf32> to vector<64x128xf32>
    %444 = arith.addf %442, %443 : vector<64x128xf32>
    %445 = vector.shape_cast %444 : vector<64x128xf32> to vector<8x8x128xf32>
    %c0_136 = arith.constant 0 : index
    %c0_137 = arith.constant 0 : index
    %c0_138 = arith.constant 0 : index
    %446 = vector.load %arg10[%c0_136, %c0_137, %c0_138] : memref<8x8x128xf32, #tpu.memory_space<vmem>>, vector<8x8x128xf32>
    tpu.vector_store %arg10[%c0_136, %c0_137, %c0_138], %445 {strides = array<i32>} : memref<8x8x128xf32, #tpu.memory_space<vmem>>, vector<8x8x128xf32>,
    %cst_139 = arith.constant 0.000000e+00 : f32
    %447 = vector.broadcast %cst_139 : f32 to vector<8x32xf32>
    %cst_140 = arith.constant 0.000000e+00 : f32
    %448 = vector.broadcast %cst_140 : f32 to vector<8x32xf32>
    %c0_i32_141 = arith.constant 0 : i32
    %449 = arith.index_cast %c0_i32_141 : i32 to index
    %c0_142 = arith.constant 0 : index
    %c0_143 = arith.constant 0 : index
    %450 = vector.load %arg10[%449, %c0_142, %c0_143] : memref<8x8x128xf32, #tpu.memory_space<vmem>>, vector<1x8x128xf32>
    %451 = vector.shape_cast %450 : vector<1x8x128xf32> to vector<8x128xf32>
    %cst_144 = arith.constant dense<0.000000e+00> : vector<8x128xf32>
    %452 = tpu.matmul %447, %437, %cst_144 {dimension_numbers = #tpu.dot_dimension_numbers<[1], [0], [0], [1], [0, 0, 1, 1], [], []>} : vector<8x32xf32>, vector<32x128xf32>, vector<8x128xf32> -> vector<8x128xf32>
    %453 = arith.addf %451, %452 : vector<8x128xf32>
    %454 = vector.broadcast %3 : vector<1x128xf32> to vector<8x128xf32>
    %455 = arith.mulf %453, %454 : vector<8x128xf32>
    %456 = math.tanh %455 : vector<8x128xf32>
    %457 = vector.broadcast %3 : vector<1x128xf32> to vector<8x128xf32>
    %458 = arith.mulf %456, %457 : vector<8x128xf32>
    %459 = vector.broadcast %4 : vector<1x128xf32> to vector<8x128xf32>
    %460 = arith.addf %458, %459 : vector<8x128xf32>
    %461 = vector.extract_strided_slice %460 {offsets = [0, 0], sizes = [8, 32], strides = [1, 1]} : vector<8x128xf32> to vector<8x32xf32>
    %462 = vector.extract_strided_slice %460 {offsets = [0, 32], sizes = [8, 32], strides = [1, 1]} : vector<8x128xf32> to vector<8x32xf32>
    %463 = vector.extract_strided_slice %460 {offsets = [0, 64], sizes = [8, 32], strides = [1, 1]} : vector<8x128xf32> to vector<8x32xf32>
    %464 = vector.extract_strided_slice %460 {offsets = [0, 96], sizes = [8, 32], strides = [1, 1]} : vector<8x128xf32> to vector<8x32xf32>
    %465 = arith.mulf %462, %448 : vector<8x32xf32>
    %466 = arith.mulf %461, %463 : vector<8x32xf32>
    %467 = arith.addf %465, %466 : vector<8x32xf32>
    %468 = math.tanh %467 : vector<8x32xf32>
    %469 = arith.mulf %464, %468 : vector<8x32xf32>
    %470 = arith.index_cast %c0_i32_141 : i32 to index
    %c0_145 = arith.constant 0 : index
    %c0_146 = arith.constant 0 : index
    %471 = vector.load %arg11[%470, %c0_145, %c0_146] : memref<8x8x32xf32, #tpu.memory_space<vmem>>, vector<1x8x32xf32>
    %472 = vector.shape_cast %471 : vector<1x8x32xf32> to vector<8x32xf32>
    %473 = vector.shape_cast %469 : vector<8x32xf32> to vector<1x8x32xf32>
    tpu.vector_store %arg11[%470, %c0_145, %c0_146], %473 {strides = array<i32>} : memref<8x8x32xf32, #tpu.memory_space<vmem>>, vector<1x8x32xf32>,
    %c1_i32_147 = arith.constant 1 : i32
    %474 = arith.index_cast %c1_i32_147 : i32 to index
    %c0_148 = arith.constant 0 : index
    %c0_149 = arith.constant 0 : index
    %475 = vector.load %arg10[%474, %c0_148, %c0_149] : memref<8x8x128xf32, #tpu.memory_space<vmem>>, vector<1x8x128xf32>
    %476 = vector.shape_cast %475 : vector<1x8x128xf32> to vector<8x128xf32>
    %cst_150 = arith.constant dense<0.000000e+00> : vector<8x128xf32>
    %477 = tpu.matmul %469, %437, %cst_150 {dimension_numbers = #tpu.dot_dimension_numbers<[1], [0], [0], [1], [0, 0, 1, 1], [], []>} : vector<8x32xf32>, vector<32x128xf32>, vector<8x128xf32> -> vector<8x128xf32>
    %478 = arith.addf %476, %477 : vector<8x128xf32>
    %479 = vector.broadcast %3 : vector<1x128xf32> to vector<8x128xf32>
    %480 = arith.mulf %478, %479 : vector<8x128xf32>
    %481 = math.tanh %480 : vector<8x128xf32>
    %482 = vector.broadcast %3 : vector<1x128xf32> to vector<8x128xf32>
    %483 = arith.mulf %481, %482 : vector<8x128xf32>
    %484 = vector.broadcast %4 : vector<1x128xf32> to vector<8x128xf32>
    %485 = arith.addf %483, %484 : vector<8x128xf32>
    %486 = vector.extract_strided_slice %485 {offsets = [0, 0], sizes = [8, 32], strides = [1, 1]} : vector<8x128xf32> to vector<8x32xf32>
    %487 = vector.extract_strided_slice %485 {offsets = [0, 32], sizes = [8, 32], strides = [1, 1]} : vector<8x128xf32> to vector<8x32xf32>
    %488 = vector.extract_strided_slice %485 {offsets = [0, 64], sizes = [8, 32], strides = [1, 1]} : vector<8x128xf32> to vector<8x32xf32>
    %489 = vector.extract_strided_slice %485 {offsets = [0, 96], sizes = [8, 32], strides = [1, 1]} : vector<8x128xf32> to vector<8x32xf32>
    %490 = arith.mulf %487, %467 : vector<8x32xf32>
    %491 = arith.mulf %486, %488 : vector<8x32xf32>
    %492 = arith.addf %490, %491 : vector<8x32xf32>
    %493 = math.tanh %492 : vector<8x32xf32>
    %494 = arith.mulf %489, %493 : vector<8x32xf32>
    %495 = arith.index_cast %c1_i32_147 : i32 to index
    %c0_151 = arith.constant 0 : index
    %c0_152 = arith.constant 0 : index
    %496 = vector.load %arg11[%495, %c0_151, %c0_152] : memref<8x8x32xf32, #tpu.memory_space<vmem>>, vector<1x8x32xf32>
    %497 = vector.shape_cast %496 : vector<1x8x32xf32> to vector<8x32xf32>
    %498 = vector.shape_cast %494 : vector<8x32xf32> to vector<1x8x32xf32>
    tpu.vector_store %arg11[%495, %c0_151, %c0_152], %498 {strides = array<i32>} : memref<8x8x32xf32, #tpu.memory_space<vmem>>, vector<1x8x32xf32>,
    %c2_i32_153 = arith.constant 2 : i32
    %499 = arith.index_cast %c2_i32_153 : i32 to index
    %c0_154 = arith.constant 0 : index
    %c0_155 = arith.constant 0 : index
    %500 = vector.load %arg10[%499, %c0_154, %c0_155] : memref<8x8x128xf32, #tpu.memory_space<vmem>>, vector<1x8x128xf32>
    %501 = vector.shape_cast %500 : vector<1x8x128xf32> to vector<8x128xf32>
    %cst_156 = arith.constant dense<0.000000e+00> : vector<8x128xf32>
    %502 = tpu.matmul %494, %437, %cst_156 {dimension_numbers = #tpu.dot_dimension_numbers<[1], [0], [0], [1], [0, 0, 1, 1], [], []>} : vector<8x32xf32>, vector<32x128xf32>, vector<8x128xf32> -> vector<8x128xf32>
    %503 = arith.addf %501, %502 : vector<8x128xf32>
    %504 = vector.broadcast %3 : vector<1x128xf32> to vector<8x128xf32>
    %505 = arith.mulf %503, %504 : vector<8x128xf32>
    %506 = math.tanh %505 : vector<8x128xf32>
    %507 = vector.broadcast %3 : vector<1x128xf32> to vector<8x128xf32>
    %508 = arith.mulf %506, %507 : vector<8x128xf32>
    %509 = vector.broadcast %4 : vector<1x128xf32> to vector<8x128xf32>
    %510 = arith.addf %508, %509 : vector<8x128xf32>
    %511 = vector.extract_strided_slice %510 {offsets = [0, 0], sizes = [8, 32], strides = [1, 1]} : vector<8x128xf32> to vector<8x32xf32>
    %512 = vector.extract_strided_slice %510 {offsets = [0, 32], sizes = [8, 32], strides = [1, 1]} : vector<8x128xf32> to vector<8x32xf32>
    %513 = vector.extract_strided_slice %510 {offsets = [0, 64], sizes = [8, 32], strides = [1, 1]} : vector<8x128xf32> to vector<8x32xf32>
    %514 = vector.extract_strided_slice %510 {offsets = [0, 96], sizes = [8, 32], strides = [1, 1]} : vector<8x128xf32> to vector<8x32xf32>
    %515 = arith.mulf %512, %492 : vector<8x32xf32>
    %516 = arith.mulf %511, %513 : vector<8x32xf32>
    %517 = arith.addf %515, %516 : vector<8x32xf32>
    %518 = math.tanh %517 : vector<8x32xf32>
    %519 = arith.mulf %514, %518 : vector<8x32xf32>
    %520 = arith.index_cast %c2_i32_153 : i32 to index
    %c0_157 = arith.constant 0 : index
    %c0_158 = arith.constant 0 : index
    %521 = vector.load %arg11[%520, %c0_157, %c0_158] : memref<8x8x32xf32, #tpu.memory_space<vmem>>, vector<1x8x32xf32>
    %522 = vector.shape_cast %521 : vector<1x8x32xf32> to vector<8x32xf32>
    %523 = vector.shape_cast %519 : vector<8x32xf32> to vector<1x8x32xf32>
    tpu.vector_store %arg11[%520, %c0_157, %c0_158], %523 {strides = array<i32>} : memref<8x8x32xf32, #tpu.memory_space<vmem>>, vector<1x8x32xf32>,
    %c3_i32_159 = arith.constant 3 : i32
    %524 = arith.index_cast %c3_i32_159 : i32 to index
    %c0_160 = arith.constant 0 : index
    %c0_161 = arith.constant 0 : index
    %525 = vector.load %arg10[%524, %c0_160, %c0_161] : memref<8x8x128xf32, #tpu.memory_space<vmem>>, vector<1x8x128xf32>
    %526 = vector.shape_cast %525 : vector<1x8x128xf32> to vector<8x128xf32>
    %cst_162 = arith.constant dense<0.000000e+00> : vector<8x128xf32>
    %527 = tpu.matmul %519, %437, %cst_162 {dimension_numbers = #tpu.dot_dimension_numbers<[1], [0], [0], [1], [0, 0, 1, 1], [], []>} : vector<8x32xf32>, vector<32x128xf32>, vector<8x128xf32> -> vector<8x128xf32>
    %528 = arith.addf %526, %527 : vector<8x128xf32>
    %529 = vector.broadcast %3 : vector<1x128xf32> to vector<8x128xf32>
    %530 = arith.mulf %528, %529 : vector<8x128xf32>
    %531 = math.tanh %530 : vector<8x128xf32>
    %532 = vector.broadcast %3 : vector<1x128xf32> to vector<8x128xf32>
    %533 = arith.mulf %531, %532 : vector<8x128xf32>
    %534 = vector.broadcast %4 : vector<1x128xf32> to vector<8x128xf32>
    %535 = arith.addf %533, %534 : vector<8x128xf32>
    %536 = vector.extract_strided_slice %535 {offsets = [0, 0], sizes = [8, 32], strides = [1, 1]} : vector<8x128xf32> to vector<8x32xf32>
    %537 = vector.extract_strided_slice %535 {offsets = [0, 32], sizes = [8, 32], strides = [1, 1]} : vector<8x128xf32> to vector<8x32xf32>
    %538 = vector.extract_strided_slice %535 {offsets = [0, 64], sizes = [8, 32], strides = [1, 1]} : vector<8x128xf32> to vector<8x32xf32>
    %539 = vector.extract_strided_slice %535 {offsets = [0, 96], sizes = [8, 32], strides = [1, 1]} : vector<8x128xf32> to vector<8x32xf32>
    %540 = arith.mulf %537, %517 : vector<8x32xf32>
    %541 = arith.mulf %536, %538 : vector<8x32xf32>
    %542 = arith.addf %540, %541 : vector<8x32xf32>
    %543 = math.tanh %542 : vector<8x32xf32>
    %544 = arith.mulf %539, %543 : vector<8x32xf32>
    %545 = arith.index_cast %c3_i32_159 : i32 to index
    %c0_163 = arith.constant 0 : index
    %c0_164 = arith.constant 0 : index
    %546 = vector.load %arg11[%545, %c0_163, %c0_164] : memref<8x8x32xf32, #tpu.memory_space<vmem>>, vector<1x8x32xf32>
    %547 = vector.shape_cast %546 : vector<1x8x32xf32> to vector<8x32xf32>
    %548 = vector.shape_cast %544 : vector<8x32xf32> to vector<1x8x32xf32>
    tpu.vector_store %arg11[%545, %c0_163, %c0_164], %548 {strides = array<i32>} : memref<8x8x32xf32, #tpu.memory_space<vmem>>, vector<1x8x32xf32>,
    %c4_i32_165 = arith.constant 4 : i32
    %549 = arith.index_cast %c4_i32_165 : i32 to index
    %c0_166 = arith.constant 0 : index
    %c0_167 = arith.constant 0 : index
    %550 = vector.load %arg10[%549, %c0_166, %c0_167] : memref<8x8x128xf32, #tpu.memory_space<vmem>>, vector<1x8x128xf32>
    %551 = vector.shape_cast %550 : vector<1x8x128xf32> to vector<8x128xf32>
    %cst_168 = arith.constant dense<0.000000e+00> : vector<8x128xf32>
    %552 = tpu.matmul %544, %437, %cst_168 {dimension_numbers = #tpu.dot_dimension_numbers<[1], [0], [0], [1], [0, 0, 1, 1], [], []>} : vector<8x32xf32>, vector<32x128xf32>, vector<8x128xf32> -> vector<8x128xf32>
    %553 = arith.addf %551, %552 : vector<8x128xf32>
    %554 = vector.broadcast %3 : vector<1x128xf32> to vector<8x128xf32>
    %555 = arith.mulf %553, %554 : vector<8x128xf32>
    %556 = math.tanh %555 : vector<8x128xf32>
    %557 = vector.broadcast %3 : vector<1x128xf32> to vector<8x128xf32>
    %558 = arith.mulf %556, %557 : vector<8x128xf32>
    %559 = vector.broadcast %4 : vector<1x128xf32> to vector<8x128xf32>
    %560 = arith.addf %558, %559 : vector<8x128xf32>
    %561 = vector.extract_strided_slice %560 {offsets = [0, 0], sizes = [8, 32], strides = [1, 1]} : vector<8x128xf32> to vector<8x32xf32>
    %562 = vector.extract_strided_slice %560 {offsets = [0, 32], sizes = [8, 32], strides = [1, 1]} : vector<8x128xf32> to vector<8x32xf32>
    %563 = vector.extract_strided_slice %560 {offsets = [0, 64], sizes = [8, 32], strides = [1, 1]} : vector<8x128xf32> to vector<8x32xf32>
    %564 = vector.extract_strided_slice %560 {offsets = [0, 96], sizes = [8, 32], strides = [1, 1]} : vector<8x128xf32> to vector<8x32xf32>
    %565 = arith.mulf %562, %542 : vector<8x32xf32>
    %566 = arith.mulf %561, %563 : vector<8x32xf32>
    %567 = arith.addf %565, %566 : vector<8x32xf32>
    %568 = math.tanh %567 : vector<8x32xf32>
    %569 = arith.mulf %564, %568 : vector<8x32xf32>
    %570 = arith.index_cast %c4_i32_165 : i32 to index
    %c0_169 = arith.constant 0 : index
    %c0_170 = arith.constant 0 : index
    %571 = vector.load %arg11[%570, %c0_169, %c0_170] : memref<8x8x32xf32, #tpu.memory_space<vmem>>, vector<1x8x32xf32>
    %572 = vector.shape_cast %571 : vector<1x8x32xf32> to vector<8x32xf32>
    %573 = vector.shape_cast %569 : vector<8x32xf32> to vector<1x8x32xf32>
    tpu.vector_store %arg11[%570, %c0_169, %c0_170], %573 {strides = array<i32>} : memref<8x8x32xf32, #tpu.memory_space<vmem>>, vector<1x8x32xf32>,
    %c5_i32_171 = arith.constant 5 : i32
    %574 = arith.index_cast %c5_i32_171 : i32 to index
    %c0_172 = arith.constant 0 : index
    %c0_173 = arith.constant 0 : index
    %575 = vector.load %arg10[%574, %c0_172, %c0_173] : memref<8x8x128xf32, #tpu.memory_space<vmem>>, vector<1x8x128xf32>
    %576 = vector.shape_cast %575 : vector<1x8x128xf32> to vector<8x128xf32>
    %cst_174 = arith.constant dense<0.000000e+00> : vector<8x128xf32>
    %577 = tpu.matmul %569, %437, %cst_174 {dimension_numbers = #tpu.dot_dimension_numbers<[1], [0], [0], [1], [0, 0, 1, 1], [], []>} : vector<8x32xf32>, vector<32x128xf32>, vector<8x128xf32> -> vector<8x128xf32>
    %578 = arith.addf %576, %577 : vector<8x128xf32>
    %579 = vector.broadcast %3 : vector<1x128xf32> to vector<8x128xf32>
    %580 = arith.mulf %578, %579 : vector<8x128xf32>
    %581 = math.tanh %580 : vector<8x128xf32>
    %582 = vector.broadcast %3 : vector<1x128xf32> to vector<8x128xf32>
    %583 = arith.mulf %581, %582 : vector<8x128xf32>
    %584 = vector.broadcast %4 : vector<1x128xf32> to vector<8x128xf32>
    %585 = arith.addf %583, %584 : vector<8x128xf32>
    %586 = vector.extract_strided_slice %585 {offsets = [0, 0], sizes = [8, 32], strides = [1, 1]} : vector<8x128xf32> to vector<8x32xf32>
    %587 = vector.extract_strided_slice %585 {offsets = [0, 32], sizes = [8, 32], strides = [1, 1]} : vector<8x128xf32> to vector<8x32xf32>
    %588 = vector.extract_strided_slice %585 {offsets = [0, 64], sizes = [8, 32], strides = [1, 1]} : vector<8x128xf32> to vector<8x32xf32>
    %589 = vector.extract_strided_slice %585 {offsets = [0, 96], sizes = [8, 32], strides = [1, 1]} : vector<8x128xf32> to vector<8x32xf32>
    %590 = arith.mulf %587, %567 : vector<8x32xf32>
    %591 = arith.mulf %586, %588 : vector<8x32xf32>
    %592 = arith.addf %590, %591 : vector<8x32xf32>
    %593 = math.tanh %592 : vector<8x32xf32>
    %594 = arith.mulf %589, %593 : vector<8x32xf32>
    %595 = arith.index_cast %c5_i32_171 : i32 to index
    %c0_175 = arith.constant 0 : index
    %c0_176 = arith.constant 0 : index
    %596 = vector.load %arg11[%595, %c0_175, %c0_176] : memref<8x8x32xf32, #tpu.memory_space<vmem>>, vector<1x8x32xf32>
    %597 = vector.shape_cast %596 : vector<1x8x32xf32> to vector<8x32xf32>
    %598 = vector.shape_cast %594 : vector<8x32xf32> to vector<1x8x32xf32>
    tpu.vector_store %arg11[%595, %c0_175, %c0_176], %598 {strides = array<i32>} : memref<8x8x32xf32, #tpu.memory_space<vmem>>, vector<1x8x32xf32>,
    %c6_i32_177 = arith.constant 6 : i32
    %599 = arith.index_cast %c6_i32_177 : i32 to index
    %c0_178 = arith.constant 0 : index
    %c0_179 = arith.constant 0 : index
    %600 = vector.load %arg10[%599, %c0_178, %c0_179] : memref<8x8x128xf32, #tpu.memory_space<vmem>>, vector<1x8x128xf32>
    %601 = vector.shape_cast %600 : vector<1x8x128xf32> to vector<8x128xf32>
    %cst_180 = arith.constant dense<0.000000e+00> : vector<8x128xf32>
    %602 = tpu.matmul %594, %437, %cst_180 {dimension_numbers = #tpu.dot_dimension_numbers<[1], [0], [0], [1], [0, 0, 1, 1], [], []>} : vector<8x32xf32>, vector<32x128xf32>, vector<8x128xf32> -> vector<8x128xf32>
    %603 = arith.addf %601, %602 : vector<8x128xf32>
    %604 = vector.broadcast %3 : vector<1x128xf32> to vector<8x128xf32>
    %605 = arith.mulf %603, %604 : vector<8x128xf32>
    %606 = math.tanh %605 : vector<8x128xf32>
    %607 = vector.broadcast %3 : vector<1x128xf32> to vector<8x128xf32>
    %608 = arith.mulf %606, %607 : vector<8x128xf32>
    %609 = vector.broadcast %4 : vector<1x128xf32> to vector<8x128xf32>
    %610 = arith.addf %608, %609 : vector<8x128xf32>
    %611 = vector.extract_strided_slice %610 {offsets = [0, 0], sizes = [8, 32], strides = [1, 1]} : vector<8x128xf32> to vector<8x32xf32>
    %612 = vector.extract_strided_slice %610 {offsets = [0, 32], sizes = [8, 32], strides = [1, 1]} : vector<8x128xf32> to vector<8x32xf32>
    %613 = vector.extract_strided_slice %610 {offsets = [0, 64], sizes = [8, 32], strides = [1, 1]} : vector<8x128xf32> to vector<8x32xf32>
    %614 = vector.extract_strided_slice %610 {offsets = [0, 96], sizes = [8, 32], strides = [1, 1]} : vector<8x128xf32> to vector<8x32xf32>
    %615 = arith.mulf %612, %592 : vector<8x32xf32>
    %616 = arith.mulf %611, %613 : vector<8x32xf32>
    %617 = arith.addf %615, %616 : vector<8x32xf32>
    %618 = math.tanh %617 : vector<8x32xf32>
    %619 = arith.mulf %614, %618 : vector<8x32xf32>
    %620 = arith.index_cast %c6_i32_177 : i32 to index
    %c0_181 = arith.constant 0 : index
    %c0_182 = arith.constant 0 : index
    %621 = vector.load %arg11[%620, %c0_181, %c0_182] : memref<8x8x32xf32, #tpu.memory_space<vmem>>, vector<1x8x32xf32>
    %622 = vector.shape_cast %621 : vector<1x8x32xf32> to vector<8x32xf32>
    %623 = vector.shape_cast %619 : vector<8x32xf32> to vector<1x8x32xf32>
    tpu.vector_store %arg11[%620, %c0_181, %c0_182], %623 {strides = array<i32>} : memref<8x8x32xf32, #tpu.memory_space<vmem>>, vector<1x8x32xf32>,
    %c7_i32_183 = arith.constant 7 : i32
    %624 = arith.index_cast %c7_i32_183 : i32 to index
    %c0_184 = arith.constant 0 : index
    %c0_185 = arith.constant 0 : index
    %625 = vector.load %arg10[%624, %c0_184, %c0_185] : memref<8x8x128xf32, #tpu.memory_space<vmem>>, vector<1x8x128xf32>
    %626 = vector.shape_cast %625 : vector<1x8x128xf32> to vector<8x128xf32>
    %cst_186 = arith.constant dense<0.000000e+00> : vector<8x128xf32>
    %627 = tpu.matmul %619, %437, %cst_186 {dimension_numbers = #tpu.dot_dimension_numbers<[1], [0], [0], [1], [0, 0, 1, 1], [], []>} : vector<8x32xf32>, vector<32x128xf32>, vector<8x128xf32> -> vector<8x128xf32>
    %628 = arith.addf %626, %627 : vector<8x128xf32>
    %629 = vector.broadcast %3 : vector<1x128xf32> to vector<8x128xf32>
    %630 = arith.mulf %628, %629 : vector<8x128xf32>
    %631 = math.tanh %630 : vector<8x128xf32>
    %632 = vector.broadcast %3 : vector<1x128xf32> to vector<8x128xf32>
    %633 = arith.mulf %631, %632 : vector<8x128xf32>
    %634 = vector.broadcast %4 : vector<1x128xf32> to vector<8x128xf32>
    %635 = arith.addf %633, %634 : vector<8x128xf32>
    %636 = vector.extract_strided_slice %635 {offsets = [0, 0], sizes = [8, 32], strides = [1, 1]} : vector<8x128xf32> to vector<8x32xf32>
    %637 = vector.extract_strided_slice %635 {offsets = [0, 32], sizes = [8, 32], strides = [1, 1]} : vector<8x128xf32> to vector<8x32xf32>
    %638 = vector.extract_strided_slice %635 {offsets = [0, 64], sizes = [8, 32], strides = [1, 1]} : vector<8x128xf32> to vector<8x32xf32>
    %639 = vector.extract_strided_slice %635 {offsets = [0, 96], sizes = [8, 32], strides = [1, 1]} : vector<8x128xf32> to vector<8x32xf32>
    %640 = arith.mulf %637, %617 : vector<8x32xf32>
    %641 = arith.mulf %636, %638 : vector<8x32xf32>
    %642 = arith.addf %640, %641 : vector<8x32xf32>
    %643 = math.tanh %642 : vector<8x32xf32>
    %644 = arith.mulf %639, %643 : vector<8x32xf32>
    %645 = arith.index_cast %c7_i32_183 : i32 to index
    %c0_187 = arith.constant 0 : index
    %c0_188 = arith.constant 0 : index
    %646 = vector.load %arg11[%645, %c0_187, %c0_188] : memref<8x8x32xf32, #tpu.memory_space<vmem>>, vector<1x8x32xf32>
    %647 = vector.shape_cast %646 : vector<1x8x32xf32> to vector<8x32xf32>
    %648 = vector.shape_cast %644 : vector<8x32xf32> to vector<1x8x32xf32>
    tpu.vector_store %arg11[%645, %c0_187, %c0_188], %648 {strides = array<i32>} : memref<8x8x32xf32, #tpu.memory_space<vmem>>, vector<1x8x32xf32>,
    %c8_i32_189 = arith.constant 8 : i32
    %c2_190 = arith.constant 2 : index
    %c0_191 = arith.constant 0 : index
    %c0_192 = arith.constant 0 : index
    %649 = vector.load %arg3[%c2_190, %c0_191, %c0_192] : memref<5x32x128xf32, #tpu.memory_space<vmem>>, vector<1x32x128xf32>
    %650 = vector.shape_cast %649 : vector<1x32x128xf32> to vector<32x128xf32>
    %c3 = arith.constant 3 : index
    %c0_193 = arith.constant 0 : index
    %c0_194 = arith.constant 0 : index
    %651 = vector.load %arg4[%c3, %c0_193, %c0_194] : memref<6x32x128xf32, #tpu.memory_space<vmem>>, vector<1x32x128xf32>
    %652 = vector.shape_cast %651 : vector<1x32x128xf32> to vector<32x128xf32>
    %c3_195 = arith.constant 3 : index
    %c0_196 = arith.constant 0 : index
    %c0_197 = arith.constant 0 : index
    %653 = vector.load %arg5[%c3_195, %c0_196, %c0_197] : memref<6x1x128xf32, #tpu.memory_space<vmem>>, vector<1x1x128xf32>
    %654 = vector.shape_cast %653 : vector<1x1x128xf32> to vector<1x128xf32>
    %c0_198 = arith.constant 0 : index
    %c0_199 = arith.constant 0 : index
    %c0_200 = arith.constant 0 : index
    %655 = vector.load %arg11[%c0_198, %c0_199, %c0_200] : memref<8x8x32xf32, #tpu.memory_space<vmem>>, vector<8x8x32xf32>
    %656 = vector.shape_cast %655 : vector<8x8x32xf32> to vector<64x32xf32>
    %cst_201 = arith.constant dense<0.000000e+00> : vector<64x128xf32>
    %657 = tpu.matmul %656, %650, %cst_201 {dimension_numbers = #tpu.dot_dimension_numbers<[1], [0], [0], [1], [0, 0, 1, 1], [], []>} : vector<64x32xf32>, vector<32x128xf32>, vector<64x128xf32> -> vector<64x128xf32>
    %658 = vector.broadcast %654 : vector<1x128xf32> to vector<64x128xf32>
    %659 = arith.addf %657, %658 : vector<64x128xf32>
    %660 = vector.shape_cast %659 : vector<64x128xf32> to vector<8x8x128xf32>
    %c0_202 = arith.constant 0 : index
    %c0_203 = arith.constant 0 : index
    %c0_204 = arith.constant 0 : index
    %661 = vector.load %arg10[%c0_202, %c0_203, %c0_204] : memref<8x8x128xf32, #tpu.memory_space<vmem>>, vector<8x8x128xf32>
    tpu.vector_store %arg10[%c0_202, %c0_203, %c0_204], %660 {strides = array<i32>} : memref<8x8x128xf32, #tpu.memory_space<vmem>>, vector<8x8x128xf32>,
    %cst_205 = arith.constant 0.000000e+00 : f32
    %662 = vector.broadcast %cst_205 : f32 to vector<8x32xf32>
    %cst_206 = arith.constant 0.000000e+00 : f32
    %663 = vector.broadcast %cst_206 : f32 to vector<8x32xf32>
    %c0_i32_207 = arith.constant 0 : i32
    %664 = arith.index_cast %c0_i32_207 : i32 to index
    %c0_208 = arith.constant 0 : index
    %c0_209 = arith.constant 0 : index
    %665 = vector.load %arg10[%664, %c0_208, %c0_209] : memref<8x8x128xf32, #tpu.memory_space<vmem>>, vector<1x8x128xf32>
    %666 = vector.shape_cast %665 : vector<1x8x128xf32> to vector<8x128xf32>
    %cst_210 = arith.constant dense<0.000000e+00> : vector<8x128xf32>
    %667 = tpu.matmul %662, %652, %cst_210 {dimension_numbers = #tpu.dot_dimension_numbers<[1], [0], [0], [1], [0, 0, 1, 1], [], []>} : vector<8x32xf32>, vector<32x128xf32>, vector<8x128xf32> -> vector<8x128xf32>
    %668 = arith.addf %666, %667 : vector<8x128xf32>
    %669 = vector.broadcast %3 : vector<1x128xf32> to vector<8x128xf32>
    %670 = arith.mulf %668, %669 : vector<8x128xf32>
    %671 = math.tanh %670 : vector<8x128xf32>
    %672 = vector.broadcast %3 : vector<1x128xf32> to vector<8x128xf32>
    %673 = arith.mulf %671, %672 : vector<8x128xf32>
    %674 = vector.broadcast %4 : vector<1x128xf32> to vector<8x128xf32>
    %675 = arith.addf %673, %674 : vector<8x128xf32>
    %676 = vector.extract_strided_slice %675 {offsets = [0, 0], sizes = [8, 32], strides = [1, 1]} : vector<8x128xf32> to vector<8x32xf32>
    %677 = vector.extract_strided_slice %675 {offsets = [0, 32], sizes = [8, 32], strides = [1, 1]} : vector<8x128xf32> to vector<8x32xf32>
    %678 = vector.extract_strided_slice %675 {offsets = [0, 64], sizes = [8, 32], strides = [1, 1]} : vector<8x128xf32> to vector<8x32xf32>
    %679 = vector.extract_strided_slice %675 {offsets = [0, 96], sizes = [8, 32], strides = [1, 1]} : vector<8x128xf32> to vector<8x32xf32>
    %680 = arith.mulf %677, %663 : vector<8x32xf32>
    %681 = arith.mulf %676, %678 : vector<8x32xf32>
    %682 = arith.addf %680, %681 : vector<8x32xf32>
    %683 = math.tanh %682 : vector<8x32xf32>
    %684 = arith.mulf %679, %683 : vector<8x32xf32>
    %685 = arith.index_cast %c0_i32_207 : i32 to index
    %c0_211 = arith.constant 0 : index
    %c0_212 = arith.constant 0 : index
    %686 = vector.load %arg11[%685, %c0_211, %c0_212] : memref<8x8x32xf32, #tpu.memory_space<vmem>>, vector<1x8x32xf32>
    %687 = vector.shape_cast %686 : vector<1x8x32xf32> to vector<8x32xf32>
    %688 = vector.shape_cast %684 : vector<8x32xf32> to vector<1x8x32xf32>
    tpu.vector_store %arg11[%685, %c0_211, %c0_212], %688 {strides = array<i32>} : memref<8x8x32xf32, #tpu.memory_space<vmem>>, vector<1x8x32xf32>,
    %c1_i32_213 = arith.constant 1 : i32
    %689 = arith.index_cast %c1_i32_213 : i32 to index
    %c0_214 = arith.constant 0 : index
    %c0_215 = arith.constant 0 : index
    %690 = vector.load %arg10[%689, %c0_214, %c0_215] : memref<8x8x128xf32, #tpu.memory_space<vmem>>, vector<1x8x128xf32>
    %691 = vector.shape_cast %690 : vector<1x8x128xf32> to vector<8x128xf32>
    %cst_216 = arith.constant dense<0.000000e+00> : vector<8x128xf32>
    %692 = tpu.matmul %684, %652, %cst_216 {dimension_numbers = #tpu.dot_dimension_numbers<[1], [0], [0], [1], [0, 0, 1, 1], [], []>} : vector<8x32xf32>, vector<32x128xf32>, vector<8x128xf32> -> vector<8x128xf32>
    %693 = arith.addf %691, %692 : vector<8x128xf32>
    %694 = vector.broadcast %3 : vector<1x128xf32> to vector<8x128xf32>
    %695 = arith.mulf %693, %694 : vector<8x128xf32>
    %696 = math.tanh %695 : vector<8x128xf32>
    %697 = vector.broadcast %3 : vector<1x128xf32> to vector<8x128xf32>
    %698 = arith.mulf %696, %697 : vector<8x128xf32>
    %699 = vector.broadcast %4 : vector<1x128xf32> to vector<8x128xf32>
    %700 = arith.addf %698, %699 : vector<8x128xf32>
    %701 = vector.extract_strided_slice %700 {offsets = [0, 0], sizes = [8, 32], strides = [1, 1]} : vector<8x128xf32> to vector<8x32xf32>
    %702 = vector.extract_strided_slice %700 {offsets = [0, 32], sizes = [8, 32], strides = [1, 1]} : vector<8x128xf32> to vector<8x32xf32>
    %703 = vector.extract_strided_slice %700 {offsets = [0, 64], sizes = [8, 32], strides = [1, 1]} : vector<8x128xf32> to vector<8x32xf32>
    %704 = vector.extract_strided_slice %700 {offsets = [0, 96], sizes = [8, 32], strides = [1, 1]} : vector<8x128xf32> to vector<8x32xf32>
    %705 = arith.mulf %702, %682 : vector<8x32xf32>
    %706 = arith.mulf %701, %703 : vector<8x32xf32>
    %707 = arith.addf %705, %706 : vector<8x32xf32>
    %708 = math.tanh %707 : vector<8x32xf32>
    %709 = arith.mulf %704, %708 : vector<8x32xf32>
    %710 = arith.index_cast %c1_i32_213 : i32 to index
    %c0_217 = arith.constant 0 : index
    %c0_218 = arith.constant 0 : index
    %711 = vector.load %arg11[%710, %c0_217, %c0_218] : memref<8x8x32xf32, #tpu.memory_space<vmem>>, vector<1x8x32xf32>
    %712 = vector.shape_cast %711 : vector<1x8x32xf32> to vector<8x32xf32>
    %713 = vector.shape_cast %709 : vector<8x32xf32> to vector<1x8x32xf32>
    tpu.vector_store %arg11[%710, %c0_217, %c0_218], %713 {strides = array<i32>} : memref<8x8x32xf32, #tpu.memory_space<vmem>>, vector<1x8x32xf32>,
    %c2_i32_219 = arith.constant 2 : i32
    %714 = arith.index_cast %c2_i32_219 : i32 to index
    %c0_220 = arith.constant 0 : index
    %c0_221 = arith.constant 0 : index
    %715 = vector.load %arg10[%714, %c0_220, %c0_221] : memref<8x8x128xf32, #tpu.memory_space<vmem>>, vector<1x8x128xf32>
    %716 = vector.shape_cast %715 : vector<1x8x128xf32> to vector<8x128xf32>
    %cst_222 = arith.constant dense<0.000000e+00> : vector<8x128xf32>
    %717 = tpu.matmul %709, %652, %cst_222 {dimension_numbers = #tpu.dot_dimension_numbers<[1], [0], [0], [1], [0, 0, 1, 1], [], []>} : vector<8x32xf32>, vector<32x128xf32>, vector<8x128xf32> -> vector<8x128xf32>
    %718 = arith.addf %716, %717 : vector<8x128xf32>
    %719 = vector.broadcast %3 : vector<1x128xf32> to vector<8x128xf32>
    %720 = arith.mulf %718, %719 : vector<8x128xf32>
    %721 = math.tanh %720 : vector<8x128xf32>
    %722 = vector.broadcast %3 : vector<1x128xf32> to vector<8x128xf32>
    %723 = arith.mulf %721, %722 : vector<8x128xf32>
    %724 = vector.broadcast %4 : vector<1x128xf32> to vector<8x128xf32>
    %725 = arith.addf %723, %724 : vector<8x128xf32>
    %726 = vector.extract_strided_slice %725 {offsets = [0, 0], sizes = [8, 32], strides = [1, 1]} : vector<8x128xf32> to vector<8x32xf32>
    %727 = vector.extract_strided_slice %725 {offsets = [0, 32], sizes = [8, 32], strides = [1, 1]} : vector<8x128xf32> to vector<8x32xf32>
    %728 = vector.extract_strided_slice %725 {offsets = [0, 64], sizes = [8, 32], strides = [1, 1]} : vector<8x128xf32> to vector<8x32xf32>
    %729 = vector.extract_strided_slice %725 {offsets = [0, 96], sizes = [8, 32], strides = [1, 1]} : vector<8x128xf32> to vector<8x32xf32>
    %730 = arith.mulf %727, %707 : vector<8x32xf32>
    %731 = arith.mulf %726, %728 : vector<8x32xf32>
    %732 = arith.addf %730, %731 : vector<8x32xf32>
    %733 = math.tanh %732 : vector<8x32xf32>
    %734 = arith.mulf %729, %733 : vector<8x32xf32>
    %735 = arith.index_cast %c2_i32_219 : i32 to index
    %c0_223 = arith.constant 0 : index
    %c0_224 = arith.constant 0 : index
    %736 = vector.load %arg11[%735, %c0_223, %c0_224] : memref<8x8x32xf32, #tpu.memory_space<vmem>>, vector<1x8x32xf32>
    %737 = vector.shape_cast %736 : vector<1x8x32xf32> to vector<8x32xf32>
    %738 = vector.shape_cast %734 : vector<8x32xf32> to vector<1x8x32xf32>
    tpu.vector_store %arg11[%735, %c0_223, %c0_224], %738 {strides = array<i32>} : memref<8x8x32xf32, #tpu.memory_space<vmem>>, vector<1x8x32xf32>,
    %c3_i32_225 = arith.constant 3 : i32
    %739 = arith.index_cast %c3_i32_225 : i32 to index
    %c0_226 = arith.constant 0 : index
    %c0_227 = arith.constant 0 : index
    %740 = vector.load %arg10[%739, %c0_226, %c0_227] : memref<8x8x128xf32, #tpu.memory_space<vmem>>, vector<1x8x128xf32>
    %741 = vector.shape_cast %740 : vector<1x8x128xf32> to vector<8x128xf32>
    %cst_228 = arith.constant dense<0.000000e+00> : vector<8x128xf32>
    %742 = tpu.matmul %734, %652, %cst_228 {dimension_numbers = #tpu.dot_dimension_numbers<[1], [0], [0], [1], [0, 0, 1, 1], [], []>} : vector<8x32xf32>, vector<32x128xf32>, vector<8x128xf32> -> vector<8x128xf32>
    %743 = arith.addf %741, %742 : vector<8x128xf32>
    %744 = vector.broadcast %3 : vector<1x128xf32> to vector<8x128xf32>
    %745 = arith.mulf %743, %744 : vector<8x128xf32>
    %746 = math.tanh %745 : vector<8x128xf32>
    %747 = vector.broadcast %3 : vector<1x128xf32> to vector<8x128xf32>
    %748 = arith.mulf %746, %747 : vector<8x128xf32>
    %749 = vector.broadcast %4 : vector<1x128xf32> to vector<8x128xf32>
    %750 = arith.addf %748, %749 : vector<8x128xf32>
    %751 = vector.extract_strided_slice %750 {offsets = [0, 0], sizes = [8, 32], strides = [1, 1]} : vector<8x128xf32> to vector<8x32xf32>
    %752 = vector.extract_strided_slice %750 {offsets = [0, 32], sizes = [8, 32], strides = [1, 1]} : vector<8x128xf32> to vector<8x32xf32>
    %753 = vector.extract_strided_slice %750 {offsets = [0, 64], sizes = [8, 32], strides = [1, 1]} : vector<8x128xf32> to vector<8x32xf32>
    %754 = vector.extract_strided_slice %750 {offsets = [0, 96], sizes = [8, 32], strides = [1, 1]} : vector<8x128xf32> to vector<8x32xf32>
    %755 = arith.mulf %752, %732 : vector<8x32xf32>
    %756 = arith.mulf %751, %753 : vector<8x32xf32>
    %757 = arith.addf %755, %756 : vector<8x32xf32>
    %758 = math.tanh %757 : vector<8x32xf32>
    %759 = arith.mulf %754, %758 : vector<8x32xf32>
    %760 = arith.index_cast %c3_i32_225 : i32 to index
    %c0_229 = arith.constant 0 : index
    %c0_230 = arith.constant 0 : index
    %761 = vector.load %arg11[%760, %c0_229, %c0_230] : memref<8x8x32xf32, #tpu.memory_space<vmem>>, vector<1x8x32xf32>
    %762 = vector.shape_cast %761 : vector<1x8x32xf32> to vector<8x32xf32>
    %763 = vector.shape_cast %759 : vector<8x32xf32> to vector<1x8x32xf32>
    tpu.vector_store %arg11[%760, %c0_229, %c0_230], %763 {strides = array<i32>} : memref<8x8x32xf32, #tpu.memory_space<vmem>>, vector<1x8x32xf32>,
    %c4_i32_231 = arith.constant 4 : i32
    %764 = arith.index_cast %c4_i32_231 : i32 to index
    %c0_232 = arith.constant 0 : index
    %c0_233 = arith.constant 0 : index
    %765 = vector.load %arg10[%764, %c0_232, %c0_233] : memref<8x8x128xf32, #tpu.memory_space<vmem>>, vector<1x8x128xf32>
    %766 = vector.shape_cast %765 : vector<1x8x128xf32> to vector<8x128xf32>
    %cst_234 = arith.constant dense<0.000000e+00> : vector<8x128xf32>
    %767 = tpu.matmul %759, %652, %cst_234 {dimension_numbers = #tpu.dot_dimension_numbers<[1], [0], [0], [1], [0, 0, 1, 1], [], []>} : vector<8x32xf32>, vector<32x128xf32>, vector<8x128xf32> -> vector<8x128xf32>
    %768 = arith.addf %766, %767 : vector<8x128xf32>
    %769 = vector.broadcast %3 : vector<1x128xf32> to vector<8x128xf32>
    %770 = arith.mulf %768, %769 : vector<8x128xf32>
    %771 = math.tanh %770 : vector<8x128xf32>
    %772 = vector.broadcast %3 : vector<1x128xf32> to vector<8x128xf32>
    %773 = arith.mulf %771, %772 : vector<8x128xf32>
    %774 = vector.broadcast %4 : vector<1x128xf32> to vector<8x128xf32>
    %775 = arith.addf %773, %774 : vector<8x128xf32>
    %776 = vector.extract_strided_slice %775 {offsets = [0, 0], sizes = [8, 32], strides = [1, 1]} : vector<8x128xf32> to vector<8x32xf32>
    %777 = vector.extract_strided_slice %775 {offsets = [0, 32], sizes = [8, 32], strides = [1, 1]} : vector<8x128xf32> to vector<8x32xf32>
    %778 = vector.extract_strided_slice %775 {offsets = [0, 64], sizes = [8, 32], strides = [1, 1]} : vector<8x128xf32> to vector<8x32xf32>
    %779 = vector.extract_strided_slice %775 {offsets = [0, 96], sizes = [8, 32], strides = [1, 1]} : vector<8x128xf32> to vector<8x32xf32>
    %780 = arith.mulf %777, %757 : vector<8x32xf32>
    %781 = arith.mulf %776, %778 : vector<8x32xf32>
    %782 = arith.addf %780, %781 : vector<8x32xf32>
    %783 = math.tanh %782 : vector<8x32xf32>
    %784 = arith.mulf %779, %783 : vector<8x32xf32>
    %785 = arith.index_cast %c4_i32_231 : i32 to index
    %c0_235 = arith.constant 0 : index
    %c0_236 = arith.constant 0 : index
    %786 = vector.load %arg11[%785, %c0_235, %c0_236] : memref<8x8x32xf32, #tpu.memory_space<vmem>>, vector<1x8x32xf32>
    %787 = vector.shape_cast %786 : vector<1x8x32xf32> to vector<8x32xf32>
    %788 = vector.shape_cast %784 : vector<8x32xf32> to vector<1x8x32xf32>
    tpu.vector_store %arg11[%785, %c0_235, %c0_236], %788 {strides = array<i32>} : memref<8x8x32xf32, #tpu.memory_space<vmem>>, vector<1x8x32xf32>,
    %c5_i32_237 = arith.constant 5 : i32
    %789 = arith.index_cast %c5_i32_237 : i32 to index
    %c0_238 = arith.constant 0 : index
    %c0_239 = arith.constant 0 : index
    %790 = vector.load %arg10[%789, %c0_238, %c0_239] : memref<8x8x128xf32, #tpu.memory_space<vmem>>, vector<1x8x128xf32>
    %791 = vector.shape_cast %790 : vector<1x8x128xf32> to vector<8x128xf32>
    %cst_240 = arith.constant dense<0.000000e+00> : vector<8x128xf32>
    %792 = tpu.matmul %784, %652, %cst_240 {dimension_numbers = #tpu.dot_dimension_numbers<[1], [0], [0], [1], [0, 0, 1, 1], [], []>} : vector<8x32xf32>, vector<32x128xf32>, vector<8x128xf32> -> vector<8x128xf32>
    %793 = arith.addf %791, %792 : vector<8x128xf32>
    %794 = vector.broadcast %3 : vector<1x128xf32> to vector<8x128xf32>
    %795 = arith.mulf %793, %794 : vector<8x128xf32>
    %796 = math.tanh %795 : vector<8x128xf32>
    %797 = vector.broadcast %3 : vector<1x128xf32> to vector<8x128xf32>
    %798 = arith.mulf %796, %797 : vector<8x128xf32>
    %799 = vector.broadcast %4 : vector<1x128xf32> to vector<8x128xf32>
    %800 = arith.addf %798, %799 : vector<8x128xf32>
    %801 = vector.extract_strided_slice %800 {offsets = [0, 0], sizes = [8, 32], strides = [1, 1]} : vector<8x128xf32> to vector<8x32xf32>
    %802 = vector.extract_strided_slice %800 {offsets = [0, 32], sizes = [8, 32], strides = [1, 1]} : vector<8x128xf32> to vector<8x32xf32>
    %803 = vector.extract_strided_slice %800 {offsets = [0, 64], sizes = [8, 32], strides = [1, 1]} : vector<8x128xf32> to vector<8x32xf32>
    %804 = vector.extract_strided_slice %800 {offsets = [0, 96], sizes = [8, 32], strides = [1, 1]} : vector<8x128xf32> to vector<8x32xf32>
    %805 = arith.mulf %802, %782 : vector<8x32xf32>
    %806 = arith.mulf %801, %803 : vector<8x32xf32>
    %807 = arith.addf %805, %806 : vector<8x32xf32>
    %808 = math.tanh %807 : vector<8x32xf32>
    %809 = arith.mulf %804, %808 : vector<8x32xf32>
    %810 = arith.index_cast %c5_i32_237 : i32 to index
    %c0_241 = arith.constant 0 : index
    %c0_242 = arith.constant 0 : index
    %811 = vector.load %arg11[%810, %c0_241, %c0_242] : memref<8x8x32xf32, #tpu.memory_space<vmem>>, vector<1x8x32xf32>
    %812 = vector.shape_cast %811 : vector<1x8x32xf32> to vector<8x32xf32>
    %813 = vector.shape_cast %809 : vector<8x32xf32> to vector<1x8x32xf32>
    tpu.vector_store %arg11[%810, %c0_241, %c0_242], %813 {strides = array<i32>} : memref<8x8x32xf32, #tpu.memory_space<vmem>>, vector<1x8x32xf32>,
    %c6_i32_243 = arith.constant 6 : i32
    %814 = arith.index_cast %c6_i32_243 : i32 to index
    %c0_244 = arith.constant 0 : index
    %c0_245 = arith.constant 0 : index
    %815 = vector.load %arg10[%814, %c0_244, %c0_245] : memref<8x8x128xf32, #tpu.memory_space<vmem>>, vector<1x8x128xf32>
    %816 = vector.shape_cast %815 : vector<1x8x128xf32> to vector<8x128xf32>
    %cst_246 = arith.constant dense<0.000000e+00> : vector<8x128xf32>
    %817 = tpu.matmul %809, %652, %cst_246 {dimension_numbers = #tpu.dot_dimension_numbers<[1], [0], [0], [1], [0, 0, 1, 1], [], []>} : vector<8x32xf32>, vector<32x128xf32>, vector<8x128xf32> -> vector<8x128xf32>
    %818 = arith.addf %816, %817 : vector<8x128xf32>
    %819 = vector.broadcast %3 : vector<1x128xf32> to vector<8x128xf32>
    %820 = arith.mulf %818, %819 : vector<8x128xf32>
    %821 = math.tanh %820 : vector<8x128xf32>
    %822 = vector.broadcast %3 : vector<1x128xf32> to vector<8x128xf32>
    %823 = arith.mulf %821, %822 : vector<8x128xf32>
    %824 = vector.broadcast %4 : vector<1x128xf32> to vector<8x128xf32>
    %825 = arith.addf %823, %824 : vector<8x128xf32>
    %826 = vector.extract_strided_slice %825 {offsets = [0, 0], sizes = [8, 32], strides = [1, 1]} : vector<8x128xf32> to vector<8x32xf32>
    %827 = vector.extract_strided_slice %825 {offsets = [0, 32], sizes = [8, 32], strides = [1, 1]} : vector<8x128xf32> to vector<8x32xf32>
    %828 = vector.extract_strided_slice %825 {offsets = [0, 64], sizes = [8, 32], strides = [1, 1]} : vector<8x128xf32> to vector<8x32xf32>
    %829 = vector.extract_strided_slice %825 {offsets = [0, 96], sizes = [8, 32], strides = [1, 1]} : vector<8x128xf32> to vector<8x32xf32>
    %830 = arith.mulf %827, %807 : vector<8x32xf32>
    %831 = arith.mulf %826, %828 : vector<8x32xf32>
    %832 = arith.addf %830, %831 : vector<8x32xf32>
    %833 = math.tanh %832 : vector<8x32xf32>
    %834 = arith.mulf %829, %833 : vector<8x32xf32>
    %835 = arith.index_cast %c6_i32_243 : i32 to index
    %c0_247 = arith.constant 0 : index
    %c0_248 = arith.constant 0 : index
    %836 = vector.load %arg11[%835, %c0_247, %c0_248] : memref<8x8x32xf32, #tpu.memory_space<vmem>>, vector<1x8x32xf32>
    %837 = vector.shape_cast %836 : vector<1x8x32xf32> to vector<8x32xf32>
    %838 = vector.shape_cast %834 : vector<8x32xf32> to vector<1x8x32xf32>
    tpu.vector_store %arg11[%835, %c0_247, %c0_248], %838 {strides = array<i32>} : memref<8x8x32xf32, #tpu.memory_space<vmem>>, vector<1x8x32xf32>,
    %c7_i32_249 = arith.constant 7 : i32
    %839 = arith.index_cast %c7_i32_249 : i32 to index
    %c0_250 = arith.constant 0 : index
    %c0_251 = arith.constant 0 : index
    %840 = vector.load %arg10[%839, %c0_250, %c0_251] : memref<8x8x128xf32, #tpu.memory_space<vmem>>, vector<1x8x128xf32>
    %841 = vector.shape_cast %840 : vector<1x8x128xf32> to vector<8x128xf32>
    %cst_252 = arith.constant dense<0.000000e+00> : vector<8x128xf32>
    %842 = tpu.matmul %834, %652, %cst_252 {dimension_numbers = #tpu.dot_dimension_numbers<[1], [0], [0], [1], [0, 0, 1, 1], [], []>} : vector<8x32xf32>, vector<32x128xf32>, vector<8x128xf32> -> vector<8x128xf32>
    %843 = arith.addf %841, %842 : vector<8x128xf32>
    %844 = vector.broadcast %3 : vector<1x128xf32> to vector<8x128xf32>
    %845 = arith.mulf %843, %844 : vector<8x128xf32>
    %846 = math.tanh %845 : vector<8x128xf32>
    %847 = vector.broadcast %3 : vector<1x128xf32> to vector<8x128xf32>
    %848 = arith.mulf %846, %847 : vector<8x128xf32>
    %849 = vector.broadcast %4 : vector<1x128xf32> to vector<8x128xf32>
    %850 = arith.addf %848, %849 : vector<8x128xf32>
    %851 = vector.extract_strided_slice %850 {offsets = [0, 0], sizes = [8, 32], strides = [1, 1]} : vector<8x128xf32> to vector<8x32xf32>
    %852 = vector.extract_strided_slice %850 {offsets = [0, 32], sizes = [8, 32], strides = [1, 1]} : vector<8x128xf32> to vector<8x32xf32>
    %853 = vector.extract_strided_slice %850 {offsets = [0, 64], sizes = [8, 32], strides = [1, 1]} : vector<8x128xf32> to vector<8x32xf32>
    %854 = vector.extract_strided_slice %850 {offsets = [0, 96], sizes = [8, 32], strides = [1, 1]} : vector<8x128xf32> to vector<8x32xf32>
    %855 = arith.mulf %852, %832 : vector<8x32xf32>
    %856 = arith.mulf %851, %853 : vector<8x32xf32>
    %857 = arith.addf %855, %856 : vector<8x32xf32>
    %858 = math.tanh %857 : vector<8x32xf32>
    %859 = arith.mulf %854, %858 : vector<8x32xf32>
    %860 = arith.index_cast %c7_i32_249 : i32 to index
    %c0_253 = arith.constant 0 : index
    %c0_254 = arith.constant 0 : index
    %861 = vector.load %arg11[%860, %c0_253, %c0_254] : memref<8x8x32xf32, #tpu.memory_space<vmem>>, vector<1x8x32xf32>
    %862 = vector.shape_cast %861 : vector<1x8x32xf32> to vector<8x32xf32>
    %863 = vector.shape_cast %859 : vector<8x32xf32> to vector<1x8x32xf32>
    tpu.vector_store %arg11[%860, %c0_253, %c0_254], %863 {strides = array<i32>} : memref<8x8x32xf32, #tpu.memory_space<vmem>>, vector<1x8x32xf32>,
    %c8_i32_255 = arith.constant 8 : i32
    %c3_256 = arith.constant 3 : index
    %c0_257 = arith.constant 0 : index
    %c0_258 = arith.constant 0 : index
    %864 = vector.load %arg3[%c3_256, %c0_257, %c0_258] : memref<5x32x128xf32, #tpu.memory_space<vmem>>, vector<1x32x128xf32>
    %865 = vector.shape_cast %864 : vector<1x32x128xf32> to vector<32x128xf32>
    %c4 = arith.constant 4 : index
    %c0_259 = arith.constant 0 : index
    %c0_260 = arith.constant 0 : index
    %866 = vector.load %arg4[%c4, %c0_259, %c0_260] : memref<6x32x128xf32, #tpu.memory_space<vmem>>, vector<1x32x128xf32>
    %867 = vector.shape_cast %866 : vector<1x32x128xf32> to vector<32x128xf32>
    %c4_261 = arith.constant 4 : index
    %c0_262 = arith.constant 0 : index
    %c0_263 = arith.constant 0 : index
    %868 = vector.load %arg5[%c4_261, %c0_262, %c0_263] : memref<6x1x128xf32, #tpu.memory_space<vmem>>, vector<1x1x128xf32>
    %869 = vector.shape_cast %868 : vector<1x1x128xf32> to vector<1x128xf32>
    %c0_264 = arith.constant 0 : index
    %c0_265 = arith.constant 0 : index
    %c0_266 = arith.constant 0 : index
    %870 = vector.load %arg11[%c0_264, %c0_265, %c0_266] : memref<8x8x32xf32, #tpu.memory_space<vmem>>, vector<8x8x32xf32>
    %871 = vector.shape_cast %870 : vector<8x8x32xf32> to vector<64x32xf32>
    %cst_267 = arith.constant dense<0.000000e+00> : vector<64x128xf32>
    %872 = tpu.matmul %871, %865, %cst_267 {dimension_numbers = #tpu.dot_dimension_numbers<[1], [0], [0], [1], [0, 0, 1, 1], [], []>} : vector<64x32xf32>, vector<32x128xf32>, vector<64x128xf32> -> vector<64x128xf32>
    %873 = vector.broadcast %869 : vector<1x128xf32> to vector<64x128xf32>
    %874 = arith.addf %872, %873 : vector<64x128xf32>
    %875 = vector.shape_cast %874 : vector<64x128xf32> to vector<8x8x128xf32>
    %c0_268 = arith.constant 0 : index
    %c0_269 = arith.constant 0 : index
    %c0_270 = arith.constant 0 : index
    %876 = vector.load %arg10[%c0_268, %c0_269, %c0_270] : memref<8x8x128xf32, #tpu.memory_space<vmem>>, vector<8x8x128xf32>
    tpu.vector_store %arg10[%c0_268, %c0_269, %c0_270], %875 {strides = array<i32>} : memref<8x8x128xf32, #tpu.memory_space<vmem>>, vector<8x8x128xf32>,
    %cst_271 = arith.constant 0.000000e+00 : f32
    %877 = vector.broadcast %cst_271 : f32 to vector<8x32xf32>
    %cst_272 = arith.constant 0.000000e+00 : f32
    %878 = vector.broadcast %cst_272 : f32 to vector<8x32xf32>
    %c0_i32_273 = arith.constant 0 : i32
    %879 = arith.index_cast %c0_i32_273 : i32 to index
    %c0_274 = arith.constant 0 : index
    %c0_275 = arith.constant 0 : index
    %880 = vector.load %arg10[%879, %c0_274, %c0_275] : memref<8x8x128xf32, #tpu.memory_space<vmem>>, vector<1x8x128xf32>
    %881 = vector.shape_cast %880 : vector<1x8x128xf32> to vector<8x128xf32>
    %cst_276 = arith.constant dense<0.000000e+00> : vector<8x128xf32>
    %882 = tpu.matmul %877, %867, %cst_276 {dimension_numbers = #tpu.dot_dimension_numbers<[1], [0], [0], [1], [0, 0, 1, 1], [], []>} : vector<8x32xf32>, vector<32x128xf32>, vector<8x128xf32> -> vector<8x128xf32>
    %883 = arith.addf %881, %882 : vector<8x128xf32>
    %884 = vector.broadcast %3 : vector<1x128xf32> to vector<8x128xf32>
    %885 = arith.mulf %883, %884 : vector<8x128xf32>
    %886 = math.tanh %885 : vector<8x128xf32>
    %887 = vector.broadcast %3 : vector<1x128xf32> to vector<8x128xf32>
    %888 = arith.mulf %886, %887 : vector<8x128xf32>
    %889 = vector.broadcast %4 : vector<1x128xf32> to vector<8x128xf32>
    %890 = arith.addf %888, %889 : vector<8x128xf32>
    %891 = vector.extract_strided_slice %890 {offsets = [0, 0], sizes = [8, 32], strides = [1, 1]} : vector<8x128xf32> to vector<8x32xf32>
    %892 = vector.extract_strided_slice %890 {offsets = [0, 32], sizes = [8, 32], strides = [1, 1]} : vector<8x128xf32> to vector<8x32xf32>
    %893 = vector.extract_strided_slice %890 {offsets = [0, 64], sizes = [8, 32], strides = [1, 1]} : vector<8x128xf32> to vector<8x32xf32>
    %894 = vector.extract_strided_slice %890 {offsets = [0, 96], sizes = [8, 32], strides = [1, 1]} : vector<8x128xf32> to vector<8x32xf32>
    %895 = arith.mulf %892, %878 : vector<8x32xf32>
    %896 = arith.mulf %891, %893 : vector<8x32xf32>
    %897 = arith.addf %895, %896 : vector<8x32xf32>
    %898 = math.tanh %897 : vector<8x32xf32>
    %899 = arith.mulf %894, %898 : vector<8x32xf32>
    %900 = arith.index_cast %c0_i32_273 : i32 to index
    %c0_277 = arith.constant 0 : index
    %c0_278 = arith.constant 0 : index
    %901 = vector.load %arg11[%900, %c0_277, %c0_278] : memref<8x8x32xf32, #tpu.memory_space<vmem>>, vector<1x8x32xf32>
    %902 = vector.shape_cast %901 : vector<1x8x32xf32> to vector<8x32xf32>
    %903 = vector.shape_cast %899 : vector<8x32xf32> to vector<1x8x32xf32>
    tpu.vector_store %arg11[%900, %c0_277, %c0_278], %903 {strides = array<i32>} : memref<8x8x32xf32, #tpu.memory_space<vmem>>, vector<1x8x32xf32>,
    %c1_i32_279 = arith.constant 1 : i32
    %904 = arith.index_cast %c1_i32_279 : i32 to index
    %c0_280 = arith.constant 0 : index
    %c0_281 = arith.constant 0 : index
    %905 = vector.load %arg10[%904, %c0_280, %c0_281] : memref<8x8x128xf32, #tpu.memory_space<vmem>>, vector<1x8x128xf32>
    %906 = vector.shape_cast %905 : vector<1x8x128xf32> to vector<8x128xf32>
    %cst_282 = arith.constant dense<0.000000e+00> : vector<8x128xf32>
    %907 = tpu.matmul %899, %867, %cst_282 {dimension_numbers = #tpu.dot_dimension_numbers<[1], [0], [0], [1], [0, 0, 1, 1], [], []>} : vector<8x32xf32>, vector<32x128xf32>, vector<8x128xf32> -> vector<8x128xf32>
    %908 = arith.addf %906, %907 : vector<8x128xf32>
    %909 = vector.broadcast %3 : vector<1x128xf32> to vector<8x128xf32>
    %910 = arith.mulf %908, %909 : vector<8x128xf32>
    %911 = math.tanh %910 : vector<8x128xf32>
    %912 = vector.broadcast %3 : vector<1x128xf32> to vector<8x128xf32>
    %913 = arith.mulf %911, %912 : vector<8x128xf32>
    %914 = vector.broadcast %4 : vector<1x128xf32> to vector<8x128xf32>
    %915 = arith.addf %913, %914 : vector<8x128xf32>
    %916 = vector.extract_strided_slice %915 {offsets = [0, 0], sizes = [8, 32], strides = [1, 1]} : vector<8x128xf32> to vector<8x32xf32>
    %917 = vector.extract_strided_slice %915 {offsets = [0, 32], sizes = [8, 32], strides = [1, 1]} : vector<8x128xf32> to vector<8x32xf32>
    %918 = vector.extract_strided_slice %915 {offsets = [0, 64], sizes = [8, 32], strides = [1, 1]} : vector<8x128xf32> to vector<8x32xf32>
    %919 = vector.extract_strided_slice %915 {offsets = [0, 96], sizes = [8, 32], strides = [1, 1]} : vector<8x128xf32> to vector<8x32xf32>
    %920 = arith.mulf %917, %897 : vector<8x32xf32>
    %921 = arith.mulf %916, %918 : vector<8x32xf32>
    %922 = arith.addf %920, %921 : vector<8x32xf32>
    %923 = math.tanh %922 : vector<8x32xf32>
    %924 = arith.mulf %919, %923 : vector<8x32xf32>
    %925 = arith.index_cast %c1_i32_279 : i32 to index
    %c0_283 = arith.constant 0 : index
    %c0_284 = arith.constant 0 : index
    %926 = vector.load %arg11[%925, %c0_283, %c0_284] : memref<8x8x32xf32, #tpu.memory_space<vmem>>, vector<1x8x32xf32>
    %927 = vector.shape_cast %926 : vector<1x8x32xf32> to vector<8x32xf32>
    %928 = vector.shape_cast %924 : vector<8x32xf32> to vector<1x8x32xf32>
    tpu.vector_store %arg11[%925, %c0_283, %c0_284], %928 {strides = array<i32>} : memref<8x8x32xf32, #tpu.memory_space<vmem>>, vector<1x8x32xf32>,
    %c2_i32_285 = arith.constant 2 : i32
    %929 = arith.index_cast %c2_i32_285 : i32 to index
    %c0_286 = arith.constant 0 : index
    %c0_287 = arith.constant 0 : index
    %930 = vector.load %arg10[%929, %c0_286, %c0_287] : memref<8x8x128xf32, #tpu.memory_space<vmem>>, vector<1x8x128xf32>
    %931 = vector.shape_cast %930 : vector<1x8x128xf32> to vector<8x128xf32>
    %cst_288 = arith.constant dense<0.000000e+00> : vector<8x128xf32>
    %932 = tpu.matmul %924, %867, %cst_288 {dimension_numbers = #tpu.dot_dimension_numbers<[1], [0], [0], [1], [0, 0, 1, 1], [], []>} : vector<8x32xf32>, vector<32x128xf32>, vector<8x128xf32> -> vector<8x128xf32>
    %933 = arith.addf %931, %932 : vector<8x128xf32>
    %934 = vector.broadcast %3 : vector<1x128xf32> to vector<8x128xf32>
    %935 = arith.mulf %933, %934 : vector<8x128xf32>
    %936 = math.tanh %935 : vector<8x128xf32>
    %937 = vector.broadcast %3 : vector<1x128xf32> to vector<8x128xf32>
    %938 = arith.mulf %936, %937 : vector<8x128xf32>
    %939 = vector.broadcast %4 : vector<1x128xf32> to vector<8x128xf32>
    %940 = arith.addf %938, %939 : vector<8x128xf32>
    %941 = vector.extract_strided_slice %940 {offsets = [0, 0], sizes = [8, 32], strides = [1, 1]} : vector<8x128xf32> to vector<8x32xf32>
    %942 = vector.extract_strided_slice %940 {offsets = [0, 32], sizes = [8, 32], strides = [1, 1]} : vector<8x128xf32> to vector<8x32xf32>
    %943 = vector.extract_strided_slice %940 {offsets = [0, 64], sizes = [8, 32], strides = [1, 1]} : vector<8x128xf32> to vector<8x32xf32>
    %944 = vector.extract_strided_slice %940 {offsets = [0, 96], sizes = [8, 32], strides = [1, 1]} : vector<8x128xf32> to vector<8x32xf32>
    %945 = arith.mulf %942, %922 : vector<8x32xf32>
    %946 = arith.mulf %941, %943 : vector<8x32xf32>
    %947 = arith.addf %945, %946 : vector<8x32xf32>
    %948 = math.tanh %947 : vector<8x32xf32>
    %949 = arith.mulf %944, %948 : vector<8x32xf32>
    %950 = arith.index_cast %c2_i32_285 : i32 to index
    %c0_289 = arith.constant 0 : index
    %c0_290 = arith.constant 0 : index
    %951 = vector.load %arg11[%950, %c0_289, %c0_290] : memref<8x8x32xf32, #tpu.memory_space<vmem>>, vector<1x8x32xf32>
    %952 = vector.shape_cast %951 : vector<1x8x32xf32> to vector<8x32xf32>
    %953 = vector.shape_cast %949 : vector<8x32xf32> to vector<1x8x32xf32>
    tpu.vector_store %arg11[%950, %c0_289, %c0_290], %953 {strides = array<i32>} : memref<8x8x32xf32, #tpu.memory_space<vmem>>, vector<1x8x32xf32>,
    %c3_i32_291 = arith.constant 3 : i32
    %954 = arith.index_cast %c3_i32_291 : i32 to index
    %c0_292 = arith.constant 0 : index
    %c0_293 = arith.constant 0 : index
    %955 = vector.load %arg10[%954, %c0_292, %c0_293] : memref<8x8x128xf32, #tpu.memory_space<vmem>>, vector<1x8x128xf32>
    %956 = vector.shape_cast %955 : vector<1x8x128xf32> to vector<8x128xf32>
    %cst_294 = arith.constant dense<0.000000e+00> : vector<8x128xf32>
    %957 = tpu.matmul %949, %867, %cst_294 {dimension_numbers = #tpu.dot_dimension_numbers<[1], [0], [0], [1], [0, 0, 1, 1], [], []>} : vector<8x32xf32>, vector<32x128xf32>, vector<8x128xf32> -> vector<8x128xf32>
    %958 = arith.addf %956, %957 : vector<8x128xf32>
    %959 = vector.broadcast %3 : vector<1x128xf32> to vector<8x128xf32>
    %960 = arith.mulf %958, %959 : vector<8x128xf32>
    %961 = math.tanh %960 : vector<8x128xf32>
    %962 = vector.broadcast %3 : vector<1x128xf32> to vector<8x128xf32>
    %963 = arith.mulf %961, %962 : vector<8x128xf32>
    %964 = vector.broadcast %4 : vector<1x128xf32> to vector<8x128xf32>
    %965 = arith.addf %963, %964 : vector<8x128xf32>
    %966 = vector.extract_strided_slice %965 {offsets = [0, 0], sizes = [8, 32], strides = [1, 1]} : vector<8x128xf32> to vector<8x32xf32>
    %967 = vector.extract_strided_slice %965 {offsets = [0, 32], sizes = [8, 32], strides = [1, 1]} : vector<8x128xf32> to vector<8x32xf32>
    %968 = vector.extract_strided_slice %965 {offsets = [0, 64], sizes = [8, 32], strides = [1, 1]} : vector<8x128xf32> to vector<8x32xf32>
    %969 = vector.extract_strided_slice %965 {offsets = [0, 96], sizes = [8, 32], strides = [1, 1]} : vector<8x128xf32> to vector<8x32xf32>
    %970 = arith.mulf %967, %947 : vector<8x32xf32>
    %971 = arith.mulf %966, %968 : vector<8x32xf32>
    %972 = arith.addf %970, %971 : vector<8x32xf32>
    %973 = math.tanh %972 : vector<8x32xf32>
    %974 = arith.mulf %969, %973 : vector<8x32xf32>
    %975 = arith.index_cast %c3_i32_291 : i32 to index
    %c0_295 = arith.constant 0 : index
    %c0_296 = arith.constant 0 : index
    %976 = vector.load %arg11[%975, %c0_295, %c0_296] : memref<8x8x32xf32, #tpu.memory_space<vmem>>, vector<1x8x32xf32>
    %977 = vector.shape_cast %976 : vector<1x8x32xf32> to vector<8x32xf32>
    %978 = vector.shape_cast %974 : vector<8x32xf32> to vector<1x8x32xf32>
    tpu.vector_store %arg11[%975, %c0_295, %c0_296], %978 {strides = array<i32>} : memref<8x8x32xf32, #tpu.memory_space<vmem>>, vector<1x8x32xf32>,
    %c4_i32_297 = arith.constant 4 : i32
    %979 = arith.index_cast %c4_i32_297 : i32 to index
    %c0_298 = arith.constant 0 : index
    %c0_299 = arith.constant 0 : index
    %980 = vector.load %arg10[%979, %c0_298, %c0_299] : memref<8x8x128xf32, #tpu.memory_space<vmem>>, vector<1x8x128xf32>
    %981 = vector.shape_cast %980 : vector<1x8x128xf32> to vector<8x128xf32>
    %cst_300 = arith.constant dense<0.000000e+00> : vector<8x128xf32>
    %982 = tpu.matmul %974, %867, %cst_300 {dimension_numbers = #tpu.dot_dimension_numbers<[1], [0], [0], [1], [0, 0, 1, 1], [], []>} : vector<8x32xf32>, vector<32x128xf32>, vector<8x128xf32> -> vector<8x128xf32>
    %983 = arith.addf %981, %982 : vector<8x128xf32>
    %984 = vector.broadcast %3 : vector<1x128xf32> to vector<8x128xf32>
    %985 = arith.mulf %983, %984 : vector<8x128xf32>
    %986 = math.tanh %985 : vector<8x128xf32>
    %987 = vector.broadcast %3 : vector<1x128xf32> to vector<8x128xf32>
    %988 = arith.mulf %986, %987 : vector<8x128xf32>
    %989 = vector.broadcast %4 : vector<1x128xf32> to vector<8x128xf32>
    %990 = arith.addf %988, %989 : vector<8x128xf32>
    %991 = vector.extract_strided_slice %990 {offsets = [0, 0], sizes = [8, 32], strides = [1, 1]} : vector<8x128xf32> to vector<8x32xf32>
    %992 = vector.extract_strided_slice %990 {offsets = [0, 32], sizes = [8, 32], strides = [1, 1]} : vector<8x128xf32> to vector<8x32xf32>
    %993 = vector.extract_strided_slice %990 {offsets = [0, 64], sizes = [8, 32], strides = [1, 1]} : vector<8x128xf32> to vector<8x32xf32>
    %994 = vector.extract_strided_slice %990 {offsets = [0, 96], sizes = [8, 32], strides = [1, 1]} : vector<8x128xf32> to vector<8x32xf32>
    %995 = arith.mulf %992, %972 : vector<8x32xf32>
    %996 = arith.mulf %991, %993 : vector<8x32xf32>
    %997 = arith.addf %995, %996 : vector<8x32xf32>
    %998 = math.tanh %997 : vector<8x32xf32>
    %999 = arith.mulf %994, %998 : vector<8x32xf32>
    %1000 = arith.index_cast %c4_i32_297 : i32 to index
    %c0_301 = arith.constant 0 : index
    %c0_302 = arith.constant 0 : index
    %1001 = vector.load %arg11[%1000, %c0_301, %c0_302] : memref<8x8x32xf32, #tpu.memory_space<vmem>>, vector<1x8x32xf32>
    %1002 = vector.shape_cast %1001 : vector<1x8x32xf32> to vector<8x32xf32>
    %1003 = vector.shape_cast %999 : vector<8x32xf32> to vector<1x8x32xf32>
    tpu.vector_store %arg11[%1000, %c0_301, %c0_302], %1003 {strides = array<i32>} : memref<8x8x32xf32, #tpu.memory_space<vmem>>, vector<1x8x32xf32>,
    %c5_i32_303 = arith.constant 5 : i32
    %1004 = arith.index_cast %c5_i32_303 : i32 to index
    %c0_304 = arith.constant 0 : index
    %c0_305 = arith.constant 0 : index
    %1005 = vector.load %arg10[%1004, %c0_304, %c0_305] : memref<8x8x128xf32, #tpu.memory_space<vmem>>, vector<1x8x128xf32>
    %1006 = vector.shape_cast %1005 : vector<1x8x128xf32> to vector<8x128xf32>
    %cst_306 = arith.constant dense<0.000000e+00> : vector<8x128xf32>
    %1007 = tpu.matmul %999, %867, %cst_306 {dimension_numbers = #tpu.dot_dimension_numbers<[1], [0], [0], [1], [0, 0, 1, 1], [], []>} : vector<8x32xf32>, vector<32x128xf32>, vector<8x128xf32> -> vector<8x128xf32>
    %1008 = arith.addf %1006, %1007 : vector<8x128xf32>
    %1009 = vector.broadcast %3 : vector<1x128xf32> to vector<8x128xf32>
    %1010 = arith.mulf %1008, %1009 : vector<8x128xf32>
    %1011 = math.tanh %1010 : vector<8x128xf32>
    %1012 = vector.broadcast %3 : vector<1x128xf32> to vector<8x128xf32>
    %1013 = arith.mulf %1011, %1012 : vector<8x128xf32>
    %1014 = vector.broadcast %4 : vector<1x128xf32> to vector<8x128xf32>
    %1015 = arith.addf %1013, %1014 : vector<8x128xf32>
    %1016 = vector.extract_strided_slice %1015 {offsets = [0, 0], sizes = [8, 32], strides = [1, 1]} : vector<8x128xf32> to vector<8x32xf32>
    %1017 = vector.extract_strided_slice %1015 {offsets = [0, 32], sizes = [8, 32], strides = [1, 1]} : vector<8x128xf32> to vector<8x32xf32>
    %1018 = vector.extract_strided_slice %1015 {offsets = [0, 64], sizes = [8, 32], strides = [1, 1]} : vector<8x128xf32> to vector<8x32xf32>
    %1019 = vector.extract_strided_slice %1015 {offsets = [0, 96], sizes = [8, 32], strides = [1, 1]} : vector<8x128xf32> to vector<8x32xf32>
    %1020 = arith.mulf %1017, %997 : vector<8x32xf32>
    %1021 = arith.mulf %1016, %1018 : vector<8x32xf32>
    %1022 = arith.addf %1020, %1021 : vector<8x32xf32>
    %1023 = math.tanh %1022 : vector<8x32xf32>
    %1024 = arith.mulf %1019, %1023 : vector<8x32xf32>
    %1025 = arith.index_cast %c5_i32_303 : i32 to index
    %c0_307 = arith.constant 0 : index
    %c0_308 = arith.constant 0 : index
    %1026 = vector.load %arg11[%1025, %c0_307, %c0_308] : memref<8x8x32xf32, #tpu.memory_space<vmem>>, vector<1x8x32xf32>
    %1027 = vector.shape_cast %1026 : vector<1x8x32xf32> to vector<8x32xf32>
    %1028 = vector.shape_cast %1024 : vector<8x32xf32> to vector<1x8x32xf32>
    tpu.vector_store %arg11[%1025, %c0_307, %c0_308], %1028 {strides = array<i32>} : memref<8x8x32xf32, #tpu.memory_space<vmem>>, vector<1x8x32xf32>,
    %c6_i32_309 = arith.constant 6 : i32
    %1029 = arith.index_cast %c6_i32_309 : i32 to index
    %c0_310 = arith.constant 0 : index
    %c0_311 = arith.constant 0 : index
    %1030 = vector.load %arg10[%1029, %c0_310, %c0_311] : memref<8x8x128xf32, #tpu.memory_space<vmem>>, vector<1x8x128xf32>
    %1031 = vector.shape_cast %1030 : vector<1x8x128xf32> to vector<8x128xf32>
    %cst_312 = arith.constant dense<0.000000e+00> : vector<8x128xf32>
    %1032 = tpu.matmul %1024, %867, %cst_312 {dimension_numbers = #tpu.dot_dimension_numbers<[1], [0], [0], [1], [0, 0, 1, 1], [], []>} : vector<8x32xf32>, vector<32x128xf32>, vector<8x128xf32> -> vector<8x128xf32>
    %1033 = arith.addf %1031, %1032 : vector<8x128xf32>
    %1034 = vector.broadcast %3 : vector<1x128xf32> to vector<8x128xf32>
    %1035 = arith.mulf %1033, %1034 : vector<8x128xf32>
    %1036 = math.tanh %1035 : vector<8x128xf32>
    %1037 = vector.broadcast %3 : vector<1x128xf32> to vector<8x128xf32>
    %1038 = arith.mulf %1036, %1037 : vector<8x128xf32>
    %1039 = vector.broadcast %4 : vector<1x128xf32> to vector<8x128xf32>
    %1040 = arith.addf %1038, %1039 : vector<8x128xf32>
    %1041 = vector.extract_strided_slice %1040 {offsets = [0, 0], sizes = [8, 32], strides = [1, 1]} : vector<8x128xf32> to vector<8x32xf32>
    %1042 = vector.extract_strided_slice %1040 {offsets = [0, 32], sizes = [8, 32], strides = [1, 1]} : vector<8x128xf32> to vector<8x32xf32>
    %1043 = vector.extract_strided_slice %1040 {offsets = [0, 64], sizes = [8, 32], strides = [1, 1]} : vector<8x128xf32> to vector<8x32xf32>
    %1044 = vector.extract_strided_slice %1040 {offsets = [0, 96], sizes = [8, 32], strides = [1, 1]} : vector<8x128xf32> to vector<8x32xf32>
    %1045 = arith.mulf %1042, %1022 : vector<8x32xf32>
    %1046 = arith.mulf %1041, %1043 : vector<8x32xf32>
    %1047 = arith.addf %1045, %1046 : vector<8x32xf32>
    %1048 = math.tanh %1047 : vector<8x32xf32>
    %1049 = arith.mulf %1044, %1048 : vector<8x32xf32>
    %1050 = arith.index_cast %c6_i32_309 : i32 to index
    %c0_313 = arith.constant 0 : index
    %c0_314 = arith.constant 0 : index
    %1051 = vector.load %arg11[%1050, %c0_313, %c0_314] : memref<8x8x32xf32, #tpu.memory_space<vmem>>, vector<1x8x32xf32>
    %1052 = vector.shape_cast %1051 : vector<1x8x32xf32> to vector<8x32xf32>
    %1053 = vector.shape_cast %1049 : vector<8x32xf32> to vector<1x8x32xf32>
    tpu.vector_store %arg11[%1050, %c0_313, %c0_314], %1053 {strides = array<i32>} : memref<8x8x32xf32, #tpu.memory_space<vmem>>, vector<1x8x32xf32>,
    %c7_i32_315 = arith.constant 7 : i32
    %1054 = arith.index_cast %c7_i32_315 : i32 to index
    %c0_316 = arith.constant 0 : index
    %c0_317 = arith.constant 0 : index
    %1055 = vector.load %arg10[%1054, %c0_316, %c0_317] : memref<8x8x128xf32, #tpu.memory_space<vmem>>, vector<1x8x128xf32>
    %1056 = vector.shape_cast %1055 : vector<1x8x128xf32> to vector<8x128xf32>
    %cst_318 = arith.constant dense<0.000000e+00> : vector<8x128xf32>
    %1057 = tpu.matmul %1049, %867, %cst_318 {dimension_numbers = #tpu.dot_dimension_numbers<[1], [0], [0], [1], [0, 0, 1, 1], [], []>} : vector<8x32xf32>, vector<32x128xf32>, vector<8x128xf32> -> vector<8x128xf32>
    %1058 = arith.addf %1056, %1057 : vector<8x128xf32>
    %1059 = vector.broadcast %3 : vector<1x128xf32> to vector<8x128xf32>
    %1060 = arith.mulf %1058, %1059 : vector<8x128xf32>
    %1061 = math.tanh %1060 : vector<8x128xf32>
    %1062 = vector.broadcast %3 : vector<1x128xf32> to vector<8x128xf32>
    %1063 = arith.mulf %1061, %1062 : vector<8x128xf32>
    %1064 = vector.broadcast %4 : vector<1x128xf32> to vector<8x128xf32>
    %1065 = arith.addf %1063, %1064 : vector<8x128xf32>
    %1066 = vector.extract_strided_slice %1065 {offsets = [0, 0], sizes = [8, 32], strides = [1, 1]} : vector<8x128xf32> to vector<8x32xf32>
    %1067 = vector.extract_strided_slice %1065 {offsets = [0, 32], sizes = [8, 32], strides = [1, 1]} : vector<8x128xf32> to vector<8x32xf32>
    %1068 = vector.extract_strided_slice %1065 {offsets = [0, 64], sizes = [8, 32], strides = [1, 1]} : vector<8x128xf32> to vector<8x32xf32>
    %1069 = vector.extract_strided_slice %1065 {offsets = [0, 96], sizes = [8, 32], strides = [1, 1]} : vector<8x128xf32> to vector<8x32xf32>
    %1070 = arith.mulf %1067, %1047 : vector<8x32xf32>
    %1071 = arith.mulf %1066, %1068 : vector<8x32xf32>
    %1072 = arith.addf %1070, %1071 : vector<8x32xf32>
    %1073 = math.tanh %1072 : vector<8x32xf32>
    %1074 = arith.mulf %1069, %1073 : vector<8x32xf32>
    %1075 = arith.index_cast %c7_i32_315 : i32 to index
    %c0_319 = arith.constant 0 : index
    %c0_320 = arith.constant 0 : index
    %1076 = vector.load %arg11[%1075, %c0_319, %c0_320] : memref<8x8x32xf32, #tpu.memory_space<vmem>>, vector<1x8x32xf32>
    %1077 = vector.shape_cast %1076 : vector<1x8x32xf32> to vector<8x32xf32>
    %1078 = vector.shape_cast %1074 : vector<8x32xf32> to vector<1x8x32xf32>
    tpu.vector_store %arg11[%1075, %c0_319, %c0_320], %1078 {strides = array<i32>} : memref<8x8x32xf32, #tpu.memory_space<vmem>>, vector<1x8x32xf32>,
    %c8_i32_321 = arith.constant 8 : i32
    %c4_322 = arith.constant 4 : index
    %c0_323 = arith.constant 0 : index
    %c0_324 = arith.constant 0 : index
    %1079 = vector.load %arg3[%c4_322, %c0_323, %c0_324] : memref<5x32x128xf32, #tpu.memory_space<vmem>>, vector<1x32x128xf32>
    %1080 = vector.shape_cast %1079 : vector<1x32x128xf32> to vector<32x128xf32>
    %c5 = arith.constant 5 : index
    %c0_325 = arith.constant 0 : index
    %c0_326 = arith.constant 0 : index
    %1081 = vector.load %arg4[%c5, %c0_325, %c0_326] : memref<6x32x128xf32, #tpu.memory_space<vmem>>, vector<1x32x128xf32>
    %1082 = vector.shape_cast %1081 : vector<1x32x128xf32> to vector<32x128xf32>
    %c5_327 = arith.constant 5 : index
    %c0_328 = arith.constant 0 : index
    %c0_329 = arith.constant 0 : index
    %1083 = vector.load %arg5[%c5_327, %c0_328, %c0_329] : memref<6x1x128xf32, #tpu.memory_space<vmem>>, vector<1x1x128xf32>
    %1084 = vector.shape_cast %1083 : vector<1x1x128xf32> to vector<1x128xf32>
    %c0_330 = arith.constant 0 : index
    %c0_331 = arith.constant 0 : index
    %c0_332 = arith.constant 0 : index
    %1085 = vector.load %arg11[%c0_330, %c0_331, %c0_332] : memref<8x8x32xf32, #tpu.memory_space<vmem>>, vector<8x8x32xf32>
    %1086 = vector.shape_cast %1085 : vector<8x8x32xf32> to vector<64x32xf32>
    %cst_333 = arith.constant dense<0.000000e+00> : vector<64x128xf32>
    %1087 = tpu.matmul %1086, %1080, %cst_333 {dimension_numbers = #tpu.dot_dimension_numbers<[1], [0], [0], [1], [0, 0, 1, 1], [], []>} : vector<64x32xf32>, vector<32x128xf32>, vector<64x128xf32> -> vector<64x128xf32>
    %1088 = vector.broadcast %1084 : vector<1x128xf32> to vector<64x128xf32>
    %1089 = arith.addf %1087, %1088 : vector<64x128xf32>
    %1090 = vector.shape_cast %1089 : vector<64x128xf32> to vector<8x8x128xf32>
    %c0_334 = arith.constant 0 : index
    %c0_335 = arith.constant 0 : index
    %c0_336 = arith.constant 0 : index
    %1091 = vector.load %arg10[%c0_334, %c0_335, %c0_336] : memref<8x8x128xf32, #tpu.memory_space<vmem>>, vector<8x8x128xf32>
    tpu.vector_store %arg10[%c0_334, %c0_335, %c0_336], %1090 {strides = array<i32>} : memref<8x8x128xf32, #tpu.memory_space<vmem>>, vector<8x8x128xf32>,
    %cst_337 = arith.constant 0.000000e+00 : f32
    %1092 = vector.broadcast %cst_337 : f32 to vector<8x32xf32>
    %cst_338 = arith.constant 0.000000e+00 : f32
    %1093 = vector.broadcast %cst_338 : f32 to vector<8x32xf32>
    %c0_i32_339 = arith.constant 0 : i32
    %1094 = arith.index_cast %c0_i32_339 : i32 to index
    %c0_340 = arith.constant 0 : index
    %c0_341 = arith.constant 0 : index
    %1095 = vector.load %arg10[%1094, %c0_340, %c0_341] : memref<8x8x128xf32, #tpu.memory_space<vmem>>, vector<1x8x128xf32>
    %1096 = vector.shape_cast %1095 : vector<1x8x128xf32> to vector<8x128xf32>
    %cst_342 = arith.constant dense<0.000000e+00> : vector<8x128xf32>
    %1097 = tpu.matmul %1092, %1082, %cst_342 {dimension_numbers = #tpu.dot_dimension_numbers<[1], [0], [0], [1], [0, 0, 1, 1], [], []>} : vector<8x32xf32>, vector<32x128xf32>, vector<8x128xf32> -> vector<8x128xf32>
    %1098 = arith.addf %1096, %1097 : vector<8x128xf32>
    %1099 = vector.broadcast %3 : vector<1x128xf32> to vector<8x128xf32>
    %1100 = arith.mulf %1098, %1099 : vector<8x128xf32>
    %1101 = math.tanh %1100 : vector<8x128xf32>
    %1102 = vector.broadcast %3 : vector<1x128xf32> to vector<8x128xf32>
    %1103 = arith.mulf %1101, %1102 : vector<8x128xf32>
    %1104 = vector.broadcast %4 : vector<1x128xf32> to vector<8x128xf32>
    %1105 = arith.addf %1103, %1104 : vector<8x128xf32>
    %1106 = vector.extract_strided_slice %1105 {offsets = [0, 0], sizes = [8, 32], strides = [1, 1]} : vector<8x128xf32> to vector<8x32xf32>
    %1107 = vector.extract_strided_slice %1105 {offsets = [0, 32], sizes = [8, 32], strides = [1, 1]} : vector<8x128xf32> to vector<8x32xf32>
    %1108 = vector.extract_strided_slice %1105 {offsets = [0, 64], sizes = [8, 32], strides = [1, 1]} : vector<8x128xf32> to vector<8x32xf32>
    %1109 = vector.extract_strided_slice %1105 {offsets = [0, 96], sizes = [8, 32], strides = [1, 1]} : vector<8x128xf32> to vector<8x32xf32>
    %1110 = arith.mulf %1107, %1093 : vector<8x32xf32>
    %1111 = arith.mulf %1106, %1108 : vector<8x32xf32>
    %1112 = arith.addf %1110, %1111 : vector<8x32xf32>
    %1113 = math.tanh %1112 : vector<8x32xf32>
    %1114 = arith.mulf %1109, %1113 : vector<8x32xf32>
    %c1_i32_343 = arith.constant 1 : i32
    %1115 = arith.index_cast %c1_i32_343 : i32 to index
    %c0_344 = arith.constant 0 : index
    %c0_345 = arith.constant 0 : index
    %1116 = vector.load %arg10[%1115, %c0_344, %c0_345] : memref<8x8x128xf32, #tpu.memory_space<vmem>>, vector<1x8x128xf32>
    %1117 = vector.shape_cast %1116 : vector<1x8x128xf32> to vector<8x128xf32>
    %cst_346 = arith.constant dense<0.000000e+00> : vector<8x128xf32>
    %1118 = tpu.matmul %1114, %1082, %cst_346 {dimension_numbers = #tpu.dot_dimension_numbers<[1], [0], [0], [1], [0, 0, 1, 1], [], []>} : vector<8x32xf32>, vector<32x128xf32>, vector<8x128xf32> -> vector<8x128xf32>
    %1119 = arith.addf %1117, %1118 : vector<8x128xf32>
    %1120 = vector.broadcast %3 : vector<1x128xf32> to vector<8x128xf32>
    %1121 = arith.mulf %1119, %1120 : vector<8x128xf32>
    %1122 = math.tanh %1121 : vector<8x128xf32>
    %1123 = vector.broadcast %3 : vector<1x128xf32> to vector<8x128xf32>
    %1124 = arith.mulf %1122, %1123 : vector<8x128xf32>
    %1125 = vector.broadcast %4 : vector<1x128xf32> to vector<8x128xf32>
    %1126 = arith.addf %1124, %1125 : vector<8x128xf32>
    %1127 = vector.extract_strided_slice %1126 {offsets = [0, 0], sizes = [8, 32], strides = [1, 1]} : vector<8x128xf32> to vector<8x32xf32>
    %1128 = vector.extract_strided_slice %1126 {offsets = [0, 32], sizes = [8, 32], strides = [1, 1]} : vector<8x128xf32> to vector<8x32xf32>
    %1129 = vector.extract_strided_slice %1126 {offsets = [0, 64], sizes = [8, 32], strides = [1, 1]} : vector<8x128xf32> to vector<8x32xf32>
    %1130 = vector.extract_strided_slice %1126 {offsets = [0, 96], sizes = [8, 32], strides = [1, 1]} : vector<8x128xf32> to vector<8x32xf32>
    %1131 = arith.mulf %1128, %1112 : vector<8x32xf32>
    %1132 = arith.mulf %1127, %1129 : vector<8x32xf32>
    %1133 = arith.addf %1131, %1132 : vector<8x32xf32>
    %1134 = math.tanh %1133 : vector<8x32xf32>
    %1135 = arith.mulf %1130, %1134 : vector<8x32xf32>
    %c2_i32_347 = arith.constant 2 : i32
    %1136 = arith.index_cast %c2_i32_347 : i32 to index
    %c0_348 = arith.constant 0 : index
    %c0_349 = arith.constant 0 : index
    %1137 = vector.load %arg10[%1136, %c0_348, %c0_349] : memref<8x8x128xf32, #tpu.memory_space<vmem>>, vector<1x8x128xf32>
    %1138 = vector.shape_cast %1137 : vector<1x8x128xf32> to vector<8x128xf32>
    %cst_350 = arith.constant dense<0.000000e+00> : vector<8x128xf32>
    %1139 = tpu.matmul %1135, %1082, %cst_350 {dimension_numbers = #tpu.dot_dimension_numbers<[1], [0], [0], [1], [0, 0, 1, 1], [], []>} : vector<8x32xf32>, vector<32x128xf32>, vector<8x128xf32> -> vector<8x128xf32>
    %1140 = arith.addf %1138, %1139 : vector<8x128xf32>
    %1141 = vector.broadcast %3 : vector<1x128xf32> to vector<8x128xf32>
    %1142 = arith.mulf %1140, %1141 : vector<8x128xf32>
    %1143 = math.tanh %1142 : vector<8x128xf32>
    %1144 = vector.broadcast %3 : vector<1x128xf32> to vector<8x128xf32>
    %1145 = arith.mulf %1143, %1144 : vector<8x128xf32>
    %1146 = vector.broadcast %4 : vector<1x128xf32> to vector<8x128xf32>
    %1147 = arith.addf %1145, %1146 : vector<8x128xf32>
    %1148 = vector.extract_strided_slice %1147 {offsets = [0, 0], sizes = [8, 32], strides = [1, 1]} : vector<8x128xf32> to vector<8x32xf32>
    %1149 = vector.extract_strided_slice %1147 {offsets = [0, 32], sizes = [8, 32], strides = [1, 1]} : vector<8x128xf32> to vector<8x32xf32>
    %1150 = vector.extract_strided_slice %1147 {offsets = [0, 64], sizes = [8, 32], strides = [1, 1]} : vector<8x128xf32> to vector<8x32xf32>
    %1151 = vector.extract_strided_slice %1147 {offsets = [0, 96], sizes = [8, 32], strides = [1, 1]} : vector<8x128xf32> to vector<8x32xf32>
    %1152 = arith.mulf %1149, %1133 : vector<8x32xf32>
    %1153 = arith.mulf %1148, %1150 : vector<8x32xf32>
    %1154 = arith.addf %1152, %1153 : vector<8x32xf32>
    %1155 = math.tanh %1154 : vector<8x32xf32>
    %1156 = arith.mulf %1151, %1155 : vector<8x32xf32>
    %c3_i32_351 = arith.constant 3 : i32
    %1157 = arith.index_cast %c3_i32_351 : i32 to index
    %c0_352 = arith.constant 0 : index
    %c0_353 = arith.constant 0 : index
    %1158 = vector.load %arg10[%1157, %c0_352, %c0_353] : memref<8x8x128xf32, #tpu.memory_space<vmem>>, vector<1x8x128xf32>
    %1159 = vector.shape_cast %1158 : vector<1x8x128xf32> to vector<8x128xf32>
    %cst_354 = arith.constant dense<0.000000e+00> : vector<8x128xf32>
    %1160 = tpu.matmul %1156, %1082, %cst_354 {dimension_numbers = #tpu.dot_dimension_numbers<[1], [0], [0], [1], [0, 0, 1, 1], [], []>} : vector<8x32xf32>, vector<32x128xf32>, vector<8x128xf32> -> vector<8x128xf32>
    %1161 = arith.addf %1159, %1160 : vector<8x128xf32>
    %1162 = vector.broadcast %3 : vector<1x128xf32> to vector<8x128xf32>
    %1163 = arith.mulf %1161, %1162 : vector<8x128xf32>
    %1164 = math.tanh %1163 : vector<8x128xf32>
    %1165 = vector.broadcast %3 : vector<1x128xf32> to vector<8x128xf32>
    %1166 = arith.mulf %1164, %1165 : vector<8x128xf32>
    %1167 = vector.broadcast %4 : vector<1x128xf32> to vector<8x128xf32>
    %1168 = arith.addf %1166, %1167 : vector<8x128xf32>
    %1169 = vector.extract_strided_slice %1168 {offsets = [0, 0], sizes = [8, 32], strides = [1, 1]} : vector<8x128xf32> to vector<8x32xf32>
    %1170 = vector.extract_strided_slice %1168 {offsets = [0, 32], sizes = [8, 32], strides = [1, 1]} : vector<8x128xf32> to vector<8x32xf32>
    %1171 = vector.extract_strided_slice %1168 {offsets = [0, 64], sizes = [8, 32], strides = [1, 1]} : vector<8x128xf32> to vector<8x32xf32>
    %1172 = vector.extract_strided_slice %1168 {offsets = [0, 96], sizes = [8, 32], strides = [1, 1]} : vector<8x128xf32> to vector<8x32xf32>
    %1173 = arith.mulf %1170, %1154 : vector<8x32xf32>
    %1174 = arith.mulf %1169, %1171 : vector<8x32xf32>
    %1175 = arith.addf %1173, %1174 : vector<8x32xf32>
    %1176 = math.tanh %1175 : vector<8x32xf32>
    %1177 = arith.mulf %1172, %1176 : vector<8x32xf32>
    %c4_i32_355 = arith.constant 4 : i32
    %1178 = arith.index_cast %c4_i32_355 : i32 to index
    %c0_356 = arith.constant 0 : index
    %c0_357 = arith.constant 0 : index
    %1179 = vector.load %arg10[%1178, %c0_356, %c0_357] : memref<8x8x128xf32, #tpu.memory_space<vmem>>, vector<1x8x128xf32>
    %1180 = vector.shape_cast %1179 : vector<1x8x128xf32> to vector<8x128xf32>
    %cst_358 = arith.constant dense<0.000000e+00> : vector<8x128xf32>
    %1181 = tpu.matmul %1177, %1082, %cst_358 {dimension_numbers = #tpu.dot_dimension_numbers<[1], [0], [0], [1], [0, 0, 1, 1], [], []>} : vector<8x32xf32>, vector<32x128xf32>, vector<8x128xf32> -> vector<8x128xf32>
    %1182 = arith.addf %1180, %1181 : vector<8x128xf32>
    %1183 = vector.broadcast %3 : vector<1x128xf32> to vector<8x128xf32>
    %1184 = arith.mulf %1182, %1183 : vector<8x128xf32>
    %1185 = math.tanh %1184 : vector<8x128xf32>
    %1186 = vector.broadcast %3 : vector<1x128xf32> to vector<8x128xf32>
    %1187 = arith.mulf %1185, %1186 : vector<8x128xf32>
    %1188 = vector.broadcast %4 : vector<1x128xf32> to vector<8x128xf32>
    %1189 = arith.addf %1187, %1188 : vector<8x128xf32>
    %1190 = vector.extract_strided_slice %1189 {offsets = [0, 0], sizes = [8, 32], strides = [1, 1]} : vector<8x128xf32> to vector<8x32xf32>
    %1191 = vector.extract_strided_slice %1189 {offsets = [0, 32], sizes = [8, 32], strides = [1, 1]} : vector<8x128xf32> to vector<8x32xf32>
    %1192 = vector.extract_strided_slice %1189 {offsets = [0, 64], sizes = [8, 32], strides = [1, 1]} : vector<8x128xf32> to vector<8x32xf32>
    %1193 = vector.extract_strided_slice %1189 {offsets = [0, 96], sizes = [8, 32], strides = [1, 1]} : vector<8x128xf32> to vector<8x32xf32>
    %1194 = arith.mulf %1191, %1175 : vector<8x32xf32>
    %1195 = arith.mulf %1190, %1192 : vector<8x32xf32>
    %1196 = arith.addf %1194, %1195 : vector<8x32xf32>
    %1197 = math.tanh %1196 : vector<8x32xf32>
    %1198 = arith.mulf %1193, %1197 : vector<8x32xf32>
    %c5_i32_359 = arith.constant 5 : i32
    %1199 = arith.index_cast %c5_i32_359 : i32 to index
    %c0_360 = arith.constant 0 : index
    %c0_361 = arith.constant 0 : index
    %1200 = vector.load %arg10[%1199, %c0_360, %c0_361] : memref<8x8x128xf32, #tpu.memory_space<vmem>>, vector<1x8x128xf32>
    %1201 = vector.shape_cast %1200 : vector<1x8x128xf32> to vector<8x128xf32>
    %cst_362 = arith.constant dense<0.000000e+00> : vector<8x128xf32>
    %1202 = tpu.matmul %1198, %1082, %cst_362 {dimension_numbers = #tpu.dot_dimension_numbers<[1], [0], [0], [1], [0, 0, 1, 1], [], []>} : vector<8x32xf32>, vector<32x128xf32>, vector<8x128xf32> -> vector<8x128xf32>
    %1203 = arith.addf %1201, %1202 : vector<8x128xf32>
    %1204 = vector.broadcast %3 : vector<1x128xf32> to vector<8x128xf32>
    %1205 = arith.mulf %1203, %1204 : vector<8x128xf32>
    %1206 = math.tanh %1205 : vector<8x128xf32>
    %1207 = vector.broadcast %3 : vector<1x128xf32> to vector<8x128xf32>
    %1208 = arith.mulf %1206, %1207 : vector<8x128xf32>
    %1209 = vector.broadcast %4 : vector<1x128xf32> to vector<8x128xf32>
    %1210 = arith.addf %1208, %1209 : vector<8x128xf32>
    %1211 = vector.extract_strided_slice %1210 {offsets = [0, 0], sizes = [8, 32], strides = [1, 1]} : vector<8x128xf32> to vector<8x32xf32>
    %1212 = vector.extract_strided_slice %1210 {offsets = [0, 32], sizes = [8, 32], strides = [1, 1]} : vector<8x128xf32> to vector<8x32xf32>
    %1213 = vector.extract_strided_slice %1210 {offsets = [0, 64], sizes = [8, 32], strides = [1, 1]} : vector<8x128xf32> to vector<8x32xf32>
    %1214 = vector.extract_strided_slice %1210 {offsets = [0, 96], sizes = [8, 32], strides = [1, 1]} : vector<8x128xf32> to vector<8x32xf32>
    %1215 = arith.mulf %1212, %1196 : vector<8x32xf32>
    %1216 = arith.mulf %1211, %1213 : vector<8x32xf32>
    %1217 = arith.addf %1215, %1216 : vector<8x32xf32>
    %1218 = math.tanh %1217 : vector<8x32xf32>
    %1219 = arith.mulf %1214, %1218 : vector<8x32xf32>
    %c6_i32_363 = arith.constant 6 : i32
    %1220 = arith.index_cast %c6_i32_363 : i32 to index
    %c0_364 = arith.constant 0 : index
    %c0_365 = arith.constant 0 : index
    %1221 = vector.load %arg10[%1220, %c0_364, %c0_365] : memref<8x8x128xf32, #tpu.memory_space<vmem>>, vector<1x8x128xf32>
    %1222 = vector.shape_cast %1221 : vector<1x8x128xf32> to vector<8x128xf32>
    %cst_366 = arith.constant dense<0.000000e+00> : vector<8x128xf32>
    %1223 = tpu.matmul %1219, %1082, %cst_366 {dimension_numbers = #tpu.dot_dimension_numbers<[1], [0], [0], [1], [0, 0, 1, 1], [], []>} : vector<8x32xf32>, vector<32x128xf32>, vector<8x128xf32> -> vector<8x128xf32>
    %1224 = arith.addf %1222, %1223 : vector<8x128xf32>
    %1225 = vector.broadcast %3 : vector<1x128xf32> to vector<8x128xf32>
    %1226 = arith.mulf %1224, %1225 : vector<8x128xf32>
    %1227 = math.tanh %1226 : vector<8x128xf32>
    %1228 = vector.broadcast %3 : vector<1x128xf32> to vector<8x128xf32>
    %1229 = arith.mulf %1227, %1228 : vector<8x128xf32>
    %1230 = vector.broadcast %4 : vector<1x128xf32> to vector<8x128xf32>
    %1231 = arith.addf %1229, %1230 : vector<8x128xf32>
    %1232 = vector.extract_strided_slice %1231 {offsets = [0, 0], sizes = [8, 32], strides = [1, 1]} : vector<8x128xf32> to vector<8x32xf32>
    %1233 = vector.extract_strided_slice %1231 {offsets = [0, 32], sizes = [8, 32], strides = [1, 1]} : vector<8x128xf32> to vector<8x32xf32>
    %1234 = vector.extract_strided_slice %1231 {offsets = [0, 64], sizes = [8, 32], strides = [1, 1]} : vector<8x128xf32> to vector<8x32xf32>
    %1235 = vector.extract_strided_slice %1231 {offsets = [0, 96], sizes = [8, 32], strides = [1, 1]} : vector<8x128xf32> to vector<8x32xf32>
    %1236 = arith.mulf %1233, %1217 : vector<8x32xf32>
    %1237 = arith.mulf %1232, %1234 : vector<8x32xf32>
    %1238 = arith.addf %1236, %1237 : vector<8x32xf32>
    %1239 = math.tanh %1238 : vector<8x32xf32>
    %1240 = arith.mulf %1235, %1239 : vector<8x32xf32>
    %c7_i32_367 = arith.constant 7 : i32
    %1241 = arith.index_cast %c7_i32_367 : i32 to index
    %c0_368 = arith.constant 0 : index
    %c0_369 = arith.constant 0 : index
    %1242 = vector.load %arg10[%1241, %c0_368, %c0_369] : memref<8x8x128xf32, #tpu.memory_space<vmem>>, vector<1x8x128xf32>
    %1243 = vector.shape_cast %1242 : vector<1x8x128xf32> to vector<8x128xf32>
    %cst_370 = arith.constant dense<0.000000e+00> : vector<8x128xf32>
    %1244 = tpu.matmul %1240, %1082, %cst_370 {dimension_numbers = #tpu.dot_dimension_numbers<[1], [0], [0], [1], [0, 0, 1, 1], [], []>} : vector<8x32xf32>, vector<32x128xf32>, vector<8x128xf32> -> vector<8x128xf32>
    %1245 = arith.addf %1243, %1244 : vector<8x128xf32>
    %1246 = vector.broadcast %3 : vector<1x128xf32> to vector<8x128xf32>
    %1247 = arith.mulf %1245, %1246 : vector<8x128xf32>
    %1248 = math.tanh %1247 : vector<8x128xf32>
    %1249 = vector.broadcast %3 : vector<1x128xf32> to vector<8x128xf32>
    %1250 = arith.mulf %1248, %1249 : vector<8x128xf32>
    %1251 = vector.broadcast %4 : vector<1x128xf32> to vector<8x128xf32>
    %1252 = arith.addf %1250, %1251 : vector<8x128xf32>
    %1253 = vector.extract_strided_slice %1252 {offsets = [0, 0], sizes = [8, 32], strides = [1, 1]} : vector<8x128xf32> to vector<8x32xf32>
    %1254 = vector.extract_strided_slice %1252 {offsets = [0, 32], sizes = [8, 32], strides = [1, 1]} : vector<8x128xf32> to vector<8x32xf32>
    %1255 = vector.extract_strided_slice %1252 {offsets = [0, 64], sizes = [8, 32], strides = [1, 1]} : vector<8x128xf32> to vector<8x32xf32>
    %1256 = vector.extract_strided_slice %1252 {offsets = [0, 96], sizes = [8, 32], strides = [1, 1]} : vector<8x128xf32> to vector<8x32xf32>
    %1257 = arith.mulf %1254, %1238 : vector<8x32xf32>
    %1258 = arith.mulf %1253, %1255 : vector<8x32xf32>
    %1259 = arith.addf %1257, %1258 : vector<8x32xf32>
    %1260 = math.tanh %1259 : vector<8x32xf32>
    %1261 = arith.mulf %1256, %1260 : vector<8x32xf32>
    %c8_i32_371 = arith.constant 8 : i32
    %c0_372 = arith.constant 0 : index
    %c0_373 = arith.constant 0 : index
    %1262 = vector.load %arg6[%c0_372, %c0_373] : memref<8x32xf32, #tpu.memory_space<vmem>>, vector<8x32xf32>
    %1263 = arith.addf %1261, %1262 : vector<8x32xf32>
    %c0_374 = arith.constant 0 : index
    %c0_375 = arith.constant 0 : index
    %1264 = vector.load %arg7[%c0_374, %c0_375] : memref<32x128xf32, #tpu.memory_space<vmem>>, vector<32x128xf32>
    %cst_376 = arith.constant dense<0.000000e+00> : vector<8x128xf32>
    %1265 = tpu.matmul %1263, %1264, %cst_376 {dimension_numbers = #tpu.dot_dimension_numbers<[1], [0], [0], [1], [0, 0, 1, 1], [], []>} : vector<8x32xf32>, vector<32x128xf32>, vector<8x128xf32> -> vector<8x128xf32>
    %c0_377 = arith.constant 0 : index
    %c0_378 = arith.constant 0 : index
    %1266 = vector.load %arg8[%c0_377, %c0_378] : memref<1x128xf32, #tpu.memory_space<vmem>>, vector<1x128xf32>
    %1267 = vector.broadcast %1266 : vector<1x128xf32> to vector<8x128xf32>
    %1268 = arith.addf %1265, %1267 : vector<8x128xf32>
    %cst_379 = arith.constant 0.000000e+00 : f32
    %1269 = vector.broadcast %cst_379 : f32 to vector<8x128xf32>
    %1270 = arith.maximumf %1268, %1269 : vector<8x128xf32>
    %c0_380 = arith.constant 0 : index
    %c0_381 = arith.constant 0 : index
    %1271 = vector.load %arg9[%c0_380, %c0_381] : memref<8x128xf32, #tpu.memory_space<vmem>>, vector<8x128xf32>
    tpu.vector_store %arg9[%c0_380, %c0_381], %1270 {strides = array<i32>} : memref<8x128xf32, #tpu.memory_space<vmem>>, vector<8x128xf32>,
    return
  }
  func.func @transform_0(%arg0: i32) -> (i32, i32, i32) {
    %c0_i32 = arith.constant 0 : i32
    %c0_i32_0 = arith.constant 0 : i32
    %c0_i32_1 = arith.constant 0 : i32
    return %c0_i32, %arg0, %c0_i32_0 : i32, i32, i32
  }
  func.func @transform_1(%arg0: i32) -> (i32, i32) {
    %c0_i32 = arith.constant 0 : i32
    %c0_i32_0 = arith.constant 0 : i32
    %c0_i32_1 = arith.constant 0 : i32
    return %c0_i32, %c0_i32_0 : i32, i32
  }
  func.func @transform_2(%arg0: i32) -> (i32, i32, i32) {
    %c0_i32 = arith.constant 0 : i32
    %c0_i32_0 = arith.constant 0 : i32
    %c0_i32_1 = arith.constant 0 : i32
    %c0_i32_2 = arith.constant 0 : i32
    return %c0_i32, %c0_i32_0, %c0_i32_1 : i32, i32, i32
  }
  func.func @transform_3(%arg0: i32) -> (i32, i32, i32) {
    %c0_i32 = arith.constant 0 : i32
    %c0_i32_0 = arith.constant 0 : i32
    %c0_i32_1 = arith.constant 0 : i32
    %c0_i32_2 = arith.constant 0 : i32
    return %c0_i32, %c0_i32_0, %c0_i32_1 : i32, i32, i32
  }
  func.func @transform_4(%arg0: i32) -> (i32, i32, i32) {
    %c0_i32 = arith.constant 0 : i32
    %c0_i32_0 = arith.constant 0 : i32
    %c0_i32_1 = arith.constant 0 : i32
    %c0_i32_2 = arith.constant 0 : i32
    return %c0_i32, %c0_i32_0, %c0_i32_1 : i32, i32, i32
  }
  func.func @transform_5(%arg0: i32) -> (i32, i32) {
    %c0_i32 = arith.constant 0 : i32
    %c0_i32_0 = arith.constant 0 : i32
    return %arg0, %c0_i32 : i32, i32
  }
  func.func @transform_6(%arg0: i32) -> (i32, i32) {
    %c0_i32 = arith.constant 0 : i32
    %c0_i32_0 = arith.constant 0 : i32
    %c0_i32_1 = arith.constant 0 : i32
    return %c0_i32, %c0_i32_0 : i32, i32
  }
  func.func @transform_7(%arg0: i32) -> (i32, i32) {
    %c0_i32 = arith.constant 0 : i32
    %c0_i32_0 = arith.constant 0 : i32
    %c0_i32_1 = arith.constant 0 : i32
    return %c0_i32, %c0_i32_0 : i32, i32
  }
  func.func @transform_8(%arg0: i32) -> (i32, i32) {
    %c0_i32 = arith.constant 0 : i32
    %c0_i32_0 = arith.constant 0 : i32
    return %arg0, %c0_i32 : i32, i32
  }
}

</mosaic_0001>

<bundles_post_ra>
// kernel: residual_lstm_forward.1
= control target key start
LH: loop header
LB: loop body
LE: loop exit
PB: predicated region body
PF: predicated region fallthrough
CT: control target
= control target key end

     0   :  { %13 = vsyncpa [#allocation5], 0  ;;  %s9052_s0 = inlined_call_operand.hbm [shape: f32[8,8,16], index: 0, kind: input, shape index: {}]   ;;  %s9053_s1 = inlined_call_operand.hbm [shape: f32[16,128], index: 1, kind: input, shape index: {}]   ;;  %s9054_s2 = inlined_call_operand.hbm [shape: f32[5,32,128], index: 2, kind: input, shape index: {}]   ;;  %s9055_s3 = inlined_call_operand.hbm [shape: f32[6,32,128], index: 3, kind: input, shape index: {}]   ;;  %s9056_s4 = inlined_call_operand.hbm [shape: f32[6,1,128], index: 4, kind: input, shape index: {}]   ;;  %s9057_s5 = inlined_call_operand.hbm [shape: f32[8,32], index: 5, kind: input, shape index: {}]   ;;  %s9058_s6 = inlined_call_operand.hbm [shape: f32[32,128], index: 6, kind: input, shape index: {}]   ;;  %s9059_s7 = inlined_call_operand.hbm [shape: f32[1,128], index: 7, kind: input, shape index: {}]   ;;  %s9060_s8 = inlined_call_operand.hbm [shape: f32[8,128], index: 8, kind: output, shape index: {}]  }
   0x1   :  { %14 = vsyncpa [#allocation8], 0 }
   0x2   :  { %15 = vsyncpa [#allocation11], 0 }
   0x3   :  { %16 = vsyncpa [#allocation14], 0 }
   0x4   :  { %17 = vsyncpa [#allocation17], 0 }
   0x5   :  { %18 = vsyncpa [#allocation6], 0  ;;  %s7850_s27 = smov [#allocation7]   ;;  %s7851_s29 = smov [#allocation10]  }
   0x6   :  { %s36_s28 = sshll.u32 %s7850_s27, 4  ;;  %s60_s30 = sshll.u32 %s7851_s29, 4  ;;  %s37_s28 = int_to_ptr.vmem [resolvable:$true] %s36_s28  ;;  %s7915_s30 = int_to_ptr.vmem [resolvable:$true] %s60_s30 }
   0x7   :  { %s7640_s11 = scalar_lea.hbm %s9053_s1, 256 }
   0x8   :  { %p7641_p0 = scmp.ne.s32.totalorder %s9053_s1, %s7640_s11  ;;  %p7644_p1 = scmp.lt.u32.totalorder %s7640_s11, %s9053_s1 }
   0xa   :  { %p7646_p2 = pnand %p7644_p1, %p7641_p0 }
   0xc   :  { %7649 = shalt.err (!%p7646_p2)
}
   0xd   :  { %s7650_s16 = scalar_lea.vmem %s37_s28, 256  ;;  %p7655_p4 = scmp.lt.s32.totalorder %s37_s28, %s37_s28 }
   0xe   :  { %p7651_p3 = scmp.ne.s32.totalorder %s37_s28, %s7650_s16  ;;  %p7656_p5 = scmp.lt.s32.totalorder %s7650_s16, %s7650_s16 }
  0x10   :  { %p7657_p6 = por %p7656_p5, %p7655_p4 }
  0x12   :  { %p7658_p7 = pnand %p7657_p6, %p7651_p3 }
  0x14   :  { %7661 = shalt.err (!%p7658_p7)
}
  0x15   :  { %s7852_s17 = smov 128   ;;  %s7853_s18 = smov 8  }
  0x16   :  { %42 = dma.hbm_to_vmem [thread:$0]  %s9053_s1, 256, %s37_s28, [#allocation8], %s7852_s17, %s7852_s17, %s7853_s18  }
  0x17   :  { %s7662_s23 = scalar_lea.hbm %s9055_s3, 3072 }
  0x18   :  { %p7663_p8 = scmp.ne.s32.totalorder %s9055_s3, %s7662_s23  ;;  %p7666_p9 = scmp.lt.u32.totalorder %s7662_s23, %s9055_s3 }
  0x1a   :  { %p7668_p10 = pnand %p7666_p9, %p7663_p8 }
  0x1c   :  { %7671 = shalt.err (!%p7668_p10)
}
  0x1d   :  { %s7672_s29 = scalar_lea.vmem %s7915_s30, 3072  ;;  %p7677_p12 = scmp.lt.s32.totalorder %s7915_s30, %s7915_s30 }
  0x1e   :  { %p7673_p11 = scmp.ne.s32.totalorder %s7915_s30, %s7672_s29  ;;  %p7678_p13 = scmp.lt.s32.totalorder %s7672_s29, %s7672_s29 }
  0x20   :  { %p7679_p0 = por %p7678_p13, %p7677_p12 }
  0x22   :  { %p7680_p1 = pnand %p7679_p0, %p7673_p11 }
  0x24   :  { %7683 = shalt.err (!%p7680_p1)
}
  0x25   :  { %66 = dma.hbm_to_vmem [thread:$0]  %s9055_s3, 3072, %s7915_s30, [#allocation11], %s7852_s17, %s7852_s17, %s7853_s18  }
  0x26   :  { %s7854_s9 = smov [#allocation13]   ;;  %s7855_s11 = smov [#allocation4]  }
  0x27   :  { %s85_s10 = sshll.u32 %s7854_s9, 4  ;;  %s24_s12 = sshll.u32 %s7855_s11, 4  ;;  %s86_s10 = int_to_ptr.vmem [resolvable:$true] %s85_s10  ;;  %s7952_s12 = int_to_ptr.vmem [resolvable:$true] %s24_s12 }
  0x28   :  { %s7684_s15 = scalar_lea.hbm %s9057_s5, 128 }
  0x29   :  { %p7685_p2 = scmp.ne.s32.totalorder %s9057_s5, %s7684_s15  ;;  %p7688_p3 = scmp.lt.u32.totalorder %s7684_s15, %s9057_s5 }
  0x2b   :  { %p7690_p4 = pnand %p7688_p3, %p7685_p2 }
  0x2d   :  { %7693 = shalt.err (!%p7690_p4)
}
  0x2e   :  { %s7694_s3 = scalar_lea.vmem %s86_s10, 128  ;;  %p7699_p6 = scmp.lt.s32.totalorder %s86_s10, %s86_s10 }
  0x2f   :  { %p7695_p5 = scmp.ne.s32.totalorder %s86_s10, %s7694_s3  ;;  %p7700_p7 = scmp.lt.s32.totalorder %s7694_s3, %s7694_s3 }
  0x31   :  { %p7701_p8 = por %p7700_p7, %p7699_p6 }
  0x33   :  { %p7702_p9 = pnand %p7701_p8, %p7695_p5 }
  0x35   :  { %7705 = shalt.err (!%p7702_p9)
}
  0x36   :  { %88 = dma.hbm_to_vmem [thread:$0]  %s9057_s5, 128, %s86_s10, [#allocation14]  }
  0x37   :  { %s7706_s25 = scalar_lea.hbm %s9052_s0, 1024 }
  0x38   :  { %p7707_p10 = scmp.ne.s32.totalorder %s9052_s0, %s7706_s25  ;;  %p7710_p11 = scmp.lt.u32.totalorder %s7706_s25, %s9052_s0 }
  0x3a   :  { %p7712_p12 = pnand %p7710_p11, %p7707_p10 }
  0x3c   :  { %7715 = shalt.err (!%p7712_p12)
}
  0x3d   :  { %s7716_s28 = scalar_lea.vmem %s7952_s12, 1024  ;;  %p7721_p0 = scmp.lt.s32.totalorder %s7952_s12, %s7952_s12 }
  0x3e   :  { %p7717_p13 = scmp.ne.s32.totalorder %s7952_s12, %s7716_s28  ;;  %p7722_p1 = scmp.lt.s32.totalorder %s7716_s28, %s7716_s28 }
  0x40   :  { %p7723_p2 = por %p7722_p1, %p7721_p0 }
  0x42   :  { %p7724_p3 = pnand %p7723_p2, %p7717_p13 }
  0x44   :  { %7727 = shalt.err (!%p7724_p3)
}
  0x45   :  { %30 = dma.hbm_to_vmem [thread:$0]  %s9052_s0, 1024, %s7952_s12, [#allocation5], %s7852_s17, %s7852_s17, %s7853_s18  }
  0x46   :  { %s7856_s10 = smov [#allocation9]   ;;  %s7857_s13 = smov [#allocation12]  }
  0x47   :  { %s48_s11 = sshll.u32 %s7856_s10, 4  ;;  %s72_s14 = sshll.u32 %s7857_s13, 4  ;;  %s49_s11 = int_to_ptr.vmem [resolvable:$true] %s48_s11  ;;  %s7986_s14 = int_to_ptr.vmem [resolvable:$true] %s72_s14 }
  0x48   :  { %s7728_s19 = scalar_lea.hbm %s9054_s2, 2560 }
  0x49   :  { %p7729_p4 = scmp.ne.s32.totalorder %s9054_s2, %s7728_s19  ;;  %p7732_p5 = scmp.lt.u32.totalorder %s7728_s19, %s9054_s2 }
  0x4b   :  { %p7734_p6 = pnand %p7732_p5, %p7729_p4 }
  0x4d   :  { %7737 = shalt.err (!%p7734_p6)
}
  0x4e   :  { %s7738_s0 = scalar_lea.vmem %s49_s11, 2560  ;;  %p7743_p8 = scmp.lt.s32.totalorder %s49_s11, %s49_s11 }
  0x4f   :  { %p7739_p7 = scmp.ne.s32.totalorder %s49_s11, %s7738_s0  ;;  %p7744_p9 = scmp.lt.s32.totalorder %s7738_s0, %s7738_s0 }
  0x51   :  { %p7745_p10 = por %p7744_p9, %p7743_p8 }
  0x53   :  { %p7746_p11 = pnand %p7745_p10, %p7739_p7 }
  0x55   :  { %7749 = shalt.err (!%p7746_p11)
}
  0x56   :  { %54 = dma.hbm_to_vmem [thread:$0]  %s9054_s2, 2560, %s49_s11, [#allocation8], %s7852_s17, %s7852_s17, %s7853_s18  }
  0x57   :  { %s7750_s25 = scalar_lea.hbm %s9056_s4, 96 }
  0x58   :  { %p7751_p12 = scmp.ne.s32.totalorder %s9056_s4, %s7750_s25  ;;  %p7754_p13 = scmp.lt.u32.totalorder %s7750_s25, %s9056_s4 }
  0x5a   :  { %p7756_p0 = pnand %p7754_p13, %p7751_p12 }
  0x5c   :  { %7759 = shalt.err (!%p7756_p0)
}
  0x5d   :  { %s7760_s28 = scalar_lea.vmem %s7986_s14, 96  ;;  %p7765_p2 = scmp.lt.s32.totalorder %s7986_s14, %s7986_s14 }
  0x5e   :  { %p7761_p1 = scmp.ne.s32.totalorder %s7986_s14, %s7760_s28  ;;  %p7766_p3 = scmp.lt.s32.totalorder %s7760_s28, %s7760_s28 }
  0x60   :  { %p7767_p4 = por %p7766_p3, %p7765_p2 }
  0x62   :  { %p7768_p5 = pnand %p7767_p4, %p7761_p1 }
  0x64   :  { %7771 = shalt.err (!%p7768_p5)
}
  0x65   :  { %s7858_s2 = smov 16   ;;  %s7859_s5 = smov 1  }
  0x66   :  { %78 = dma.hbm_to_vmem [thread:$0]  %s9056_s4, 96, %s7986_s14, [#allocation11], %s7858_s2, %s7858_s2, %s7859_s5  }
  0x67   :  { %s7860_s11 = smov [#allocation15]   ;;  %s7861_s15 = smov [#allocation16]  }
  0x68   :  { %s94_s13 = sshll.u32 %s7860_s11, 4  ;;  %s107_s16 = sshll.u32 %s7861_s15, 4  ;;  %s95_s13 = int_to_ptr.vmem [resolvable:$true] %s94_s13  ;;  %s108_s16 = int_to_ptr.vmem [resolvable:$true] %s107_s16 }
  0x69   :  { %s7772_s21 = scalar_lea.hbm %s9058_s6, 512 }
  0x6a   :  { %p7773_p6 = scmp.ne.s32.totalorder %s9058_s6, %s7772_s21  ;;  %p7776_p7 = scmp.lt.u32.totalorder %s7772_s21, %s9058_s6 }
  0x6c   :  { %p7778_p8 = pnand %p7776_p7, %p7773_p6 }
  0x6e   :  { %7781 = shalt.err (!%p7778_p8)
}
  0x6f   :  { %s7782_s4 = scalar_lea.vmem %s95_s13, 512  ;;  %p7787_p10 = scmp.lt.s32.totalorder %s95_s13, %s95_s13 }
  0x70   :  { %p7783_p9 = scmp.ne.s32.totalorder %s95_s13, %s7782_s4  ;;  %p7788_p11 = scmp.lt.s32.totalorder %s7782_s4, %s7782_s4 }
  0x72   :  { %p7789_p12 = por %p7788_p11, %p7787_p10 }
  0x74   :  { %p7790_p13 = pnand %p7789_p12, %p7783_p9 }
  0x76   :  { %7793 = shalt.err (!%p7790_p13)
}
  0x77   :  { %100 = dma.hbm_to_vmem [thread:$0]  %s9058_s6, 512, %s95_s13, [#allocation14], %s7852_s17, %s7852_s17, %s7853_s18  }
  0x78   :  { %s7794_s25 = scalar_lea.hbm %s9059_s7, 16 }
  0x79   :  { %p7795_p0 = scmp.ne.s32.totalorder %s9059_s7, %s7794_s25  ;;  %p7798_p1 = scmp.lt.u32.totalorder %s7794_s25, %s9059_s7 }
  0x7b   :  { %p7800_p2 = pnand %p7798_p1, %p7795_p0 }
  0x7d   :  { %7803 = shalt.err (!%p7800_p2)
}
  0x7e   :  { %s7804_s28 = scalar_lea.vmem %s108_s16, 16  ;;  %s7808_s2 = scalar_lea.vmem %s108_s16, 32 }
  0x7f   :  { %p7805_p3 = scmp.ne.s32.totalorder %s108_s16, %s7804_s28  ;;  %p7809_p4 = scmp.lt.s32.totalorder %s108_s16, %s108_s16 }
  0x80   :  { %p7810_p5 = scmp.lt.s32.totalorder %s7808_s2, %s7804_s28 }
  0x82   :  { %p7811_p6 = por %p7810_p5, %p7809_p4 }
  0x84   :  { %p7812_p7 = pnand %p7811_p6, %p7805_p3 }
  0x86   :  { %7815 = shalt.err (!%p7812_p7)
}
  0x87   :  { %110 = dma.hbm_to_vmem [thread:$0]  %s9059_s7, 16, %s108_s16, [#allocation17]  }
  0x88   :  { %7838 = dma.done.wait [#allocation5], 1024  }
  0x89   :  { %7839 = vsyncadd [#allocation5], 4294966272 }
  0x8a   :  { %7840 = dma.done.wait [#allocation8], 2816  }
  0x8b   :  { %7841 = vsyncadd [#allocation8], 4294964480 }
  0x8c   :  { %7842 = dma.done.wait [#allocation11], 3168  }
  0x8d   :  { %7843 = vsyncadd [#allocation11], 4294964128 }
  0x8e   :  { %7844 = dma.done.wait [#allocation14], 640  }
  0x8f   :  { %7845 = vsyncadd [#allocation14], 4294966656 }
  0x90   :  { %7846 = dma.done.wait [#allocation17], 16  }
  0x91   :  { %7847 = vsyncadd [#allocation17], 4294967280  ;;  %v7862_v0 = vmov 0.0|0.0   ;;  %vm7863_vm0 = vmmov 0   ;;  %v7864_v1 = vmov 0.0   ;;  %vm162_vm1 = vcmask 130048  }
  0x92   :  { %7094 = vmatprep.subr.bf16.mxu1 %v7862_v0  ;;  %6459 = vmatprep.mubr.msk.f32.mxu1 %vm7863_vm0, %v7864_v1  ;;  %v141_v2 = vld [vmem:[#allocation7] sm:$0xff]  ;;  %v142_v3 = vld [vmem:[#allocation7 + $0x8] sm:$0xff]  ;;  %v143_v4 = vld [vmem:[#allocation10] sm:$0xff]  ;;  %v376_v13 = vlaneseq  ;;  %vm135_vm2 = vcmask 523264   ;;  %v7865_v15 = vmov 1.0   ;;  %vm137_vm3 = vcmask 785408  }
  0x93   :  { %v7090_v5 = vpack.c.bf16 %v142_v3, %v141_v2  ;;  %v144_v6 = vld [vmem:[#allocation10 + $0x8] sm:$0xff]  ;;  %v148_v7 = vld [vmem:[#allocation4] sm:$0xff]  ;;  %v146_v10 = vld [vmem:[#allocation10 + $0x18] sm:$0xff]  ;;  %v136_v16 = vsel %vm135_vm2, 0.5, %v7865_v15  ;;  %v139_v28 = vsel %vm135_vm2, 0.5, %v7864_v1  ;;  %s7866_s7 = smov 64  }
  0x94   :  { %v8050_v8 = vpack.c.bf16 %v144_v6, %v143_v4  ;;  %6439 = vmatprep.mubr.msk.f32.mxu0 %vm162_vm1, %v148_v7  ;;  %v145_v9 = vld [vmem:[#allocation10 + $0x10] sm:$0xff]  ;;  %v149_v11 = vld [vmem:[#allocation4 + $0x8] sm:$0xff]  ;;  %v377_v14 = vshrl.u32 %v376_v13, 7  ;;  %v8073_v17 = vld [vmem:[#allocation12] ss:$0 sm:$0xff]  ;;  %v138_v20 = vsel %vm137_vm3, %v136_v16, 0.5 }
  0x95   :  { %7091 = vmatprep.subr.bf16.mxu0 %v7090_v5  ;;  %v8054_v12 = vpack.c.bf16 %v146_v10, %v145_v9  ;;  %v140_v29 = vsel %vm137_vm3, %v139_v28, 0.5  ;;  %s7867_s18 = smov 32   ;;  %vm301_vm4 = vcmask 261120   ;;  %v150_v56 = vld [vmem:[#allocation4 + $0x10] sm:$0xff]  ;;  %v151_v57 = vld [vmem:[#allocation4 + $0x18] sm:$0xff]  ;;  %v152_v58 = vld [vmem:[#allocation4 + $0x20] sm:$0xff] }
  0x96   :  { %7096 = vmatpush3.bf16.msra.mxu1 %v8050_v8  ;;  %7093 = vmatpush3.bf16.msra.mxu0 %v7090_v5  ;;  %v378_v18 = vsub.s32 0, %v377_v14  ;;  %v153_v59 = vld [vmem:[#allocation4 + $0x28] sm:$0xff]  ;;  %v154_v60 = vld [vmem:[#allocation4 + $0x30] sm:$0xff]  ;;  %v155_v61 = vld [vmem:[#allocation4 + $0x38] sm:$0xff]  ;;  %s7868_s5 = smov 96   ;;  %s7869_s9 = smov [#allocation18]  }
  0x97   :  { %7097 = vmatprep.subr.bf16.mxu1 %v7862_v0  ;;  %7106 = vmatprep.subr.bf16.mxu0 %v7862_v0  ;;  %s6009_s10 = sshll.u32 %s7869_s9, 4  ;;  %s6010_s10 = int_to_ptr.vmem [resolvable:$true] %s6009_s10 }
  0x98   :  { %v8076_v23 = vrot.slane %v138_v20, %v378_v18  ;;  %v8081_v30 = vrot.slane %v140_v29, %v378_v18  ;;  %s7816_s11 = scalar_lea.vmem %s6010_s10, 128  ;;  %p7821_p9 = scmp.lt.s32.totalorder %s6010_s10, %s6010_s10 }
  0x99   :  { %6440 = vmatmul.mubr.msk.f32.vlgmr.msra.gmra.mrb[0].mxu0 %vm162_vm1, %v149_v11  ;;  %p7817_p8 = scmp.ne.s32.totalorder %s6010_s10, %s7816_s11  ;;  %p7822_p10 = scmp.lt.s32.totalorder %s7816_s11, %s7816_s11 }
  0x9a   :  { %7099 = vmatpush3.bf16.msra.mxu1 %v8054_v12  ;;  %7108 = vmatpush3.bf16.msra.mxu0 %v8050_v8 }
  0x9b   :  { %7100 = vmatprep.subr.bf16.mxu1 %v7862_v0  ;;  %7109 = vmatprep.subr.bf16.mxu0 %v7862_v0  ;;  %p7823_p11 = por %p7822_p10, %p7821_p9 }
  0x9c   :  { %6442 = vmatprep.mubr.msk.f32.mxu0 %vm162_vm1, %v150_v56 }
  0x9d   :  { %6460 = vmatmul.mubr.f32.vlgmr.msra.gmra.mrb[0].mxu1 %v7864_v1  ;;  %6443 = vmatmul.mubr.msk.f32.gmra.mrb[2].mxu0 %vm162_vm1, %v151_v57  ;;  %p7824_p12 = pnand %p7823_p11, %p7817_p8 }
  0x9e   :  { %7102 = vmatpush3.bf16.msra.mxu1 %v8050_v8  ;;  %6470 = vmatprep.mubr.msk.f32.mxu1 %vm7863_vm0, %v7864_v1 }
  0x9f   :  { %7103 = vmatprep.subr.bf16.mxu1 %v7862_v0  ;;  %7111 = vmatpush3.bf16.msra.mxu0 %v8054_v12 }
  0xa0   :  { %7118 = vmatprep.subr.bf16.mxu0 %v7862_v0  ;;  %6445 = vmatprep.mubr.msk.f32.mxu0 %vm162_vm1, %v152_v58 }
  0xa1   :  { %6446 = vmatmul.mubr.msk.f32.gmra.mrb[4].mxu0 %vm162_vm1, %v153_v59 }
  0xa2   :  { %7105 = vmatpush3.bf16.msra.mxu1 %v8054_v12  ;;  %6448 = vmatprep.mubr.msk.f32.mxu0 %vm162_vm1, %v154_v60 }
  0xa3   :  { %7112 = vmatprep.subr.bf16.mxu1 %v7862_v0 }
  0xa5   :  { %6449 = vmatmul.mubr.msk.f32.gmra.mrb[6].mxu0 %vm162_vm1, %v155_v61 }
  0xa6   :  { %6481 = vmatprep.mubr.msk.f32.mxu0 %vm7863_vm0, %v7864_v1 }
 0x16c   :  { %v6441_v19 = vpop.f32.mrb[0].mxu0 }
 0x16d   :  { %v253_v21 = vpop.f32.mrb[1].mxu0  ;;  %v259_v43 = vadd.f32 %v6441_v19, %v8073_v17 }
 0x16e   :  { %v254_v22 = vadd.f32 %v8073_v17, %v253_v21 }
 0x170   :  { %v371_v24 = vpop.f32.mrb[0].mxu1  ;;  %v6444_v3 = vpop.f32.mrb[2].mxu0 }
 0x171   :  { %v375_v25 = vadd.f32 %v371_v24, %v254_v22  ;;  %v6461_v26 = vpop.f32.mrb[1].mxu1  ;;  %v263_v4 = vpop.f32.mrb[3].mxu0 }
 0x172   :  { %v264_v11 = vadd.f32 %v8073_v17, %v263_v4 }
 0x173   :  { %v380_v27 = vmul.f32 %v8076_v23, %v375_v25 }
 0x174   :  { %v8113_v5 = vpop.f32.mrb[4].mxu0 }
 0x175   :  { %7448 = vtanh.f32 %v380_v27  ;;  %v8115_v6 = vpop.f32.mrb[5].mxu0  ;;  %v279_v4 = vadd.f32 %v8113_v5, %v8073_v17 }
 0x178   :  { %v8117_v7 = vpop.f32.mrb[6].mxu0 }
 0x179   :  { %v8119_v9 = vpop.f32.mrb[7].mxu0 }
 0x17f   :  { %v7449_v31 = vpop.eup %7448 }
 0x180   :  { %v382_v32 = vmul.f32 %v7449_v31, %v8076_v23 }
 0x182   :  { %v387_v33 = vadd.f32 %v8081_v30, %v382_v32  ;;  %v269_v32 = vadd.f32 %v6444_v3, %v8073_v17 }
 0x184   :  { %390 = vrot.lane.b32.xlu0 %v387_v33, %s7866_s7  ;;  %v388_v36 = vmul.f32 0.0, %v387_v33 }
 0x1f6   :  { %v391_v34 = vpop.permute.xlu0 %390 }
 0x1f7   :  { %v393_v35 = vmul.f32 %v391_v34, %v387_v33 }
 0x1f9   :  { %395 = vrot.lane.b32.xlu0 %v393_v35, %s7867_s18 }
 0x26b   :  { %v396_v37 = vpop.permute.xlu0 %395 }
 0x26c   :  { %v398_v38 = vadd.f32 %v396_v37, %v388_v36 }
 0x26e   :  { %7450 = vtanh.f32 %v398_v38 }
 0x278   :  { %v7451_v39 = vpop.eup %7450 }
 0x279   :  { %401 = vrot.lane.b32.xlu1 %v7451_v39, %s7866_s7 }
 0x2eb   :  { %v402_v40 = vpop.permute.xlu1 %401 }
 0x2ec   :  { %v404_v41 = vmul.f32 %v402_v40, %v387_v33 }
 0x2ee   :  { %406 = vrot.lane.b32.xlu1 %v404_v41, %s7867_s18 }
 0x360   :  { %v407_v42 = vpop.permute.xlu1 %406 }
 0x361   :  { %409 = vst.msk [vmem:[#allocation3] sm:$0xff] %vm301_vm4, %v407_v42  ;;  %6471 = vmatmul.mubr.msk.f32.vlgmr.msra.gmra.mrb[2].mxu1 %vm301_vm4, %v407_v42 }
 0x362   :  { %7114 = vmatpush3.bf16.msra.mxu1 %v8050_v8  ;;  %6492 = vmatprep.mubr.msk.f32.mxu1 %vm7863_vm0, %v7864_v1 }
 0x363   :  { %7115 = vmatprep.subr.bf16.mxu1 %v7862_v0 }
 0x366   :  { %7117 = vmatpush3.bf16.msra.mxu1 %v8054_v12 }
 0x367   :  { %7124 = vmatprep.subr.bf16.mxu1 %v7862_v0 }
 0x434   :  { %v480_v44 = vpop.f32.mrb[2].mxu1 }
 0x435   :  { %v484_v45 = vadd.f32 %v480_v44, %v259_v43  ;;  %v6472_v46 = vpop.f32.mrb[3].mxu1 }
 0x437   :  { %v485_v47 = vmul.f32 %v484_v45, %v8076_v23 }
 0x439   :  { %7452 = vtanh.f32 %v485_v47 }
 0x443   :  { %v7453_v48 = vpop.eup %7452 }
 0x444   :  { %v487_v49 = vmul.f32 %v7453_v48, %v8076_v23 }
 0x446   :  { %v488_v50 = vadd.f32 %v487_v49, %v8081_v30  ;;  %v274_v49 = vadd.f32 %v8073_v17, %v8115_v6 }
 0x448   :  { %491 = vrot.lane.b32.xlu0 %v488_v50, %s7866_s7  ;;  %v489_v53 = vmul.f32 %v488_v50, %v398_v38 }
 0x4ba   :  { %v492_v51 = vpop.permute.xlu0 %491 }
 0x4bb   :  { %v494_v52 = vmul.f32 %v492_v51, %v488_v50 }
 0x4bd   :  { %496 = vrot.lane.b32.xlu1 %v494_v52, %s7867_s18 }
 0x52f   :  { %v497_v54 = vpop.permute.xlu1 %496 }
 0x530   :  { %v499_v55 = vadd.f32 %v497_v54, %v489_v53 }
 0x532   :  { %7454 = vtanh.f32 %v499_v55 }
 0x53c   :  { %v7455_v62 = vpop.eup %7454 }
 0x53d   :  { %502 = vrot.lane.b32.xlu0 %v7455_v62, %s7866_s7 }
 0x5af   :  { %v503_v63 = vpop.permute.xlu0 %502 }
 0x5b0   :  { %v505_v2 = vmul.f32 %v503_v63, %v488_v50 }
 0x5b2   :  { %507 = vrot.lane.b32.xlu1 %v505_v2, %s7867_s18 }
 0x624   :  { %v508_v10 = vpop.permute.xlu1 %507 }
 0x625   :  { %511 = vst.msk [vmem:[#allocation3 + $0x8] sm:$0xff] %vm301_vm4, %v508_v10  ;;  %6482 = vmatmul.mubr.msk.f32.vlgmr.msra.gmra.mrb[8].mxu0 %vm301_vm4, %v508_v10 }
 0x626   :  { %7120 = vmatpush3.bf16.msra.mxu0 %v8050_v8  ;;  %6503 = vmatprep.mubr.msk.f32.mxu0 %vm7863_vm0, %v7864_v1 }
 0x627   :  { %7121 = vmatprep.subr.bf16.mxu0 %v7862_v0 }
 0x62a   :  { %7123 = vmatpush3.bf16.msra.mxu0 %v8054_v12 }
 0x62b   :  { %7130 = vmatprep.subr.bf16.mxu0 %v7862_v0 }
 0x6f8   :  { %v582_v13 = vpop.f32.mrb[8].mxu0 }
 0x6f9   :  { %v586_v14 = vadd.f32 %v582_v13, %v264_v11  ;;  %v6483_v15 = vpop.f32.mrb[9].mxu0 }
 0x6fb   :  { %v587_v16 = vmul.f32 %v586_v14, %v8076_v23 }
 0x6fd   :  { %7456 = vtanh.f32 %v587_v16 }
 0x707   :  { %v7457_v18 = vpop.eup %7456 }
 0x708   :  { %v589_v19 = vmul.f32 %v7457_v18, %v8076_v23 }
 0x70a   :  { %v590_v20 = vadd.f32 %v589_v19, %v8081_v30 }
 0x70c   :  { %593 = vrot.lane.b32.xlu0 %v590_v20, %s7866_s7  ;;  %v591_v24 = vmul.f32 %v590_v20, %v499_v55 }
 0x77e   :  { %v594_v21 = vpop.permute.xlu0 %593 }
 0x77f   :  { %v596_v22 = vmul.f32 %v594_v21, %v590_v20  ;;  %v1125_v21 = vld [vmem:[#allocation9 + $0x8] sm:$0xff] }
 0x781   :  { %598 = vrot.lane.b32.xlu1 %v596_v22, %s7867_s18 }
 0x7f3   :  { %v599_v25 = vpop.permute.xlu1 %598 }
 0x7f4   :  { %v601_v26 = vadd.f32 %v599_v25, %v591_v24 }
 0x7f6   :  { %7458 = vtanh.f32 %v601_v26 }
 0x800   :  { %v7459_v27 = vpop.eup %7458 }
 0x801   :  { %604 = vrot.lane.b32.xlu0 %v7459_v27, %s7866_s7  ;;  %v1126_v27 = vld [vmem:[#allocation9 + $0x10] sm:$0xff] }
 0x873   :  { %v605_v28 = vpop.permute.xlu0 %604 }
 0x874   :  { %v607_v29 = vmul.f32 %v605_v28, %v590_v20  ;;  %v1124_v20 = vld [vmem:[#allocation9] sm:$0xff]  ;;  %v1127_v28 = vld [vmem:[#allocation9 + $0x18] sm:$0xff] }
 0x875   :  { %v7142_v22 = vpack.c.bf16 %v1125_v21, %v1124_v20 }
 0x876   :  { %609 = vrot.lane.b32.xlu1 %v607_v29, %s7867_s18  ;;  %v7146_v29 = vpack.c.bf16 %v1127_v28, %v1126_v27 }
 0x8e8   :  { %v610_v31 = vpop.permute.xlu1 %609 }
 0x8e9   :  { %613 = vst.msk [vmem:[#allocation3 + $0x10] sm:$0xff] %vm301_vm4, %v610_v31  ;;  %6493 = vmatmul.mubr.msk.f32.vlgmr.msra.gmra.mrb[4].mxu1 %vm301_vm4, %v610_v31 }
 0x8ea   :  { %7126 = vmatpush3.bf16.msra.mxu1 %v8050_v8  ;;  %6514 = vmatprep.mubr.msk.f32.mxu1 %vm7863_vm0, %v7864_v1 }
 0x8eb   :  { %7127 = vmatprep.subr.bf16.mxu1 %v7862_v0 }
 0x8ee   :  { %7129 = vmatpush3.bf16.msra.mxu1 %v8054_v12 }
 0x8ef   :  { %7136 = vmatprep.subr.bf16.mxu1 %v7862_v0 }
 0x9bc   :  { %v684_v33 = vpop.f32.mrb[4].mxu1 }
 0x9bd   :  { %v688_v34 = vadd.f32 %v684_v33, %v269_v32  ;;  %v6494_v35 = vpop.f32.mrb[5].mxu1  ;;  %v1135_v32 = vld [vmem:[#allocation3] sm:$0xff]  ;;  %v1136_v33 = vld [vmem:[#allocation3 + $0x8] sm:$0xff] }
 0x9bf   :  { %v689_v36 = vmul.f32 %v688_v34, %v8076_v23  ;;  %v1137_v34 = vld [vmem:[#allocation3 + $0x10] sm:$0xff] }
 0x9c1   :  { %7460 = vtanh.f32 %v689_v36 }
 0x9cb   :  { %v7461_v37 = vpop.eup %7460 }
 0x9cc   :  { %v691_v38 = vmul.f32 %v7461_v37, %v8076_v23 }
 0x9ce   :  { %v692_v39 = vadd.f32 %v691_v38, %v8081_v30  ;;  %v284_v38 = vadd.f32 %v8073_v17, %v8119_v9 }
 0x9d0   :  { %695 = vrot.lane.b32.xlu0 %v692_v39, %s7866_s7  ;;  %v693_v42 = vmul.f32 %v692_v39, %v601_v26 }
 0xa42   :  { %v696_v40 = vpop.permute.xlu0 %695 }
 0xa43   :  { %v698_v41 = vmul.f32 %v696_v40, %v692_v39 }
 0xa45   :  { %700 = vrot.lane.b32.xlu1 %v698_v41, %s7867_s18 }
 0xab7   :  { %v701_v43 = vpop.permute.xlu1 %700 }
 0xab8   :  { %v703_v44 = vadd.f32 %v701_v43, %v693_v42 }
 0xaba   :  { %7462 = vtanh.f32 %v703_v44 }
 0xac4   :  { %v7463_v45 = vpop.eup %7462 }
 0xac5   :  { %706 = vrot.lane.b32.xlu0 %v7463_v45, %s7866_s7 }
 0xb37   :  { %v707_v46 = vpop.permute.xlu0 %706 }
 0xb38   :  { %v709_v47 = vmul.f32 %v707_v46, %v692_v39 }
 0xb3a   :  { %711 = vrot.lane.b32.xlu1 %v709_v47, %s7867_s18 }
 0xbac   :  { %v712_v48 = vpop.permute.xlu1 %711 }
 0xbad   :  { %715 = vst.msk [vmem:[#allocation3 + $0x18] sm:$0xff] %vm301_vm4, %v712_v48  ;;  %6504 = vmatmul.mubr.msk.f32.vlgmr.msra.gmra.mrb[10].mxu0 %vm301_vm4, %v712_v48 }
 0xbae   :  { %7132 = vmatpush3.bf16.msra.mxu0 %v8050_v8  ;;  %6525 = vmatprep.mubr.msk.f32.mxu0 %vm7863_vm0, %v7864_v1 }
 0xbaf   :  { %7133 = vmatprep.subr.bf16.mxu0 %v7862_v0 }
 0xbb2   :  { %7135 = vmatpush3.bf16.msra.mxu0 %v8054_v12 }
 0xbb3   :  { %7143 = vmatprep.subr.bf16.mxu0 %v7142_v22 }
 0xbb4   :  { %v1138_v35 = vld [vmem:[#allocation3 + $0x18] sm:$0xff] }
 0xc80   :  { %v786_v50 = vpop.f32.mrb[10].mxu0 }
 0xc81   :  { %v790_v51 = vadd.f32 %v786_v50, %v274_v49  ;;  %v6505_v52 = vpop.f32.mrb[11].mxu0 }
 0xc83   :  { %v791_v53 = vmul.f32 %v790_v51, %v8076_v23 }
 0xc85   :  { %7464 = vtanh.f32 %v791_v53 }
 0xc8f   :  { %v7465_v54 = vpop.eup %7464 }
 0xc90   :  { %v793_v55 = vmul.f32 %v7465_v54, %v8076_v23 }
 0xc92   :  { %v794_v56 = vadd.f32 %v793_v55, %v8081_v30 }
 0xc94   :  { %797 = vrot.lane.b32.xlu0 %v794_v56, %s7866_s7  ;;  %v795_v59 = vmul.f32 %v794_v56, %v703_v44 }
 0xd06   :  { %v798_v57 = vpop.permute.xlu0 %797 }
 0xd07   :  { %v800_v58 = vmul.f32 %v798_v57, %v794_v56  ;;  %v1129_v57 = vld [vmem:[#allocation10 + $0x20] sm:$0xff] }
 0xd09   :  { %802 = vrot.lane.b32.xlu1 %v800_v58, %s7867_s18  ;;  %v1130_v58 = vld [vmem:[#allocation10 + $0x28] sm:$0xff] }
 0xd7b   :  { %v803_v60 = vpop.permute.xlu1 %802 }
 0xd7c   :  { %v805_v61 = vadd.f32 %v803_v60, %v795_v59  ;;  %v8216_v59 = vpack.c.bf16 %v1130_v58, %v1129_v57  ;;  %v1131_v60 = vld [vmem:[#allocation10 + $0x30] sm:$0xff] }
 0xd7e   :  { %7466 = vtanh.f32 %v805_v61 }
 0xd88   :  { %v7467_v62 = vpop.eup %7466 }
 0xd89   :  { %808 = vrot.lane.b32.xlu0 %v7467_v62, %s7866_s7 }
 0xdfb   :  { %v809_v63 = vpop.permute.xlu0 %808 }
 0xdfc   :  { %v811_v2 = vmul.f32 %v809_v63, %v794_v56 }
 0xdfe   :  { %813 = vrot.lane.b32.xlu1 %v811_v2, %s7867_s18 }
 0xe70   :  { %v814_v3 = vpop.permute.xlu1 %813 }
 0xe71   :  { %817 = vst.msk [vmem:[#allocation3 + $0x20] sm:$0xff] %vm301_vm4, %v814_v3  ;;  %6515 = vmatmul.mubr.msk.f32.vlgmr.msra.gmra.mrb[6].mxu1 %vm301_vm4, %v814_v3 }
 0xe72   :  { %7138 = vmatpush3.bf16.msra.mxu1 %v8050_v8  ;;  %6536 = vmatprep.mubr.msk.f32.mxu1 %vm7863_vm0, %v7864_v1 }
 0xe73   :  { %7139 = vmatprep.subr.bf16.mxu1 %v7862_v0 }
 0xe76   :  { %7141 = vmatpush3.bf16.msra.mxu1 %v8054_v12 }
 0xe77   :  { %7150 = vmatprep.subr.bf16.mxu1 %v7862_v0 }
 0xe78   :  { %v1139_v36 = vld [vmem:[#allocation3 + $0x20] sm:$0xff] }
 0xf44   :  { %v888_v6 = vpop.f32.mrb[6].mxu1 }
 0xf45   :  { %v892_v10 = vadd.f32 %v888_v6, %v279_v4  ;;  %v6516_v11 = vpop.f32.mrb[7].mxu1  ;;  %v289_v6 = vadd.f32 %v8117_v7, %v8073_v17 }
 0xf47   :  { %v893_v13 = vmul.f32 %v892_v10, %v8076_v23 }
 0xf49   :  { %7468 = vtanh.f32 %v893_v13 }
 0xf53   :  { %v7469_v14 = vpop.eup %7468 }
 0xf54   :  { %v895_v8 = vmul.f32 %v7469_v14, %v8076_v23  ;;  %v8243_v14 = vld [vmem:[#allocation12 + $0x1] ss:$0 sm:$0xff] }
 0xf56   :  { %v896_v15 = vadd.f32 %v895_v8, %v8081_v30 }
 0xf58   :  { %899 = vrot.lane.b32.xlu0 %v896_v15, %s7866_s7  ;;  %v897_v18 = vmul.f32 %v896_v15, %v805_v61  ;;  %v1132_v61 = vld [vmem:[#allocation10 + $0x38] sm:$0xff] }
 0xf59   :  { %v8220_v62 = vpack.c.bf16 %v1132_v61, %v1131_v60 }
 0xfca   :  { %v900_v16 = vpop.permute.xlu0 %899 }
 0xfcb   :  { %v902_v12 = vmul.f32 %v900_v16, %v896_v15 }
 0xfcd   :  { %904 = vrot.lane.b32.xlu1 %v902_v12, %s7867_s18 }
0x103f   :  { %v905_v19 = vpop.permute.xlu1 %904 }
0x1040   :  { %v907_v5 = vadd.f32 %v905_v19, %v897_v18 }
0x1042   :  { %7470 = vtanh.f32 %v907_v5 }
0x104c   :  { %v7471_v24 = vpop.eup %7470 }
0x104d   :  { %910 = vrot.lane.b32.xlu0 %v7471_v24, %s7866_s7 }
0x10bf   :  { %v911_v25 = vpop.permute.xlu0 %910 }
0x10c0   :  { %v913_v26 = vmul.f32 %v911_v25, %v896_v15 }
0x10c2   :  { %915 = vrot.lane.b32.xlu1 %v913_v26, %s7867_s18 }
0x1134   :  { %v916_v31 = vpop.permute.xlu1 %915 }
0x1135   :  { %919 = vst.msk [vmem:[#allocation3 + $0x28] sm:$0xff] %vm301_vm4, %v916_v31  ;;  %6526 = vmatmul.mubr.msk.f32.vlgmr.msra.gmra.mrb[12].mxu0 %vm301_vm4, %v916_v31 }
0x1136   :  { %7145 = vmatpush3.bf16.msra.mxu0 %v7142_v22  ;;  %6547 = vmatprep.mubr.msk.f32.mxu0 %vm301_vm4, %v1135_v32 }
0x1137   :  { %7147 = vmatprep.subr.bf16.mxu0 %v7146_v29 }
0x113a   :  { %7149 = vmatpush3.bf16.msra.mxu0 %v7146_v29 }
0x113b   :  { %7162 = vmatprep.subr.bf16.mxu0 %v7862_v0 }
0x113c   :  { %v1140_v37 = vld [vmem:[#allocation3 + $0x28] sm:$0xff] }
0x113d   :  { %6548 = vmatmul.mubr.msk.f32.vlgmr.msra.gmra.mrb[14].mxu0 %vm301_vm4, %v1136_v33 }
0x113e   :  { %6550 = vmatprep.mubr.msk.f32.mxu0 %vm301_vm4, %v1137_v34  ;;  %7164 = vmatpush3.bf16.msra.mxu0 %v8216_v59 }
0x113f   :  { %7165 = vmatprep.subr.bf16.mxu0 %v7862_v0 }
0x1141   :  { %6551 = vmatmul.mubr.msk.f32.gmra.mrb[16].mxu0 %vm301_vm4, %v1138_v35 }
0x1142   :  { %6553 = vmatprep.mubr.msk.f32.mxu0 %vm301_vm4, %v1139_v36  ;;  %7167 = vmatpush3.bf16.msra.mxu0 %v8220_v62 }
0x1143   :  { %7174 = vmatprep.subr.bf16.mxu0 %v7862_v0 }
0x1145   :  { %6554 = vmatmul.mubr.msk.f32.gmra.mrb[18].mxu0 %vm301_vm4, %v1140_v37 }
0x1208   :  { %v990_v39 = vpop.f32.mrb[12].mxu0 }
0x1209   :  { %v994_v40 = vadd.f32 %v990_v39, %v284_v38  ;;  %v6527_v41 = vpop.f32.mrb[13].mxu0 }
0x120b   :  { %v995_v42 = vmul.f32 %v994_v40, %v8076_v23 }
0x120d   :  { %7472 = vtanh.f32 %v995_v42 }
0x1210   :  { %v8198_v43 = vpop.f32.mrb[14].mxu0 }
0x1211   :  { %v1239_v44 = vpop.f32.mrb[15].mxu0  ;;  %v1245_v42 = vadd.f32 %v8198_v43, %v8243_v14 }
0x1212   :  { %v1240_v8 = vadd.f32 %v8243_v14, %v1239_v44 }
0x1214   :  { %v8200_v45 = vpop.f32.mrb[16].mxu0 }
0x1215   :  { %v8202_v46 = vpop.f32.mrb[17].mxu0 }
0x1217   :  { %v7473_v47 = vpop.eup %7472 }
0x1218   :  { %v8204_v48 = vpop.f32.mrb[18].mxu0  ;;  %v997_v49 = vmul.f32 %v7473_v47, %v8076_v23 }
0x1219   :  { %v8207_v50 = vpop.f32.mrb[19].mxu0 }
0x121a   :  { %v998_v9 = vadd.f32 %v997_v49, %v8081_v30 }
0x121c   :  { %1001 = vrot.lane.b32.xlu0 %v998_v9, %s7866_s7  ;;  %v999_v53 = vmul.f32 %v998_v9, %v907_v5 }
0x128e   :  { %v1002_v51 = vpop.permute.xlu0 %1001 }
0x128f   :  { %v1004_v52 = vmul.f32 %v1002_v51, %v998_v9 }
0x1291   :  { %1006 = vrot.lane.b32.xlu1 %v1004_v52, %s7867_s18 }
0x1303   :  { %v1007_v54 = vpop.permute.xlu1 %1006 }
0x1304   :  { %v8212_v55 = vadd.f32 %v1007_v54, %v999_v53 }
0x1306   :  { %7474 = vtanh.f32 %v8212_v55 }
0x1310   :  { %v7475_v56 = vpop.eup %7474 }
0x1311   :  { %1012 = vrot.lane.b32.xlu0 %v7475_v56, %s7866_s7 }
0x1383   :  { %v1013_v63 = vpop.permute.xlu0 %1012 }
0x1384   :  { %v1015_v2 = vmul.f32 %v1013_v63, %v998_v9 }
0x1386   :  { %1017 = vrot.lane.b32.xlu1 %v1015_v2, %s7867_s18 }
0x13f8   :  { %v1018_v3 = vpop.permute.xlu1 %1017 }
0x13f9   :  { %1021 = vst.msk [vmem:[#allocation3 + $0x30] sm:$0xff] %vm301_vm4, %v1018_v3  ;;  %6537 = vmatmul.mubr.msk.f32.vlgmr.msra.gmra.mrb[8].mxu1 %vm301_vm4, %v1018_v3 }
0x13fa   :  { %7152 = vmatpush3.bf16.msra.mxu1 %v8216_v59  ;;  %6567 = vmatprep.mubr.msk.f32.mxu1 %vm7863_vm0, %v7864_v1 }
0x13fb   :  { %7153 = vmatprep.subr.bf16.mxu1 %v7862_v0 }
0x13fe   :  { %7155 = vmatpush3.bf16.msra.mxu1 %v8220_v62 }
0x13ff   :  { %7156 = vmatprep.subr.bf16.mxu1 %v7862_v0 }
0x1400   :  { %v1141_v4 = vld [vmem:[#allocation3 + $0x30] sm:$0xff] }
0x1401   :  { %6568 = vmatmul.mubr.f32.vlgmr.msra.gmra.mrb[10].mxu1 %v7864_v1  ;;  %6556 = vmatprep.mubr.msk.f32.mxu0 %vm301_vm4, %v1141_v4 }
0x1402   :  { %7158 = vmatpush3.bf16.msra.mxu1 %v8216_v59  ;;  %6578 = vmatprep.mubr.msk.f32.mxu1 %vm7863_vm0, %v7864_v1 }
0x1403   :  { %7159 = vmatprep.subr.bf16.mxu1 %v7862_v0 }
0x1406   :  { %7161 = vmatpush3.bf16.msra.mxu1 %v8220_v62 }
0x1407   :  { %7168 = vmatprep.subr.bf16.mxu1 %v7862_v0 }
0x14cc   :  { %v1092_v10 = vpop.f32.mrb[8].mxu1 }
0x14cd   :  { %v1096_v11 = vadd.f32 %v1092_v10, %v289_v6  ;;  %v6538_v13 = vpop.f32.mrb[9].mxu1  ;;  %v1250_v10 = vadd.f32 %v8243_v14, %v8202_v46 }
0x14cf   :  { %v1097_v21 = vmul.f32 %v1096_v11, %v8076_v23 }
0x14d4   :  { %v1353_v15 = vpop.f32.mrb[10].mxu1 }
0x14d5   :  { %v1357_v16 = vadd.f32 %v1353_v15, %v1240_v8  ;;  %v6569_v12 = vpop.f32.mrb[11].mxu1 }
0x14d7   :  { %v1358_v18 = vmul.f32 %v1357_v16, %v8076_v23 }
0x14d9   :  { %7476 = vtanh.f32 %v1358_v18 }
0x14da   :  { %7478 = vtanh.f32 %v1097_v21 }
0x14e3   :  { %v7477_v19 = vpop.eup %7476 }
0x14e4   :  { %v1360_v5 = vmul.f32 %v7477_v19, %v8076_v23  ;;  %v7479_v26 = vpop.eup %7478 }
0x14e5   :  { %v1099_v27 = vmul.f32 %v7479_v26, %v8076_v23 }
0x14e6   :  { %v1361_v20 = vadd.f32 %v1360_v5, %v8081_v30 }
0x14e7   :  { %v1100_v29 = vadd.f32 %v1099_v27, %v8081_v30 }
0x14e8   :  { %1364 = vrot.lane.b32.xlu0 %v1361_v20, %s7866_s7  ;;  %v1362_v22 = vmul.f32 0.0, %v1361_v20 }
0x14e9   :  { %v1101_v36 = vmul.f32 %v1100_v29, %v8212_v55 }
0x155a   :  { %v1365_v17 = vpop.permute.xlu0 %1364 }
0x155b   :  { %v1367_v7 = vmul.f32 %v1365_v17, %v1361_v20 }
0x155d   :  { %1369 = vrot.lane.b32.xlu1 %v1367_v7, %s7867_s18 }
0x15cf   :  { %v1370_v24 = vpop.permute.xlu1 %1369 }
0x15d0   :  { %v1372_v25 = vadd.f32 %v1370_v24, %v1362_v22 }
0x15d2   :  { %7480 = vtanh.f32 %v1372_v25 }
0x15dc   :  { %v7481_v28 = vpop.eup %7480 }
0x15dd   :  { %1375 = vrot.lane.b32.xlu0 %v7481_v28, %s7866_s7 }
0x15e1   :  { %1103 = vrot.lane.b32.xlu0 %v1100_v29, %s7866_s7 }
0x164f   :  { %v1376_v31 = vpop.permute.xlu0 %1375 }
0x1650   :  { %v1378_v32 = vmul.f32 %v1376_v31, %v1361_v20 }
0x1652   :  { %1380 = vrot.lane.b32.xlu1 %v1378_v32, %s7867_s18 }
0x1653   :  { %v1104_v33 = vpop.permute.xlu0 %1103 }
0x1654   :  { %v1106_v34 = vmul.f32 %v1104_v33, %v1100_v29 }
0x1656   :  { %1108 = vrot.lane.b32.xlu0 %v1106_v34, %s7867_s18 }
0x16c4   :  { %v1381_v35 = vpop.permute.xlu1 %1380 }
0x16c5   :  { %1383 = vst.msk [vmem:[#allocation3] sm:$0xff] %vm301_vm4, %v1381_v35  ;;  %6579 = vmatmul.mubr.msk.f32.vlgmr.msra.gmra.mrb[12].mxu1 %vm301_vm4, %v1381_v35 }
0x16c6   :  { %7170 = vmatpush3.bf16.msra.mxu1 %v8216_v59  ;;  %6600 = vmatprep.mubr.msk.f32.mxu1 %vm7863_vm0, %v7864_v1 }
0x16c7   :  { %7171 = vmatprep.subr.bf16.mxu1 %v7862_v0 }
0x16c8   :  { %v1109_v37 = vpop.permute.xlu0 %1108 }
0x16c9   :  { %v1111_v38 = vadd.f32 %v1109_v37, %v1101_v36 }
0x16ca   :  { %7173 = vmatpush3.bf16.msra.mxu1 %v8220_v62 }
0x16cb   :  { %7482 = vtanh.f32 %v1111_v38  ;;  %7180 = vmatprep.subr.bf16.mxu1 %v7862_v0 }
0x16d5   :  { %v7483_v39 = vpop.eup %7482 }
0x16d6   :  { %1114 = vrot.lane.b32.xlu0 %v7483_v39, %s7866_s7 }
0x1748   :  { %v1115_v40 = vpop.permute.xlu0 %1114 }
0x1749   :  { %v1117_v41 = vmul.f32 %v1115_v40, %v1100_v29 }
0x174b   :  { %1119 = vrot.lane.b32.xlu0 %v1117_v41, %s7867_s18 }
0x1798   :  { %v1453_v44 = vpop.f32.mrb[12].mxu1 }
0x1799   :  { %v1457_v47 = vadd.f32 %v1453_v44, %v1245_v42  ;;  %v6580_v49 = vpop.f32.mrb[13].mxu1  ;;  %v1260_v42 = vadd.f32 %v8243_v14, %v8207_v50 }
0x179b   :  { %v1458_v9 = vmul.f32 %v1457_v47, %v8076_v23 }
0x179d   :  { %7484 = vtanh.f32 %v1458_v9 }
0x17a7   :  { %v7485_v51 = vpop.eup %7484 }
0x17a8   :  { %v1460_v52 = vmul.f32 %v7485_v51, %v8076_v23 }
0x17aa   :  { %v1461_v53 = vadd.f32 %v1460_v52, %v8081_v30 }
0x17ac   :  { %1464 = vrot.lane.b32.xlu1 %v1461_v53, %s7866_s7  ;;  %v1462_v57 = vmul.f32 %v1461_v53, %v1372_v25  ;;  %v1255_v25 = vadd.f32 %v8200_v45, %v8243_v14 }
0x17bd   :  { %v1120_v54 = vpop.permute.xlu0 %1119 }
0x17be   :  { %1123 = vst.msk [vmem:[#allocation3 + $0x38] sm:$0xff] %vm301_vm4, %v1120_v54 }
0x17c5   :  { %v1142_v55 = vld [vmem:[#allocation3 + $0x38] sm:$0xff] }
0x17c6   :  { %6557 = vmatmul.mubr.msk.f32.gmra.mrb[20].mxu0 %vm301_vm4, %v1142_v55 }
0x17c7   :  { %6589 = vmatprep.mubr.msk.f32.mxu0 %vm7863_vm0, %v7864_v1 }
0x181e   :  { %v1465_v43 = vpop.permute.xlu1 %1464 }
0x181f   :  { %v1467_v56 = vmul.f32 %v1465_v43, %v1461_v53 }
0x1821   :  { %1469 = vrot.lane.b32.xlu1 %v1467_v56, %s7867_s18 }
0x1893   :  { %v1470_v58 = vpop.permute.xlu1 %1469 }
0x1894   :  { %v1472_v60 = vadd.f32 %v1470_v58, %v1462_v57 }
0x1896   :  { %7486 = vtanh.f32 %v1472_v60 }
0x1899   :  { %v8280_v61 = vpop.f32.mrb[20].mxu0 }
0x189a   :  { %v8282_v63 = vpop.f32.mrb[21].mxu0 }
0x18a0   :  { %v7487_v2 = vpop.eup %7486 }
0x18a1   :  { %1475 = vrot.lane.b32.xlu1 %v7487_v2, %s7866_s7 }
0x1913   :  { %v1476_v3 = vpop.permute.xlu1 %1475 }
0x1914   :  { %v1478_v4 = vmul.f32 %v1476_v3, %v1461_v53  ;;  %v1265_v3 = vadd.f32 %v8204_v48, %v8243_v14 }
0x1916   :  { %1480 = vrot.lane.b32.xlu1 %v1478_v4, %s7867_s18 }
0x1988   :  { %v1481_v6 = vpop.permute.xlu1 %1480 }
0x1989   :  { %1483 = vst.msk [vmem:[#allocation3 + $0x8] sm:$0xff] %vm301_vm4, %v1481_v6  ;;  %6590 = vmatmul.mubr.msk.f32.vlgmr.msra.gmra.mrb[22].mxu0 %vm301_vm4, %v1481_v6 }
0x198a   :  { %7176 = vmatpush3.bf16.msra.mxu0 %v8216_v59  ;;  %6611 = vmatprep.mubr.msk.f32.mxu0 %vm7863_vm0, %v7864_v1 }
0x198b   :  { %7177 = vmatprep.subr.bf16.mxu0 %v7862_v0 }
0x198e   :  { %7179 = vmatpush3.bf16.msra.mxu0 %v8220_v62 }
0x198f   :  { %7186 = vmatprep.subr.bf16.mxu0 %v7862_v0 }
0x1a5c   :  { %v1553_v11 = vpop.f32.mrb[22].mxu0 }
0x1a5d   :  { %v1557_v13 = vadd.f32 %v1553_v11, %v1250_v10  ;;  %v6591_v8 = vpop.f32.mrb[23].mxu0 }
0x1a5f   :  { %v1558_v15 = vmul.f32 %v1557_v13, %v8076_v23 }
0x1a61   :  { %7488 = vtanh.f32 %v1558_v15 }
0x1a6b   :  { %v7489_v16 = vpop.eup %7488 }
0x1a6c   :  { %v1560_v12 = vmul.f32 %v7489_v16, %v8076_v23 }
0x1a6e   :  { %v1561_v18 = vadd.f32 %v1560_v12, %v8081_v30 }
0x1a70   :  { %1564 = vrot.lane.b32.xlu0 %v1561_v18, %s7866_s7  ;;  %v1562_v20 = vmul.f32 %v1561_v18, %v1472_v60 }
0x1ae2   :  { %v1565_v19 = vpop.permute.xlu0 %1564 }
0x1ae3   :  { %v1567_v5 = vmul.f32 %v1565_v19, %v1561_v18  ;;  %v2086_v19 = vld [vmem:[#allocation9 + $0x28] sm:$0xff] }
0x1ae5   :  { %1569 = vrot.lane.b32.xlu1 %v1567_v5, %s7867_s18 }
0x1b57   :  { %v1570_v17 = vpop.permute.xlu1 %1569 }
0x1b58   :  { %v1572_v46 = vadd.f32 %v1570_v17, %v1562_v20 }
0x1b5a   :  { %7490 = vtanh.f32 %v1572_v46 }
0x1b64   :  { %v7491_v7 = vpop.eup %7490 }
0x1b65   :  { %1575 = vrot.lane.b32.xlu0 %v7491_v7, %s7866_s7  ;;  %v2087_v7 = vld [vmem:[#allocation9 + $0x30] sm:$0xff] }
0x1bd7   :  { %v1576_v21 = vpop.permute.xlu0 %1575 }
0x1bd8   :  { %v1578_v22 = vmul.f32 %v1576_v21, %v1561_v18  ;;  %v2085_v18 = vld [vmem:[#allocation9 + $0x20] sm:$0xff]  ;;  %v2088_v21 = vld [vmem:[#allocation9 + $0x38] sm:$0xff] }
0x1bd9   :  { %v7198_v5 = vpack.c.bf16 %v2086_v19, %v2085_v18 }
0x1bda   :  { %1580 = vrot.lane.b32.xlu1 %v1578_v22, %s7867_s18  ;;  %v7202_v22 = vpack.c.bf16 %v2088_v21, %v2087_v7 }
0x1c4c   :  { %v1581_v24 = vpop.permute.xlu1 %1580 }
0x1c4d   :  { %1583 = vst.msk [vmem:[#allocation3 + $0x10] sm:$0xff] %vm301_vm4, %v1581_v24  ;;  %6601 = vmatmul.mubr.msk.f32.vlgmr.msra.gmra.mrb[14].mxu1 %vm301_vm4, %v1581_v24 }
0x1c4e   :  { %7182 = vmatpush3.bf16.msra.mxu1 %v8216_v59  ;;  %6622 = vmatprep.mubr.msk.f32.mxu1 %vm7863_vm0, %v7864_v1 }
0x1c4f   :  { %7183 = vmatprep.subr.bf16.mxu1 %v7862_v0 }
0x1c52   :  { %7185 = vmatpush3.bf16.msra.mxu1 %v8220_v62 }
0x1c53   :  { %7192 = vmatprep.subr.bf16.mxu1 %v7862_v0 }
0x1d20   :  { %v1653_v26 = vpop.f32.mrb[14].mxu1 }
0x1d21   :  { %v1657_v27 = vadd.f32 %v1653_v26, %v1255_v25  ;;  %v6602_v28 = vpop.f32.mrb[15].mxu1  ;;  %v2096_v25 = vld [vmem:[#allocation3] sm:$0xff]  ;;  %v2097_v26 = vld [vmem:[#allocation3 + $0x8] sm:$0xff] }
0x1d23   :  { %v1658_v29 = vmul.f32 %v1657_v27, %v8076_v23  ;;  %v2098_v27 = vld [vmem:[#allocation3 + $0x10] sm:$0xff] }
0x1d25   :  { %7492 = vtanh.f32 %v1658_v29 }
0x1d2f   :  { %v7493_v31 = vpop.eup %7492 }
0x1d30   :  { %v1660_v32 = vmul.f32 %v7493_v31, %v8076_v23 }
0x1d32   :  { %v1661_v33 = vadd.f32 %v1660_v32, %v8081_v30  ;;  %v1270_v32 = vadd.f32 %v8243_v14, %v8282_v63 }
0x1d34   :  { %1664 = vrot.lane.b32.xlu0 %v1661_v33, %s7866_s7  ;;  %v1662_v36 = vmul.f32 %v1661_v33, %v1572_v46 }
0x1da6   :  { %v1665_v34 = vpop.permute.xlu0 %1664 }
0x1da7   :  { %v1667_v35 = vmul.f32 %v1665_v34, %v1661_v33 }
0x1da9   :  { %1669 = vrot.lane.b32.xlu1 %v1667_v35, %s7867_s18 }
0x1e1b   :  { %v1670_v37 = vpop.permute.xlu1 %1669 }
0x1e1c   :  { %v1672_v45 = vadd.f32 %v1670_v37, %v1662_v36 }
0x1e1e   :  { %7494 = vtanh.f32 %v1672_v45 }
0x1e28   :  { %v7495_v38 = vpop.eup %7494 }
0x1e29   :  { %1675 = vrot.lane.b32.xlu0 %v7495_v38, %s7866_s7 }
0x1e9b   :  { %v1676_v39 = vpop.permute.xlu0 %1675 }
0x1e9c   :  { %v1678_v40 = vmul.f32 %v1676_v39, %v1661_v33 }
0x1e9e   :  { %1680 = vrot.lane.b32.xlu1 %v1678_v40, %s7867_s18 }
0x1f10   :  { %v1681_v41 = vpop.permute.xlu1 %1680 }
0x1f11   :  { %1683 = vst.msk [vmem:[#allocation3 + $0x18] sm:$0xff] %vm301_vm4, %v1681_v41  ;;  %6612 = vmatmul.mubr.msk.f32.vlgmr.msra.gmra.mrb[24].mxu0 %vm301_vm4, %v1681_v41 }
0x1f12   :  { %7188 = vmatpush3.bf16.msra.mxu0 %v8216_v59  ;;  %6633 = vmatprep.mubr.msk.f32.mxu0 %vm7863_vm0, %v7864_v1 }
0x1f13   :  { %7189 = vmatprep.subr.bf16.mxu0 %v7862_v0 }
0x1f16   :  { %7191 = vmatpush3.bf16.msra.mxu0 %v8220_v62 }
0x1f17   :  { %7199 = vmatprep.subr.bf16.mxu0 %v7198_v5 }
0x1f18   :  { %v2099_v28 = vld [vmem:[#allocation3 + $0x18] sm:$0xff] }
0x1fe4   :  { %v1753_v44 = vpop.f32.mrb[24].mxu0 }
0x1fe5   :  { %v1757_v47 = vadd.f32 %v1753_v44, %v1260_v42  ;;  %v6613_v49 = vpop.f32.mrb[25].mxu0 }
0x1fe7   :  { %v1758_v9 = vmul.f32 %v1757_v47, %v8076_v23 }
0x1fe9   :  { %7496 = vtanh.f32 %v1758_v9 }
0x1ff3   :  { %v7497_v51 = vpop.eup %7496 }
0x1ff4   :  { %v1760_v52 = vmul.f32 %v7497_v51, %v8076_v23 }
0x1ff6   :  { %v1761_v53 = vadd.f32 %v1760_v52, %v8081_v30 }
0x1ff8   :  { %1764 = vrot.lane.b32.xlu0 %v1761_v53, %s7866_s7  ;;  %v1762_v43 = vmul.f32 %v1761_v53, %v1672_v45 }
0x206a   :  { %v1765_v54 = vpop.permute.xlu0 %1764 }
0x206b   :  { %v1767_v55 = vmul.f32 %v1765_v54, %v1761_v53  ;;  %v2090_v54 = vld [vmem:[#allocation10 + $0x40] sm:$0xff] }
0x206d   :  { %1769 = vrot.lane.b32.xlu1 %v1767_v55, %s7867_s18  ;;  %v2091_v55 = vld [vmem:[#allocation10 + $0x48] sm:$0xff] }
0x20df   :  { %v1770_v56 = vpop.permute.xlu1 %1769 }
0x20e0   :  { %v1772_v50 = vadd.f32 %v1770_v56, %v1762_v43  ;;  %v8383_v43 = vpack.c.bf16 %v2091_v55, %v2090_v54  ;;  %v2092_v56 = vld [vmem:[#allocation10 + $0x50] sm:$0xff] }
0x20e2   :  { %7498 = vtanh.f32 %v1772_v50 }
0x20ec   :  { %v7499_v57 = vpop.eup %7498 }
0x20ed   :  { %1775 = vrot.lane.b32.xlu0 %v7499_v57, %s7866_s7 }
0x215f   :  { %v1776_v58 = vpop.permute.xlu0 %1775 }
0x2160   :  { %v1778_v60 = vmul.f32 %v1776_v58, %v1761_v53 }
0x2162   :  { %1780 = vrot.lane.b32.xlu1 %v1778_v60, %s7867_s18 }
0x21d4   :  { %v1781_v2 = vpop.permute.xlu1 %1780 }
0x21d5   :  { %1783 = vst.msk [vmem:[#allocation3 + $0x20] sm:$0xff] %vm301_vm4, %v1781_v2  ;;  %6623 = vmatmul.mubr.msk.f32.vlgmr.msra.gmra.mrb[16].mxu1 %vm301_vm4, %v1781_v2 }
0x21d6   :  { %7194 = vmatpush3.bf16.msra.mxu1 %v8216_v59  ;;  %6644 = vmatprep.mubr.msk.f32.mxu1 %vm7863_vm0, %v7864_v1 }
0x21d7   :  { %7195 = vmatprep.subr.bf16.mxu1 %v7862_v0 }
0x21da   :  { %7197 = vmatpush3.bf16.msra.mxu1 %v8220_v62 }
0x21db   :  { %7206 = vmatprep.subr.bf16.mxu1 %v7862_v0 }
0x21dc   :  { %v2100_v29 = vld [vmem:[#allocation3 + $0x20] sm:$0xff] }
0x22a8   :  { %v1853_v4 = vpop.f32.mrb[16].mxu1 }
0x22a9   :  { %v1857_v6 = vadd.f32 %v1853_v4, %v1265_v3  ;;  %v6624_v10 = vpop.f32.mrb[17].mxu1  ;;  %v1275_v4 = vadd.f32 %v8280_v61, %v8243_v14 }
0x22ab   :  { %v1858_v11 = vmul.f32 %v1857_v6, %v8076_v23 }
0x22ad   :  { %7500 = vtanh.f32 %v1858_v11 }
0x22b7   :  { %v7501_v13 = vpop.eup %7500 }
0x22b8   :  { %v1860_v59 = vmul.f32 %v7501_v13, %v8076_v23  ;;  %v8410_v13 = vld [vmem:[#allocation12 + $0x2] ss:$0 sm:$0xff] }
0x22ba   :  { %v1861_v8 = vadd.f32 %v1860_v59, %v8081_v30 }
0x22bc   :  { %1864 = vrot.lane.b32.xlu0 %v1861_v8, %s7866_s7  ;;  %v1862_v16 = vmul.f32 %v1861_v8, %v1772_v50  ;;  %v2093_v50 = vld [vmem:[#allocation10 + $0x58] sm:$0xff] }
0x22bd   :  { %v8387_v57 = vpack.c.bf16 %v2093_v50, %v2092_v56 }
0x232e   :  { %v1865_v15 = vpop.permute.xlu0 %1864 }
0x232f   :  { %v1867_v62 = vmul.f32 %v1865_v15, %v1861_v8 }
0x2331   :  { %1869 = vrot.lane.b32.xlu1 %v1867_v62, %s7867_s18 }
0x23a3   :  { %v1870_v12 = vpop.permute.xlu1 %1869 }
0x23a4   :  { %v1872_v48 = vadd.f32 %v1870_v12, %v1862_v16 }
0x23a6   :  { %7502 = vtanh.f32 %v1872_v48 }
0x23b0   :  { %v7503_v20 = vpop.eup %7502 }
0x23b1   :  { %1875 = vrot.lane.b32.xlu0 %v7503_v20, %s7866_s7 }
0x2423   :  { %v1876_v17 = vpop.permute.xlu0 %1875 }
0x2424   :  { %v1878_v46 = vmul.f32 %v1876_v17, %v1861_v8 }
0x2426   :  { %1880 = vrot.lane.b32.xlu1 %v1878_v46, %s7867_s18 }
0x2498   :  { %v1881_v24 = vpop.permute.xlu1 %1880 }
0x2499   :  { %1883 = vst.msk [vmem:[#allocation3 + $0x28] sm:$0xff] %vm301_vm4, %v1881_v24  ;;  %6634 = vmatmul.mubr.msk.f32.vlgmr.msra.gmra.mrb[26].mxu0 %vm301_vm4, %v1881_v24 }
0x249a   :  { %7201 = vmatpush3.bf16.msra.mxu0 %v7198_v5  ;;  %6655 = vmatprep.mubr.msk.f32.mxu0 %vm301_vm4, %v2096_v25 }
0x249b   :  { %7203 = vmatprep.subr.bf16.mxu0 %v7202_v22 }
0x249e   :  { %7205 = vmatpush3.bf16.msra.mxu0 %v7202_v22 }
0x249f   :  { %7218 = vmatprep.subr.bf16.mxu0 %v7862_v0 }
0x24a0   :  { %v2101_v31 = vld [vmem:[#allocation3 + $0x28] sm:$0xff] }
0x24a1   :  { %6656 = vmatmul.mubr.msk.f32.vlgmr.msra.gmra.mrb[28].mxu0 %vm301_vm4, %v2097_v26 }
0x24a2   :  { %6658 = vmatprep.mubr.msk.f32.mxu0 %vm301_vm4, %v2098_v27  ;;  %7220 = vmatpush3.bf16.msra.mxu0 %v8383_v43 }
0x24a3   :  { %7221 = vmatprep.subr.bf16.mxu0 %v7862_v0 }
0x24a5   :  { %6659 = vmatmul.mubr.msk.f32.gmra.mrb[30].mxu0 %vm301_vm4, %v2099_v28 }
0x24a6   :  { %6661 = vmatprep.mubr.msk.f32.mxu0 %vm301_vm4, %v2100_v29  ;;  %7223 = vmatpush3.bf16.msra.mxu0 %v8387_v57 }
0x24a7   :  { %7230 = vmatprep.subr.bf16.mxu0 %v7862_v0 }
0x24a9   :  { %6662 = vmatmul.mubr.msk.f32.gmra.mrb[32].mxu0 %vm301_vm4, %v2101_v31 }
0x256c   :  { %v1953_v33 = vpop.f32.mrb[26].mxu0 }
0x256d   :  { %v1957_v34 = vadd.f32 %v1953_v33, %v1270_v32  ;;  %v6635_v35 = vpop.f32.mrb[27].mxu0 }
0x256f   :  { %v1958_v36 = vmul.f32 %v1957_v34, %v8076_v23 }
0x2571   :  { %7504 = vtanh.f32 %v1958_v36 }
0x2574   :  { %v8365_v37 = vpop.f32.mrb[28].mxu0 }
0x2575   :  { %v2200_v45 = vpop.f32.mrb[29].mxu0  ;;  %v2206_v36 = vadd.f32 %v8365_v37, %v8410_v13 }
0x2576   :  { %v2201_v59 = vadd.f32 %v8410_v13, %v2200_v45 }
0x2578   :  { %v8367_v38 = vpop.f32.mrb[30].mxu0 }
0x2579   :  { %v8369_v39 = vpop.f32.mrb[31].mxu0 }
0x257b   :  { %v7505_v40 = vpop.eup %7504 }
0x257c   :  { %v8371_v41 = vpop.f32.mrb[32].mxu0  ;;  %v1960_v42 = vmul.f32 %v7505_v40, %v8076_v23 }
0x257d   :  { %v8374_v44 = vpop.f32.mrb[33].mxu0 }
0x257e   :  { %v1961_v63 = vadd.f32 %v1960_v42, %v8081_v30 }
0x2580   :  { %1964 = vrot.lane.b32.xlu0 %v1961_v63, %s7866_s7  ;;  %v1962_v9 = vmul.f32 %v1961_v63, %v1872_v48 }
0x25f2   :  { %v1965_v47 = vpop.permute.xlu0 %1964 }
0x25f3   :  { %v1967_v49 = vmul.f32 %v1965_v47, %v1961_v63 }
0x25f5   :  { %1969 = vrot.lane.b32.xlu1 %v1967_v49, %s7867_s18 }
0x2667   :  { %v1970_v51 = vpop.permute.xlu1 %1969 }
0x2668   :  { %v8379_v52 = vadd.f32 %v1970_v51, %v1962_v9 }
0x266a   :  { %7506 = vtanh.f32 %v8379_v52 }
0x2674   :  { %v7507_v53 = vpop.eup %7506 }
0x2675   :  { %1975 = vrot.lane.b32.xlu0 %v7507_v53, %s7866_s7 }
0x26e7   :  { %v1976_v58 = vpop.permute.xlu0 %1975 }
0x26e8   :  { %v1978_v60 = vmul.f32 %v1976_v58, %v1961_v63 }
0x26ea   :  { %1980 = vrot.lane.b32.xlu1 %v1978_v60, %s7867_s18 }
0x275c   :  { %v1981_v2 = vpop.permute.xlu1 %1980 }
0x275d   :  { %1983 = vst.msk [vmem:[#allocation3 + $0x30] sm:$0xff] %vm301_vm4, %v1981_v2  ;;  %6645 = vmatmul.mubr.msk.f32.vlgmr.msra.gmra.mrb[18].mxu1 %vm301_vm4, %v1981_v2 }
0x275e   :  { %7208 = vmatpush3.bf16.msra.mxu1 %v8383_v43  ;;  %6675 = vmatprep.mubr.msk.f32.mxu1 %vm7863_vm0, %v7864_v1 }
0x275f   :  { %7209 = vmatprep.subr.bf16.mxu1 %v7862_v0 }
0x2762   :  { %7211 = vmatpush3.bf16.msra.mxu1 %v8387_v57 }
0x2763   :  { %7212 = vmatprep.subr.bf16.mxu1 %v7862_v0 }
0x2764   :  { %v2102_v3 = vld [vmem:[#allocation3 + $0x30] sm:$0xff] }
0x2765   :  { %6676 = vmatmul.mubr.f32.vlgmr.msra.gmra.mrb[20].mxu1 %v7864_v1  ;;  %6664 = vmatprep.mubr.msk.f32.mxu0 %vm301_vm4, %v2102_v3 }
0x2766   :  { %7214 = vmatpush3.bf16.msra.mxu1 %v8383_v43  ;;  %6686 = vmatprep.mubr.msk.f32.mxu1 %vm7863_vm0, %v7864_v1 }
0x2767   :  { %7215 = vmatprep.subr.bf16.mxu1 %v7862_v0 }
0x276a   :  { %7217 = vmatpush3.bf16.msra.mxu1 %v8387_v57 }
0x276b   :  { %7224 = vmatprep.subr.bf16.mxu1 %v7862_v0 }
0x2830   :  { %v2053_v6 = vpop.f32.mrb[18].mxu1 }
0x2831   :  { %v2057_v10 = vadd.f32 %v2053_v6, %v1275_v4  ;;  %v6646_v11 = vpop.f32.mrb[19].mxu1  ;;  %v2211_v6 = vadd.f32 %v8410_v13, %v8369_v39 }
0x2833   :  { %v2058_v19 = vmul.f32 %v2057_v10, %v8076_v23 }
0x2838   :  { %v2314_v8 = vpop.f32.mrb[20].mxu1 }
0x2839   :  { %v2318_v15 = vadd.f32 %v2314_v8, %v2201_v59  ;;  %v6677_v62 = vpop.f32.mrb[21].mxu1 }
0x283b   :  { %v2319_v16 = vmul.f32 %v2318_v15, %v8076_v23 }
0x283d   :  { %7508 = vtanh.f32 %v2319_v16 }
0x283e   :  { %7510 = vtanh.f32 %v2058_v19 }
0x2847   :  { %v7509_v12 = vpop.eup %7508 }
0x2848   :  { %v2321_v48 = vmul.f32 %v7509_v12, %v8076_v23  ;;  %v7511_v46 = vpop.eup %7510 }
0x2849   :  { %v2060_v7 = vmul.f32 %v7511_v46, %v8076_v23 }
0x284a   :  { %v2322_v18 = vadd.f32 %v2321_v48, %v8081_v30 }
0x284b   :  { %v2061_v22 = vadd.f32 %v2060_v7, %v8081_v30 }
0x284c   :  { %2325 = vrot.lane.b32.xlu0 %v2322_v18, %s7866_s7  ;;  %v2323_v5 = vmul.f32 0.0, %v2322_v18 }
0x284d   :  { %v2062_v29 = vmul.f32 %v2061_v22, %v8379_v52 }
0x28be   :  { %v2326_v14 = vpop.permute.xlu0 %2325 }
0x28bf   :  { %v2328_v61 = vmul.f32 %v2326_v14, %v2322_v18 }
0x28c1   :  { %2330 = vrot.lane.b32.xlu1 %v2328_v61, %s7867_s18 }
0x2933   :  { %v2331_v20 = vpop.permute.xlu1 %2330 }
0x2934   :  { %v2333_v17 = vadd.f32 %v2331_v20, %v2323_v5 }
0x2936   :  { %7512 = vtanh.f32 %v2333_v17 }
0x2940   :  { %v7513_v21 = vpop.eup %7512 }
0x2941   :  { %2336 = vrot.lane.b32.xlu0 %v7513_v21, %s7866_s7 }
0x2945   :  { %2064 = vrot.lane.b32.xlu0 %v2061_v22, %s7866_s7 }
0x29b3   :  { %v2337_v24 = vpop.permute.xlu0 %2336 }
0x29b4   :  { %v2339_v25 = vmul.f32 %v2337_v24, %v2322_v18 }
0x29b6   :  { %2341 = vrot.lane.b32.xlu1 %v2339_v25, %s7867_s18 }
0x29b7   :  { %v2065_v26 = vpop.permute.xlu0 %2064 }
0x29b8   :  { %v2067_v27 = vmul.f32 %v2065_v26, %v2061_v22 }
0x29ba   :  { %2069 = vrot.lane.b32.xlu0 %v2067_v27, %s7867_s18 }
0x2a28   :  { %v2342_v28 = vpop.permute.xlu1 %2341 }
0x2a29   :  { %2344 = vst.msk [vmem:[#allocation3] sm:$0xff] %vm301_vm4, %v2342_v28  ;;  %6687 = vmatmul.mubr.msk.f32.vlgmr.msra.gmra.mrb[22].mxu1 %vm301_vm4, %v2342_v28 }
0x2a2a   :  { %7226 = vmatpush3.bf16.msra.mxu1 %v8383_v43  ;;  %6708 = vmatprep.mubr.msk.f32.mxu1 %vm7863_vm0, %v7864_v1 }
0x2a2b   :  { %7227 = vmatprep.subr.bf16.mxu1 %v7862_v0 }
0x2a2c   :  { %v2070_v31 = vpop.permute.xlu0 %2069 }
0x2a2d   :  { %v2072_v32 = vadd.f32 %v2070_v31, %v2062_v29 }
0x2a2e   :  { %7229 = vmatpush3.bf16.msra.mxu1 %v8387_v57 }
0x2a2f   :  { %7514 = vtanh.f32 %v2072_v32  ;;  %7236 = vmatprep.subr.bf16.mxu1 %v7862_v0 }
0x2a39   :  { %v7515_v33 = vpop.eup %7514 }
0x2a3a   :  { %2075 = vrot.lane.b32.xlu0 %v7515_v33, %s7866_s7 }
0x2aac   :  { %v2076_v34 = vpop.permute.xlu0 %2075 }
0x2aad   :  { %v2078_v35 = vmul.f32 %v2076_v34, %v2061_v22 }
0x2aaf   :  { %2080 = vrot.lane.b32.xlu0 %v2078_v35, %s7867_s18 }
0x2afc   :  { %v2414_v45 = vpop.f32.mrb[22].mxu1 }
0x2afd   :  { %v2418_v40 = vadd.f32 %v2414_v45, %v2206_v36  ;;  %v6688_v42 = vpop.f32.mrb[23].mxu1  ;;  %v2221_v36 = vadd.f32 %v8410_v13, %v8374_v44 }
0x2aff   :  { %v2419_v63 = vmul.f32 %v2418_v40, %v8076_v23 }
0x2b01   :  { %7516 = vtanh.f32 %v2419_v63 }
0x2b0b   :  { %v7517_v47 = vpop.eup %7516 }
0x2b0c   :  { %v2421_v49 = vmul.f32 %v7517_v47, %v8076_v23 }
0x2b0e   :  { %v2422_v9 = vadd.f32 %v2421_v49, %v8081_v30 }
0x2b10   :  { %2425 = vrot.lane.b32.xlu1 %v2422_v9, %s7866_s7  ;;  %v2423_v54 = vmul.f32 %v2422_v9, %v2333_v17  ;;  %v2216_v17 = vadd.f32 %v8367_v38, %v8410_v13 }
0x2b21   :  { %v2081_v51 = vpop.permute.xlu0 %2080 }
0x2b22   :  { %2083 = vst.msk [vmem:[#allocation3 + $0x38] sm:$0xff] %vm301_vm4, %v2081_v51 }
0x2b29   :  { %v2103_v52 = vld [vmem:[#allocation3 + $0x38] sm:$0xff] }
0x2b2a   :  { %6665 = vmatmul.mubr.msk.f32.gmra.mrb[34].mxu0 %vm301_vm4, %v2103_v52 }
0x2b2b   :  { %6697 = vmatprep.mubr.msk.f32.mxu0 %vm7863_vm0, %v7864_v1 }
0x2b82   :  { %v2426_v37 = vpop.permute.xlu1 %2425 }
0x2b83   :  { %v2428_v53 = vmul.f32 %v2426_v37, %v2422_v9 }
0x2b85   :  { %2430 = vrot.lane.b32.xlu1 %v2428_v53, %s7867_s18 }
0x2bf7   :  { %v2431_v55 = vpop.permute.xlu1 %2430 }
0x2bf8   :  { %v2433_v56 = vadd.f32 %v2431_v55, %v2423_v54 }
0x2bfa   :  { %7518 = vtanh.f32 %v2433_v56 }
0x2bfd   :  { %v8447_v50 = vpop.f32.mrb[34].mxu0 }
0x2bfe   :  { %v8449_v58 = vpop.f32.mrb[35].mxu0 }
0x2c04   :  { %v7519_v60 = vpop.eup %7518 }
0x2c05   :  { %2436 = vrot.lane.b32.xlu1 %v7519_v60, %s7866_s7 }
0x2c77   :  { %v2437_v2 = vpop.permute.xlu1 %2436 }
0x2c78   :  { %v2439_v3 = vmul.f32 %v2437_v2, %v2422_v9  ;;  %v2226_v2 = vadd.f32 %v8371_v41, %v8410_v13 }
0x2c7a   :  { %2441 = vrot.lane.b32.xlu1 %v2439_v3, %s7867_s18 }
0x2cec   :  { %v2442_v4 = vpop.permute.xlu1 %2441 }
0x2ced   :  { %2444 = vst.msk [vmem:[#allocation3 + $0x8] sm:$0xff] %vm301_vm4, %v2442_v4  ;;  %6698 = vmatmul.mubr.msk.f32.vlgmr.msra.gmra.mrb[36].mxu0 %vm301_vm4, %v2442_v4 }
0x2cee   :  { %7232 = vmatpush3.bf16.msra.mxu0 %v8383_v43  ;;  %6719 = vmatprep.mubr.msk.f32.mxu0 %vm7863_vm0, %v7864_v1 }
0x2cef   :  { %7233 = vmatprep.subr.bf16.mxu0 %v7862_v0 }
0x2cf2   :  { %7235 = vmatpush3.bf16.msra.mxu0 %v8387_v57 }
0x2cf3   :  { %7242 = vmatprep.subr.bf16.mxu0 %v7862_v0 }
0x2dc0   :  { %v2514_v10 = vpop.f32.mrb[36].mxu0 }
0x2dc1   :  { %v2518_v11 = vadd.f32 %v2514_v10, %v2211_v6  ;;  %v6699_v59 = vpop.f32.mrb[37].mxu0 }
0x2dc3   :  { %v2519_v8 = vmul.f32 %v2518_v11, %v8076_v23 }
0x2dc5   :  { %7520 = vtanh.f32 %v2519_v8 }
0x2dcf   :  { %v7521_v15 = vpop.eup %7520 }
0x2dd0   :  { %v2521_v62 = vmul.f32 %v7521_v15, %v8076_v23 }
0x2dd2   :  { %v2522_v16 = vadd.f32 %v2521_v62, %v8081_v30 }
0x2dd4   :  { %2525 = vrot.lane.b32.xlu0 %v2522_v16, %s7866_s7  ;;  %v2523_v18 = vmul.f32 %v2522_v16, %v2433_v56 }
0x2e46   :  { %v2526_v12 = vpop.permute.xlu0 %2525 }
0x2e47   :  { %v2528_v48 = vmul.f32 %v2526_v12, %v2522_v16  ;;  %v3047_v12 = vld [vmem:[#allocation9 + $0x48] sm:$0xff] }
0x2e49   :  { %2530 = vrot.lane.b32.xlu1 %v2528_v48, %s7867_s18 }
0x2ebb   :  { %v2531_v14 = vpop.permute.xlu1 %2530 }
0x2ebc   :  { %v2533_v39 = vadd.f32 %v2531_v14, %v2523_v18 }
0x2ebe   :  { %7522 = vtanh.f32 %v2533_v39 }
0x2ec8   :  { %v7523_v61 = vpop.eup %7522 }
0x2ec9   :  { %2536 = vrot.lane.b32.xlu0 %v7523_v61, %s7866_s7  ;;  %v3048_v61 = vld [vmem:[#allocation9 + $0x50] sm:$0xff] }
0x2f3b   :  { %v2537_v19 = vpop.permute.xlu0 %2536 }
0x2f3c   :  { %v2539_v5 = vmul.f32 %v2537_v19, %v2522_v16  ;;  %v3046_v16 = vld [vmem:[#allocation9 + $0x40] sm:$0xff]  ;;  %v3049_v19 = vld [vmem:[#allocation9 + $0x58] sm:$0xff] }
0x2f3d   :  { %v7254_v48 = vpack.c.bf16 %v3047_v12, %v3046_v16 }
0x2f3e   :  { %2541 = vrot.lane.b32.xlu1 %v2539_v5, %s7867_s18  ;;  %v7258_v5 = vpack.c.bf16 %v3049_v19, %v3048_v61 }
0x2fb0   :  { %v2542_v20 = vpop.permute.xlu1 %2541 }
0x2fb1   :  { %2544 = vst.msk [vmem:[#allocation3 + $0x10] sm:$0xff] %vm301_vm4, %v2542_v20  ;;  %6709 = vmatmul.mubr.msk.f32.vlgmr.msra.gmra.mrb[24].mxu1 %vm301_vm4, %v2542_v20 }
0x2fb2   :  { %7238 = vmatpush3.bf16.msra.mxu1 %v8383_v43  ;;  %6730 = vmatprep.mubr.msk.f32.mxu1 %vm7863_vm0, %v7864_v1 }
0x2fb3   :  { %7239 = vmatprep.subr.bf16.mxu1 %v7862_v0 }
0x2fb6   :  { %7241 = vmatpush3.bf16.msra.mxu1 %v8387_v57 }
0x2fb7   :  { %7248 = vmatprep.subr.bf16.mxu1 %v7862_v0 }
0x3084   :  { %v2614_v46 = vpop.f32.mrb[24].mxu1 }
0x3085   :  { %v2618_v7 = vadd.f32 %v2614_v46, %v2216_v17  ;;  %v6710_v21 = vpop.f32.mrb[25].mxu1  ;;  %v3057_v17 = vld [vmem:[#allocation3] sm:$0xff]  ;;  %v3058_v46 = vld [vmem:[#allocation3 + $0x8] sm:$0xff] }
0x3087   :  { %v2619_v22 = vmul.f32 %v2618_v7, %v8076_v23  ;;  %v3059_v7 = vld [vmem:[#allocation3 + $0x10] sm:$0xff] }
0x3089   :  { %7524 = vtanh.f32 %v2619_v22 }
0x3093   :  { %v7525_v24 = vpop.eup %7524 }
0x3094   :  { %v2621_v25 = vmul.f32 %v7525_v24, %v8076_v23 }
0x3096   :  { %v2622_v26 = vadd.f32 %v2621_v25, %v8081_v30  ;;  %v2231_v25 = vadd.f32 %v8410_v13, %v8449_v58 }
0x3098   :  { %2625 = vrot.lane.b32.xlu0 %v2622_v26, %s7866_s7  ;;  %v2623_v29 = vmul.f32 %v2622_v26, %v2533_v39 }
0x310a   :  { %v2626_v27 = vpop.permute.xlu0 %2625 }
0x310b   :  { %v2628_v28 = vmul.f32 %v2626_v27, %v2622_v26 }
0x310d   :  { %2630 = vrot.lane.b32.xlu1 %v2628_v28, %s7867_s18 }
0x317f   :  { %v2631_v31 = vpop.permute.xlu1 %2630 }
0x3180   :  { %v2633_v38 = vadd.f32 %v2631_v31, %v2623_v29 }
0x3182   :  { %7526 = vtanh.f32 %v2633_v38 }
0x318c   :  { %v7527_v32 = vpop.eup %7526 }
0x318d   :  { %2636 = vrot.lane.b32.xlu0 %v7527_v32, %s7866_s7 }
0x31ff   :  { %v2637_v33 = vpop.permute.xlu0 %2636 }
0x3200   :  { %v2639_v34 = vmul.f32 %v2637_v33, %v2622_v26 }
0x3202   :  { %2641 = vrot.lane.b32.xlu1 %v2639_v34, %s7867_s18 }
0x3274   :  { %v2642_v35 = vpop.permute.xlu1 %2641 }
0x3275   :  { %2644 = vst.msk [vmem:[#allocation3 + $0x18] sm:$0xff] %vm301_vm4, %v2642_v35  ;;  %6720 = vmatmul.mubr.msk.f32.vlgmr.msra.gmra.mrb[38].mxu0 %vm301_vm4, %v2642_v35 }
0x3276   :  { %7244 = vmatpush3.bf16.msra.mxu0 %v8383_v43  ;;  %6741 = vmatprep.mubr.msk.f32.mxu0 %vm7863_vm0, %v7864_v1 }
0x3277   :  { %7245 = vmatprep.subr.bf16.mxu0 %v7862_v0 }
0x327a   :  { %7247 = vmatpush3.bf16.msra.mxu0 %v8387_v57 }
0x327b   :  { %7255 = vmatprep.subr.bf16.mxu0 %v7254_v48 }
0x327c   :  { %v3060_v21 = vld [vmem:[#allocation3 + $0x18] sm:$0xff] }
0x3348   :  { %v2714_v45 = vpop.f32.mrb[38].mxu0 }
0x3349   :  { %v2718_v40 = vadd.f32 %v2714_v45, %v2221_v36  ;;  %v6721_v42 = vpop.f32.mrb[39].mxu0 }
0x334b   :  { %v2719_v63 = vmul.f32 %v2718_v40, %v8076_v23 }
0x334d   :  { %7528 = vtanh.f32 %v2719_v63 }
0x3357   :  { %v7529_v47 = vpop.eup %7528 }
0x3358   :  { %v2721_v49 = vmul.f32 %v7529_v47, %v8076_v23 }
0x335a   :  { %v2722_v9 = vadd.f32 %v2721_v49, %v8081_v30 }
0x335c   :  { %2725 = vrot.lane.b32.xlu0 %v2722_v9, %s7866_s7  ;;  %v2723_v37 = vmul.f32 %v2722_v9, %v2633_v38 }
0x33ce   :  { %v2726_v51 = vpop.permute.xlu0 %2725 }
0x33cf   :  { %v2728_v52 = vmul.f32 %v2726_v51, %v2722_v9  ;;  %v3051_v51 = vld [vmem:[#allocation10 + $0x60] sm:$0xff] }
0x33d1   :  { %2730 = vrot.lane.b32.xlu1 %v2728_v52, %s7867_s18  ;;  %v3052_v52 = vld [vmem:[#allocation10 + $0x68] sm:$0xff] }
0x3443   :  { %v2731_v53 = vpop.permute.xlu1 %2730 }
0x3444   :  { %v2733_v44 = vadd.f32 %v2731_v53, %v2723_v37  ;;  %v8550_v37 = vpack.c.bf16 %v3052_v52, %v3051_v51  ;;  %v3053_v53 = vld [vmem:[#allocation10 + $0x70] sm:$0xff] }
0x3446   :  { %7530 = vtanh.f32 %v2733_v44 }
0x3450   :  { %v7531_v54 = vpop.eup %7530 }
0x3451   :  { %2736 = vrot.lane.b32.xlu0 %v7531_v54, %s7866_s7 }
0x34c3   :  { %v2737_v55 = vpop.permute.xlu0 %2736 }
0x34c4   :  { %v2739_v56 = vmul.f32 %v2737_v55, %v2722_v9 }
0x34c6   :  { %2741 = vrot.lane.b32.xlu1 %v2739_v56, %s7867_s18 }
0x3538   :  { %v2742_v60 = vpop.permute.xlu1 %2741 }
0x3539   :  { %2744 = vst.msk [vmem:[#allocation3 + $0x20] sm:$0xff] %vm301_vm4, %v2742_v60  ;;  %6731 = vmatmul.mubr.msk.f32.vlgmr.msra.gmra.mrb[26].mxu1 %vm301_vm4, %v2742_v60 }
0x353a   :  { %7250 = vmatpush3.bf16.msra.mxu1 %v8383_v43  ;;  %6752 = vmatprep.mubr.msk.f32.mxu1 %vm7863_vm0, %v7864_v1 }
0x353b   :  { %7251 = vmatprep.subr.bf16.mxu1 %v7862_v0 }
0x353e   :  { %7253 = vmatpush3.bf16.msra.mxu1 %v8387_v57 }
0x353f   :  { %7262 = vmatprep.subr.bf16.mxu1 %v7862_v0 }
0x3540   :  { %v3061_v22 = vld [vmem:[#allocation3 + $0x20] sm:$0xff] }
0x360c   :  { %v2814_v3 = vpop.f32.mrb[26].mxu1 }
0x360d   :  { %v2818_v4 = vadd.f32 %v2814_v3, %v2226_v2  ;;  %v6732_v6 = vpop.f32.mrb[27].mxu1  ;;  %v2236_v3 = vadd.f32 %v8447_v50, %v8410_v13 }
0x360f   :  { %v2819_v10 = vmul.f32 %v2818_v4, %v8076_v23 }
0x3611   :  { %7532 = vtanh.f32 %v2819_v10 }
0x361b   :  { %v7533_v11 = vpop.eup %7532 }
0x361c   :  { %v2821_v43 = vmul.f32 %v7533_v11, %v8076_v23  ;;  %v8577_v11 = vld [vmem:[#allocation12 + $0x3] ss:$0 sm:$0xff] }
0x361e   :  { %v2822_v59 = vadd.f32 %v2821_v43, %v8081_v30 }
0x3620   :  { %2825 = vrot.lane.b32.xlu0 %v2822_v59, %s7866_s7  ;;  %v2823_v15 = vmul.f32 %v2822_v59, %v2733_v44  ;;  %v3054_v44 = vld [vmem:[#allocation10 + $0x78] sm:$0xff] }
0x3621   :  { %v8554_v54 = vpack.c.bf16 %v3054_v44, %v3053_v53 }
0x3692   :  { %v2826_v8 = vpop.permute.xlu0 %2825 }
0x3693   :  { %v2828_v57 = vmul.f32 %v2826_v8, %v2822_v59 }
0x3695   :  { %2830 = vrot.lane.b32.xlu1 %v2828_v57, %s7867_s18 }
0x3707   :  { %v2831_v62 = vpop.permute.xlu1 %2830 }
0x3708   :  { %v2833_v41 = vadd.f32 %v2831_v62, %v2823_v15 }
0x370a   :  { %7534 = vtanh.f32 %v2833_v41 }
0x3714   :  { %v7535_v18 = vpop.eup %7534 }
0x3715   :  { %2836 = vrot.lane.b32.xlu0 %v7535_v18, %s7866_s7 }
0x3787   :  { %v2837_v14 = vpop.permute.xlu0 %2836 }
0x3788   :  { %v2839_v39 = vmul.f32 %v2837_v14, %v2822_v59 }
0x378a   :  { %2841 = vrot.lane.b32.xlu1 %v2839_v39, %s7867_s18 }
0x37fc   :  { %v2842_v20 = vpop.permute.xlu1 %2841 }
0x37fd   :  { %2844 = vst.msk [vmem:[#allocation3 + $0x28] sm:$0xff] %vm301_vm4, %v2842_v20  ;;  %6742 = vmatmul.mubr.msk.f32.vlgmr.msra.gmra.mrb[40].mxu0 %vm301_vm4, %v2842_v20 }
0x37fe   :  { %7257 = vmatpush3.bf16.msra.mxu0 %v7254_v48  ;;  %6763 = vmatprep.mubr.msk.f32.mxu0 %vm301_vm4, %v3057_v17 }
0x37ff   :  { %7259 = vmatprep.subr.bf16.mxu0 %v7258_v5 }
0x3802   :  { %7261 = vmatpush3.bf16.msra.mxu0 %v7258_v5 }
0x3803   :  { %7274 = vmatprep.subr.bf16.mxu0 %v7862_v0 }
0x3804   :  { %v3062_v24 = vld [vmem:[#allocation3 + $0x28] sm:$0xff] }
0x3805   :  { %6764 = vmatmul.mubr.msk.f32.vlgmr.msra.gmra.mrb[42].mxu0 %vm301_vm4, %v3058_v46 }
0x3806   :  { %6766 = vmatprep.mubr.msk.f32.mxu0 %vm301_vm4, %v3059_v7  ;;  %7276 = vmatpush3.bf16.msra.mxu0 %v8550_v37 }
0x3807   :  { %7277 = vmatprep.subr.bf16.mxu0 %v7862_v0 }
0x3809   :  { %6767 = vmatmul.mubr.msk.f32.gmra.mrb[44].mxu0 %vm301_vm4, %v3060_v21 }
0x380a   :  { %6769 = vmatprep.mubr.msk.f32.mxu0 %vm301_vm4, %v3061_v22  ;;  %7279 = vmatpush3.bf16.msra.mxu0 %v8554_v54 }
0x380b   :  { %7286 = vmatprep.subr.bf16.mxu0 %v7862_v0 }
0x380d   :  { %6770 = vmatmul.mubr.msk.f32.gmra.mrb[46].mxu0 %vm301_vm4, %v3062_v24 }
0x38d0   :  { %v2914_v26 = vpop.f32.mrb[40].mxu0 }
0x38d1   :  { %v2918_v27 = vadd.f32 %v2914_v26, %v2231_v25  ;;  %v6743_v28 = vpop.f32.mrb[41].mxu0 }
0x38d3   :  { %v2919_v29 = vmul.f32 %v2918_v27, %v8076_v23 }
0x38d5   :  { %7536 = vtanh.f32 %v2919_v29 }
0x38d8   :  { %v8532_v31 = vpop.f32.mrb[42].mxu0 }
0x38d9   :  { %v3161_v38 = vpop.f32.mrb[43].mxu0  ;;  %v3167_v29 = vadd.f32 %v8532_v31, %v8577_v11 }
0x38da   :  { %v3162_v43 = vadd.f32 %v8577_v11, %v3161_v38 }
0x38dc   :  { %v8534_v32 = vpop.f32.mrb[44].mxu0 }
0x38dd   :  { %v8536_v33 = vpop.f32.mrb[45].mxu0 }
0x38df   :  { %v7537_v34 = vpop.eup %7536 }
0x38e0   :  { %v8538_v35 = vpop.f32.mrb[46].mxu0  ;;  %v2921_v36 = vmul.f32 %v7537_v34, %v8076_v23 }
0x38e1   :  { %v8541_v45 = vpop.f32.mrb[47].mxu0 }
0x38e2   :  { %v2922_v58 = vadd.f32 %v2921_v36, %v8081_v30 }
0x38e4   :  { %2925 = vrot.lane.b32.xlu0 %v2922_v58, %s7866_s7  ;;  %v2923_v63 = vmul.f32 %v2922_v58, %v2833_v41 }
0x3956   :  { %v2926_v40 = vpop.permute.xlu0 %2925 }
0x3957   :  { %v2928_v42 = vmul.f32 %v2926_v40, %v2922_v58 }
0x3959   :  { %2930 = vrot.lane.b32.xlu1 %v2928_v42, %s7867_s18 }
0x39cb   :  { %v2931_v47 = vpop.permute.xlu1 %2930 }
0x39cc   :  { %v8546_v49 = vadd.f32 %v2931_v47, %v2923_v63 }
0x39ce   :  { %7538 = vtanh.f32 %v8546_v49 }
0x39d8   :  { %v7539_v9 = vpop.eup %7538 }
0x39d9   :  { %2936 = vrot.lane.b32.xlu0 %v7539_v9, %s7866_s7 }
0x3a4b   :  { %v2937_v55 = vpop.permute.xlu0 %2936 }
0x3a4c   :  { %v2939_v56 = vmul.f32 %v2937_v55, %v2922_v58 }
0x3a4e   :  { %2941 = vrot.lane.b32.xlu1 %v2939_v56, %s7867_s18 }
0x3ac0   :  { %v2942_v60 = vpop.permute.xlu1 %2941 }
0x3ac1   :  { %2944 = vst.msk [vmem:[#allocation3 + $0x30] sm:$0xff] %vm301_vm4, %v2942_v60  ;;  %6753 = vmatmul.mubr.msk.f32.vlgmr.msra.gmra.mrb[28].mxu1 %vm301_vm4, %v2942_v60 }
0x3ac2   :  { %7264 = vmatpush3.bf16.msra.mxu1 %v8550_v37  ;;  %6783 = vmatprep.mubr.msk.f32.mxu1 %vm7863_vm0, %v7864_v1 }
0x3ac3   :  { %7265 = vmatprep.subr.bf16.mxu1 %v7862_v0 }
0x3ac6   :  { %7267 = vmatpush3.bf16.msra.mxu1 %v8554_v54 }
0x3ac7   :  { %7268 = vmatprep.subr.bf16.mxu1 %v7862_v0 }
0x3ac8   :  { %v3063_v2 = vld [vmem:[#allocation3 + $0x30] sm:$0xff] }
0x3ac9   :  { %6784 = vmatmul.mubr.f32.vlgmr.msra.gmra.mrb[30].mxu1 %v7864_v1  ;;  %6772 = vmatprep.mubr.msk.f32.mxu0 %vm301_vm4, %v3063_v2 }
0x3aca   :  { %7270 = vmatpush3.bf16.msra.mxu1 %v8550_v37  ;;  %6794 = vmatprep.mubr.msk.f32.mxu1 %vm7863_vm0, %v7864_v1 }
0x3acb   :  { %7271 = vmatprep.subr.bf16.mxu1 %v7862_v0 }
0x3ace   :  { %7273 = vmatpush3.bf16.msra.mxu1 %v8554_v54 }
0x3acf   :  { %7280 = vmatprep.subr.bf16.mxu1 %v7862_v0 }
0x3b94   :  { %v3014_v4 = vpop.f32.mrb[28].mxu1 }
0x3b95   :  { %v3018_v6 = vadd.f32 %v3014_v4, %v2236_v3  ;;  %v6754_v10 = vpop.f32.mrb[29].mxu1  ;;  %v3172_v4 = vadd.f32 %v8577_v11, %v8536_v33 }
0x3b97   :  { %v3019_v12 = vmul.f32 %v3018_v6, %v8076_v23 }
0x3b9c   :  { %v3275_v59 = vpop.f32.mrb[30].mxu1 }
0x3b9d   :  { %v3279_v8 = vadd.f32 %v3275_v59, %v3162_v43  ;;  %v6785_v57 = vpop.f32.mrb[31].mxu1 }
0x3b9f   :  { %v3280_v15 = vmul.f32 %v3279_v8, %v8076_v23 }
0x3ba1   :  { %7540 = vtanh.f32 %v3280_v15 }
0x3ba2   :  { %7542 = vtanh.f32 %v3019_v12 }
0x3bab   :  { %v7541_v62 = vpop.eup %7540 }
0x3bac   :  { %v3282_v41 = vmul.f32 %v7541_v62, %v8076_v23  ;;  %v7543_v39 = vpop.eup %7542 }
0x3bad   :  { %v3021_v61 = vmul.f32 %v7543_v39, %v8076_v23 }
0x3bae   :  { %v3283_v16 = vadd.f32 %v3282_v41, %v8081_v30 }
0x3baf   :  { %v3022_v5 = vadd.f32 %v3021_v61, %v8081_v30 }
0x3bb0   :  { %3286 = vrot.lane.b32.xlu0 %v3283_v16, %s7866_s7  ;;  %v3284_v48 = vmul.f32 0.0, %v3283_v16 }
0x3bb1   :  { %v3023_v22 = vmul.f32 %v3022_v5, %v8546_v49 }
0x3c22   :  { %v3287_v13 = vpop.permute.xlu0 %3286 }
0x3c23   :  { %v3289_v50 = vmul.f32 %v3287_v13, %v3283_v16 }
0x3c25   :  { %3291 = vrot.lane.b32.xlu1 %v3289_v50, %s7867_s18 }
0x3c97   :  { %v3292_v18 = vpop.permute.xlu1 %3291 }
0x3c98   :  { %v3294_v14 = vadd.f32 %v3292_v18, %v3284_v48 }
0x3c9a   :  { %7544 = vtanh.f32 %v3294_v14 }
0x3ca4   :  { %v7545_v19 = vpop.eup %7544 }
0x3ca5   :  { %3297 = vrot.lane.b32.xlu0 %v7545_v19, %s7866_s7 }
0x3ca9   :  { %3025 = vrot.lane.b32.xlu0 %v3022_v5, %s7866_s7 }
0x3d17   :  { %v3298_v20 = vpop.permute.xlu0 %3297 }
0x3d18   :  { %v3300_v17 = vmul.f32 %v3298_v20, %v3283_v16 }
0x3d1a   :  { %3302 = vrot.lane.b32.xlu1 %v3300_v17, %s7867_s18 }
0x3d1b   :  { %v3026_v46 = vpop.permute.xlu0 %3025 }
0x3d1c   :  { %v3028_v7 = vmul.f32 %v3026_v46, %v3022_v5 }
0x3d1e   :  { %3030 = vrot.lane.b32.xlu0 %v3028_v7, %s7867_s18 }
0x3d8c   :  { %v3303_v21 = vpop.permute.xlu1 %3302 }
0x3d8d   :  { %3305 = vst.msk [vmem:[#allocation3] sm:$0xff] %vm301_vm4, %v3303_v21  ;;  %6795 = vmatmul.mubr.msk.f32.vlgmr.msra.gmra.mrb[32].mxu1 %vm301_vm4, %v3303_v21 }
0x3d8e   :  { %7282 = vmatpush3.bf16.msra.mxu1 %v8550_v37  ;;  %6816 = vmatprep.mubr.msk.f32.mxu1 %vm7863_vm0, %v7864_v1 }
0x3d8f   :  { %7283 = vmatprep.subr.bf16.mxu1 %v7862_v0 }
0x3d90   :  { %v3031_v24 = vpop.permute.xlu0 %3030 }
0x3d91   :  { %v3033_v25 = vadd.f32 %v3031_v24, %v3023_v22 }
0x3d92   :  { %7285 = vmatpush3.bf16.msra.mxu1 %v8554_v54 }
0x3d93   :  { %7546 = vtanh.f32 %v3033_v25  ;;  %7292 = vmatprep.subr.bf16.mxu1 %v7862_v0 }
0x3d9d   :  { %v7547_v26 = vpop.eup %7546 }
0x3d9e   :  { %3036 = vrot.lane.b32.xlu0 %v7547_v26, %s7866_s7 }
0x3e10   :  { %v3037_v27 = vpop.permute.xlu0 %3036 }
0x3e11   :  { %v3039_v28 = vmul.f32 %v3037_v27, %v3022_v5 }
0x3e13   :  { %3041 = vrot.lane.b32.xlu0 %v3039_v28, %s7867_s18 }
0x3e60   :  { %v3375_v38 = vpop.f32.mrb[32].mxu1 }
0x3e61   :  { %v3379_v34 = vadd.f32 %v3375_v38, %v3167_v29  ;;  %v6796_v36 = vpop.f32.mrb[33].mxu1  ;;  %v3182_v29 = vadd.f32 %v8577_v11, %v8541_v45 }
0x3e63   :  { %v3380_v58 = vmul.f32 %v3379_v34, %v8076_v23 }
0x3e65   :  { %7548 = vtanh.f32 %v3380_v58 }
0x3e6f   :  { %v7549_v40 = vpop.eup %7548 }
0x3e70   :  { %v3382_v42 = vmul.f32 %v7549_v40, %v8076_v23 }
0x3e72   :  { %v3383_v63 = vadd.f32 %v3382_v42, %v8081_v30 }
0x3e74   :  { %3386 = vrot.lane.b32.xlu1 %v3383_v63, %s7866_s7  ;;  %v3384_v51 = vmul.f32 %v3383_v63, %v3294_v14  ;;  %v3177_v14 = vadd.f32 %v8534_v32, %v8577_v11 }
0x3e85   :  { %v3042_v47 = vpop.permute.xlu0 %3041 }
0x3e86   :  { %3044 = vst.msk [vmem:[#allocation3 + $0x38] sm:$0xff] %vm301_vm4, %v3042_v47 }
0x3e8d   :  { %v3064_v49 = vld [vmem:[#allocation3 + $0x38] sm:$0xff] }
0x3e8e   :  { %6773 = vmatmul.mubr.msk.f32.gmra.mrb[48].mxu0 %vm301_vm4, %v3064_v49 }
0x3e8f   :  { %6805 = vmatprep.mubr.msk.f32.mxu0 %vm7863_vm0, %v7864_v1 }
0x3ee6   :  { %v3387_v31 = vpop.permute.xlu1 %3386 }
0x3ee7   :  { %v3389_v9 = vmul.f32 %v3387_v31, %v3383_v63 }
0x3ee9   :  { %3391 = vrot.lane.b32.xlu1 %v3389_v9, %s7867_s18 }
0x3f5b   :  { %v3392_v52 = vpop.permute.xlu1 %3391 }
0x3f5c   :  { %v3394_v53 = vadd.f32 %v3392_v52, %v3384_v51 }
0x3f5e   :  { %7550 = vtanh.f32 %v3394_v53 }
0x3f61   :  { %v8614_v44 = vpop.f32.mrb[48].mxu0 }
0x3f62   :  { %v8616_v55 = vpop.f32.mrb[49].mxu0 }
0x3f68   :  { %v7551_v56 = vpop.eup %7550 }
0x3f69   :  { %3397 = vrot.lane.b32.xlu1 %v7551_v56, %s7866_s7 }
0x3fdb   :  { %v3398_v60 = vpop.permute.xlu1 %3397 }
0x3fdc   :  { %v3400_v2 = vmul.f32 %v3398_v60, %v3383_v63  ;;  %v3187_v60 = vadd.f32 %v8538_v35, %v8577_v11 }
0x3fde   :  { %3402 = vrot.lane.b32.xlu1 %v3400_v2, %s7867_s18 }
0x4050   :  { %v3403_v3 = vpop.permute.xlu1 %3402 }
0x4051   :  { %3405 = vst.msk [vmem:[#allocation3 + $0x8] sm:$0xff] %vm301_vm4, %v3403_v3  ;;  %6806 = vmatmul.mubr.msk.f32.vlgmr.msra.gmra.mrb[50].mxu0 %vm301_vm4, %v3403_v3 }
0x4052   :  { %7288 = vmatpush3.bf16.msra.mxu0 %v8550_v37  ;;  %6827 = vmatprep.mubr.msk.f32.mxu0 %vm7863_vm0, %v7864_v1 }
0x4053   :  { %7289 = vmatprep.subr.bf16.mxu0 %v7862_v0 }
0x4056   :  { %7291 = vmatpush3.bf16.msra.mxu0 %v8554_v54 }
0x4057   :  { %7298 = vmatprep.subr.bf16.mxu0 %v7862_v0 }
0x4124   :  { %v3475_v6 = vpop.f32.mrb[50].mxu0 }
0x4125   :  { %v3479_v10 = vadd.f32 %v3475_v6, %v3172_v4  ;;  %v6807_v43 = vpop.f32.mrb[51].mxu0 }
0x4127   :  { %v3480_v59 = vmul.f32 %v3479_v10, %v8076_v23 }
0x4129   :  { %7552 = vtanh.f32 %v3480_v59 }
0x4133   :  { %v7553_v8 = vpop.eup %7552 }
0x4134   :  { %v3482_v57 = vmul.f32 %v7553_v8, %v8076_v23 }
0x4136   :  { %v3483_v15 = vadd.f32 %v3482_v57, %v8081_v30 }
0x4138   :  { %3486 = vrot.lane.b32.xlu0 %v3483_v15, %s7866_s7  ;;  %v3484_v16 = vmul.f32 %v3483_v15, %v3394_v53 }
0x41aa   :  { %v3487_v62 = vpop.permute.xlu0 %3486 }
0x41ab   :  { %v3489_v41 = vmul.f32 %v3487_v62, %v3483_v15  ;;  %v4008_v62 = vld [vmem:[#allocation9 + $0x68] sm:$0xff] }
0x41ad   :  { %3491 = vrot.lane.b32.xlu1 %v3489_v41, %s7867_s18 }
0x421f   :  { %v3492_v13 = vpop.permute.xlu1 %3491 }
0x4220   :  { %v3494_v33 = vadd.f32 %v3492_v13, %v3484_v16 }
0x4222   :  { %7554 = vtanh.f32 %v3494_v33 }
0x422c   :  { %v7555_v50 = vpop.eup %7554 }
0x422d   :  { %3497 = vrot.lane.b32.xlu0 %v7555_v50, %s7866_s7  ;;  %v4009_v50 = vld [vmem:[#allocation9 + $0x70] sm:$0xff] }
0x429f   :  { %v3498_v12 = vpop.permute.xlu0 %3497 }
0x42a0   :  { %v3500_v48 = vmul.f32 %v3498_v12, %v3483_v15  ;;  %v4007_v15 = vld [vmem:[#allocation9 + $0x60] sm:$0xff]  ;;  %v4010_v12 = vld [vmem:[#allocation9 + $0x78] sm:$0xff] }
0x42a1   :  { %v7310_v41 = vpack.c.bf16 %v4008_v62, %v4007_v15 }
0x42a2   :  { %3502 = vrot.lane.b32.xlu1 %v3500_v48, %s7867_s18  ;;  %v7314_v48 = vpack.c.bf16 %v4010_v12, %v4009_v50 }
0x4314   :  { %v3503_v18 = vpop.permute.xlu1 %3502 }
0x4315   :  { %3505 = vst.msk [vmem:[#allocation3 + $0x10] sm:$0xff] %vm301_vm4, %v3503_v18  ;;  %6817 = vmatmul.mubr.msk.f32.vlgmr.msra.gmra.mrb[34].mxu1 %vm301_vm4, %v3503_v18 }
0x4316   :  { %7294 = vmatpush3.bf16.msra.mxu1 %v8550_v37  ;;  %6838 = vmatprep.mubr.msk.f32.mxu1 %vm7863_vm0, %v7864_v1 }
0x4317   :  { %7295 = vmatprep.subr.bf16.mxu1 %v7862_v0 }
0x431a   :  { %7297 = vmatpush3.bf16.msra.mxu1 %v8554_v54 }
0x431b   :  { %7304 = vmatprep.subr.bf16.mxu1 %v7862_v0 }
0x43e8   :  { %v3575_v39 = vpop.f32.mrb[34].mxu1 }
0x43e9   :  { %v3579_v61 = vadd.f32 %v3575_v39, %v3177_v14  ;;  %v6818_v19 = vpop.f32.mrb[35].mxu1  ;;  %v4018_v14 = vld [vmem:[#allocation3] sm:$0xff]  ;;  %v4019_v39 = vld [vmem:[#allocation3 + $0x8] sm:$0xff] }
0x43eb   :  { %v3580_v5 = vmul.f32 %v3579_v61, %v8076_v23  ;;  %v4020_v61 = vld [vmem:[#allocation3 + $0x10] sm:$0xff] }
0x43ed   :  { %7556 = vtanh.f32 %v3580_v5 }
0x43f7   :  { %v7557_v20 = vpop.eup %7556 }
0x43f8   :  { %v3582_v17 = vmul.f32 %v7557_v20, %v8076_v23 }
0x43fa   :  { %v3583_v46 = vadd.f32 %v3582_v17, %v8081_v30  ;;  %v3192_v17 = vadd.f32 %v8577_v11, %v8616_v55 }
0x43fc   :  { %3586 = vrot.lane.b32.xlu0 %v3583_v46, %s7866_s7  ;;  %v3584_v22 = vmul.f32 %v3583_v46, %v3494_v33 }
0x446e   :  { %v3587_v7 = vpop.permute.xlu0 %3586 }
0x446f   :  { %v3589_v21 = vmul.f32 %v3587_v7, %v3583_v46 }
0x4471   :  { %3591 = vrot.lane.b32.xlu1 %v3589_v21, %s7867_s18 }
0x44e3   :  { %v3592_v24 = vpop.permute.xlu1 %3591 }
0x44e4   :  { %v3594_v32 = vadd.f32 %v3592_v24, %v3584_v22 }
0x44e6   :  { %7558 = vtanh.f32 %v3594_v32 }
0x44f0   :  { %v7559_v25 = vpop.eup %7558 }
0x44f1   :  { %3597 = vrot.lane.b32.xlu0 %v7559_v25, %s7866_s7 }
0x4563   :  { %v3598_v26 = vpop.permute.xlu0 %3597 }
0x4564   :  { %v3600_v27 = vmul.f32 %v3598_v26, %v3583_v46 }
0x4566   :  { %3602 = vrot.lane.b32.xlu1 %v3600_v27, %s7867_s18 }
0x45d8   :  { %v3603_v28 = vpop.permute.xlu1 %3602 }
0x45d9   :  { %3605 = vst.msk [vmem:[#allocation3 + $0x18] sm:$0xff] %vm301_vm4, %v3603_v28  ;;  %6828 = vmatmul.mubr.msk.f32.vlgmr.msra.gmra.mrb[52].mxu0 %vm301_vm4, %v3603_v28 }
0x45da   :  { %7300 = vmatpush3.bf16.msra.mxu0 %v8550_v37  ;;  %6849 = vmatprep.mubr.msk.f32.mxu0 %vm7863_vm0, %v7864_v1 }
0x45db   :  { %7301 = vmatprep.subr.bf16.mxu0 %v7862_v0 }
0x45de   :  { %7303 = vmatpush3.bf16.msra.mxu0 %v8554_v54 }
0x45df   :  { %7311 = vmatprep.subr.bf16.mxu0 %v7310_v41 }
0x45e0   :  { %v4021_v19 = vld [vmem:[#allocation3 + $0x18] sm:$0xff] }
0x46ac   :  { %v3675_v38 = vpop.f32.mrb[52].mxu0 }
0x46ad   :  { %v3679_v34 = vadd.f32 %v3675_v38, %v3182_v29  ;;  %v6829_v36 = vpop.f32.mrb[53].mxu0 }
0x46af   :  { %v3680_v58 = vmul.f32 %v3679_v34, %v8076_v23 }
0x46b1   :  { %7560 = vtanh.f32 %v3680_v58 }
0x46bb   :  { %v7561_v40 = vpop.eup %7560 }
0x46bc   :  { %v3682_v42 = vmul.f32 %v7561_v40, %v8076_v23 }
0x46be   :  { %v3683_v63 = vadd.f32 %v3682_v42, %v8081_v30 }
0x46c0   :  { %3686 = vrot.lane.b32.xlu0 %v3683_v63, %s7866_s7  ;;  %v3684_v31 = vmul.f32 %v3683_v63, %v3594_v32 }
0x4732   :  { %v3687_v47 = vpop.permute.xlu0 %3686 }
0x4733   :  { %v3689_v49 = vmul.f32 %v3687_v47, %v3683_v63  ;;  %v4012_v47 = vld [vmem:[#allocation10 + $0x80] sm:$0xff] }
0x4735   :  { %3691 = vrot.lane.b32.xlu1 %v3689_v49, %s7867_s18  ;;  %v4013_v49 = vld [vmem:[#allocation10 + $0x88] sm:$0xff] }
0x47a7   :  { %v3692_v9 = vpop.permute.xlu1 %3691 }
0x47a8   :  { %v3694_v45 = vadd.f32 %v3692_v9, %v3684_v31  ;;  %v8717_v31 = vpack.c.bf16 %v4013_v49, %v4012_v47  ;;  %v4014_v9 = vld [vmem:[#allocation10 + $0x90] sm:$0xff] }
0x47aa   :  { %7562 = vtanh.f32 %v3694_v45 }
0x47b4   :  { %v7563_v51 = vpop.eup %7562 }
0x47b5   :  { %3697 = vrot.lane.b32.xlu0 %v7563_v51, %s7866_s7 }
0x4827   :  { %v3698_v52 = vpop.permute.xlu0 %3697 }
0x4828   :  { %v3700_v53 = vmul.f32 %v3698_v52, %v3683_v63 }
0x482a   :  { %3702 = vrot.lane.b32.xlu1 %v3700_v53, %s7867_s18 }
0x489c   :  { %v3703_v56 = vpop.permute.xlu1 %3702 }
0x489d   :  { %3705 = vst.msk [vmem:[#allocation3 + $0x20] sm:$0xff] %vm301_vm4, %v3703_v56  ;;  %6839 = vmatmul.mubr.msk.f32.vlgmr.msra.gmra.mrb[36].mxu1 %vm301_vm4, %v3703_v56 }
0x489e   :  { %7306 = vmatpush3.bf16.msra.mxu1 %v8550_v37  ;;  %6860 = vmatprep.mubr.msk.f32.mxu1 %vm7863_vm0, %v7864_v1 }
0x489f   :  { %7307 = vmatprep.subr.bf16.mxu1 %v7862_v0 }
0x48a2   :  { %7309 = vmatpush3.bf16.msra.mxu1 %v8554_v54 }
0x48a3   :  { %7318 = vmatprep.subr.bf16.mxu1 %v7862_v0 }
0x48a4   :  { %v4022_v5 = vld [vmem:[#allocation3 + $0x20] sm:$0xff] }
0x4970   :  { %v3775_v2 = vpop.f32.mrb[36].mxu1 }
0x4971   :  { %v3779_v3 = vadd.f32 %v3775_v2, %v3187_v60  ;;  %v6840_v4 = vpop.f32.mrb[37].mxu1  ;;  %v3197_v2 = vadd.f32 %v8614_v44, %v8577_v11 }
0x4973   :  { %v3780_v6 = vmul.f32 %v3779_v3, %v8076_v23 }
0x4975   :  { %7564 = vtanh.f32 %v3780_v6 }
0x497f   :  { %v7565_v10 = vpop.eup %7564 }
0x4980   :  { %v3782_v37 = vmul.f32 %v7565_v10, %v8076_v23  ;;  %v8744_v10 = vld [vmem:[#allocation12 + $0x4] ss:$0 sm:$0xff] }
0x4982   :  { %v3783_v43 = vadd.f32 %v3782_v37, %v8081_v30 }
0x4984   :  { %3786 = vrot.lane.b32.xlu0 %v3783_v43, %s7866_s7  ;;  %v3784_v8 = vmul.f32 %v3783_v43, %v3694_v45  ;;  %v4015_v45 = vld [vmem:[#allocation10 + $0x98] sm:$0xff] }
0x4985   :  { %v8721_v51 = vpack.c.bf16 %v4015_v45, %v4014_v9 }
0x49f6   :  { %v3787_v59 = vpop.permute.xlu0 %3786 }
0x49f7   :  { %v3789_v54 = vmul.f32 %v3787_v59, %v3783_v43 }
0x49f9   :  { %3791 = vrot.lane.b32.xlu1 %v3789_v54, %s7867_s18 }
0x4a6b   :  { %v3792_v57 = vpop.permute.xlu1 %3791 }
0x4a6c   :  { %v3794_v35 = vadd.f32 %v3792_v57, %v3784_v8 }
0x4a6e   :  { %7566 = vtanh.f32 %v3794_v35 }
0x4a78   :  { %v7567_v16 = vpop.eup %7566 }
0x4a79   :  { %3797 = vrot.lane.b32.xlu0 %v7567_v16, %s7866_s7 }
0x4aeb   :  { %v3798_v13 = vpop.permute.xlu0 %3797 }
0x4aec   :  { %v3800_v33 = vmul.f32 %v3798_v13, %v3783_v43 }
0x4aee   :  { %3802 = vrot.lane.b32.xlu1 %v3800_v33, %s7867_s18 }
0x4b60   :  { %v3803_v18 = vpop.permute.xlu1 %3802 }
0x4b61   :  { %3805 = vst.msk [vmem:[#allocation3 + $0x28] sm:$0xff] %vm301_vm4, %v3803_v18  ;;  %6850 = vmatmul.mubr.msk.f32.vlgmr.msra.gmra.mrb[54].mxu0 %vm301_vm4, %v3803_v18 }
0x4b62   :  { %7313 = vmatpush3.bf16.msra.mxu0 %v7310_v41  ;;  %6871 = vmatprep.mubr.msk.f32.mxu0 %vm301_vm4, %v4018_v14 }
0x4b63   :  { %7315 = vmatprep.subr.bf16.mxu0 %v7314_v48 }
0x4b66   :  { %7317 = vmatpush3.bf16.msra.mxu0 %v7314_v48 }
0x4b67   :  { %7330 = vmatprep.subr.bf16.mxu0 %v7862_v0 }
0x4b68   :  { %v4023_v20 = vld [vmem:[#allocation3 + $0x28] sm:$0xff] }
0x4b69   :  { %6872 = vmatmul.mubr.msk.f32.vlgmr.msra.gmra.mrb[56].mxu0 %vm301_vm4, %v4019_v39 }
0x4b6a   :  { %6874 = vmatprep.mubr.msk.f32.mxu0 %vm301_vm4, %v4020_v61  ;;  %7332 = vmatpush3.bf16.msra.mxu0 %v8717_v31 }
0x4b6b   :  { %7333 = vmatprep.subr.bf16.mxu0 %v7862_v0 }
0x4b6d   :  { %6875 = vmatmul.mubr.msk.f32.gmra.mrb[58].mxu0 %vm301_vm4, %v4021_v19 }
0x4b6e   :  { %6877 = vmatprep.mubr.msk.f32.mxu0 %vm301_vm4, %v4022_v5  ;;  %7335 = vmatpush3.bf16.msra.mxu0 %v8721_v51 }
0x4b6f   :  { %7342 = vmatprep.subr.bf16.mxu0 %v7862_v0 }
0x4b71   :  { %6878 = vmatmul.mubr.msk.f32.gmra.mrb[60].mxu0 %vm301_vm4, %v4023_v20 }
0x4c34   :  { %v3875_v46 = vpop.f32.mrb[54].mxu0 }
0x4c35   :  { %v3879_v7 = vadd.f32 %v3875_v46, %v3192_v17  ;;  %v6851_v21 = vpop.f32.mrb[55].mxu0 }
0x4c37   :  { %v3880_v22 = vmul.f32 %v3879_v7, %v8076_v23 }
0x4c39   :  { %7568 = vtanh.f32 %v3880_v22 }
0x4c3c   :  { %v8699_v24 = vpop.f32.mrb[56].mxu0 }
0x4c3d   :  { %v4122_v32 = vpop.f32.mrb[57].mxu0  ;;  %v4128_v22 = vadd.f32 %v8699_v24, %v8744_v10 }
0x4c3e   :  { %v4123_v37 = vadd.f32 %v8744_v10, %v4122_v32 }
0x4c40   :  { %v8701_v25 = vpop.f32.mrb[58].mxu0 }
0x4c41   :  { %v8703_v26 = vpop.f32.mrb[59].mxu0 }
0x4c43   :  { %v7569_v27 = vpop.eup %7568 }
0x4c44   :  { %v8705_v28 = vpop.f32.mrb[60].mxu0  ;;  %v3882_v29 = vmul.f32 %v7569_v27, %v8076_v23 }
0x4c45   :  { %v8708_v38 = vpop.f32.mrb[61].mxu0 }
0x4c46   :  { %v3883_v55 = vadd.f32 %v3882_v29, %v8081_v30 }
0x4c48   :  { %3886 = vrot.lane.b32.xlu0 %v3883_v55, %s7866_s7  ;;  %v3884_v58 = vmul.f32 %v3883_v55, %v3794_v35 }
0x4cba   :  { %v3887_v34 = vpop.permute.xlu0 %3886 }
0x4cbb   :  { %v3889_v36 = vmul.f32 %v3887_v34, %v3883_v55 }
0x4cbd   :  { %3891 = vrot.lane.b32.xlu1 %v3889_v36, %s7867_s18 }
0x4d2f   :  { %v3892_v40 = vpop.permute.xlu1 %3891 }
0x4d30   :  { %v8713_v42 = vadd.f32 %v3892_v40, %v3884_v58 }
0x4d32   :  { %7570 = vtanh.f32 %v8713_v42 }
0x4d3c   :  { %v7571_v63 = vpop.eup %7570 }
0x4d3d   :  { %3897 = vrot.lane.b32.xlu0 %v7571_v63, %s7866_s7 }
0x4daf   :  { %v3898_v52 = vpop.permute.xlu0 %3897 }
0x4db0   :  { %v3900_v53 = vmul.f32 %v3898_v52, %v3883_v55 }
0x4db2   :  { %3902 = vrot.lane.b32.xlu1 %v3900_v53, %s7867_s18 }
0x4e24   :  { %v3903_v56 = vpop.permute.xlu1 %3902 }
0x4e25   :  { %3905 = vst.msk [vmem:[#allocation3 + $0x30] sm:$0xff] %vm301_vm4, %v3903_v56  ;;  %6861 = vmatmul.mubr.msk.f32.vlgmr.msra.gmra.mrb[38].mxu1 %vm301_vm4, %v3903_v56 }
0x4e26   :  { %7320 = vmatpush3.bf16.msra.mxu1 %v8717_v31  ;;  %6891 = vmatprep.mubr.msk.f32.mxu1 %vm7863_vm0, %v7864_v1 }
0x4e27   :  { %7321 = vmatprep.subr.bf16.mxu1 %v7862_v0 }
0x4e2a   :  { %7323 = vmatpush3.bf16.msra.mxu1 %v8721_v51 }
0x4e2b   :  { %7324 = vmatprep.subr.bf16.mxu1 %v7862_v0 }
0x4e2c   :  { %v4024_v60 = vld [vmem:[#allocation3 + $0x30] sm:$0xff] }
0x4e2d   :  { %6892 = vmatmul.mubr.f32.vlgmr.msra.gmra.mrb[40].mxu1 %v7864_v1  ;;  %6880 = vmatprep.mubr.msk.f32.mxu0 %vm301_vm4, %v4024_v60 }
0x4e2e   :  { %7326 = vmatpush3.bf16.msra.mxu1 %v8717_v31  ;;  %6902 = vmatprep.mubr.msk.f32.mxu1 %vm7863_vm0, %v7864_v1 }
0x4e2f   :  { %7327 = vmatprep.subr.bf16.mxu1 %v7862_v0 }
0x4e32   :  { %7329 = vmatpush3.bf16.msra.mxu1 %v8721_v51 }
0x4e33   :  { %7336 = vmatprep.subr.bf16.mxu1 %v7862_v0 }
0x4ef8   :  { %v3975_v3 = vpop.f32.mrb[38].mxu1 }
0x4ef9   :  { %v3979_v4 = vadd.f32 %v3975_v3, %v3197_v2  ;;  %v6862_v6 = vpop.f32.mrb[39].mxu1  ;;  %v4133_v3 = vadd.f32 %v8744_v10, %v8703_v26 }
0x4efb   :  { %v3980_v62 = vmul.f32 %v3979_v4, %v8076_v23 }
0x4f00   :  { %v4236_v43 = vpop.f32.mrb[40].mxu1 }
0x4f01   :  { %v4240_v59 = vadd.f32 %v4236_v43, %v4123_v37  ;;  %v6893_v54 = vpop.f32.mrb[41].mxu1 }
0x4f03   :  { %v4241_v8 = vmul.f32 %v4240_v59, %v8076_v23 }
0x4f05   :  { %7572 = vtanh.f32 %v4241_v8 }
0x4f06   :  { %7574 = vtanh.f32 %v3980_v62 }
0x4f0f   :  { %v7573_v57 = vpop.eup %7572 }
0x4f10   :  { %v4243_v35 = vmul.f32 %v7573_v57, %v8076_v23  ;;  %v7575_v33 = vpop.eup %7574 }
0x4f11   :  { %v3982_v50 = vmul.f32 %v7575_v33, %v8076_v23 }
0x4f12   :  { %v4244_v15 = vadd.f32 %v4243_v35, %v8081_v30 }
0x4f13   :  { %v3983_v48 = vadd.f32 %v3982_v50, %v8081_v30 }
0x4f14   :  { %4247 = vrot.lane.b32.xlu0 %v4244_v15, %s7866_s7  ;;  %v4245_v41 = vmul.f32 0.0, %v4244_v15 }
0x4f15   :  { %v3984_v5 = vmul.f32 %v3983_v48, %v8713_v42 }
0x4f86   :  { %v4248_v11 = vpop.permute.xlu0 %4247 }
0x4f87   :  { %v4250_v44 = vmul.f32 %v4248_v11, %v4244_v15 }
0x4f89   :  { %4252 = vrot.lane.b32.xlu1 %v4250_v44, %s7867_s18 }
0x4ffb   :  { %v4253_v16 = vpop.permute.xlu1 %4252 }
0x4ffc   :  { %v4255_v13 = vadd.f32 %v4253_v16, %v4245_v41 }
0x4ffe   :  { %7576 = vtanh.f32 %v4255_v13 }
0x5008   :  { %v7577_v12 = vpop.eup %7576 }
0x5009   :  { %4258 = vrot.lane.b32.xlu0 %v7577_v12, %s7866_s7 }
0x500d   :  { %3986 = vrot.lane.b32.xlu0 %v3983_v48, %s7866_s7 }
0x507b   :  { %v4259_v18 = vpop.permute.xlu0 %4258 }
0x507c   :  { %v4261_v14 = vmul.f32 %v4259_v18, %v4244_v15 }
0x507e   :  { %4263 = vrot.lane.b32.xlu1 %v4261_v14, %s7867_s18 }
0x507f   :  { %v3987_v39 = vpop.permute.xlu0 %3986 }
0x5080   :  { %v3989_v61 = vmul.f32 %v3987_v39, %v3983_v48 }
0x5082   :  { %3991 = vrot.lane.b32.xlu0 %v3989_v61, %s7867_s18 }
0x50f0   :  { %v4264_v19 = vpop.permute.xlu1 %4263 }
0x50f1   :  { %4266 = vst.msk [vmem:[#allocation3] sm:$0xff] %vm301_vm4, %v4264_v19  ;;  %6903 = vmatmul.mubr.msk.f32.vlgmr.msra.gmra.mrb[42].mxu1 %vm301_vm4, %v4264_v19 }
0x50f2   :  { %7338 = vmatpush3.bf16.msra.mxu1 %v8717_v31  ;;  %6924 = vmatprep.mubr.msk.f32.mxu1 %vm7863_vm0, %v7864_v1 }
0x50f3   :  { %7339 = vmatprep.subr.bf16.mxu1 %v7862_v0 }
0x50f4   :  { %v3992_v20 = vpop.permute.xlu0 %3991 }
0x50f5   :  { %v3994_v17 = vadd.f32 %v3992_v20, %v3984_v5 }
0x50f6   :  { %7341 = vmatpush3.bf16.msra.mxu1 %v8721_v51 }
0x50f7   :  { %7578 = vtanh.f32 %v3994_v17  ;;  %7348 = vmatprep.subr.bf16.mxu1 %v7862_v0 }
0x5101   :  { %v7579_v46 = vpop.eup %7578 }
0x5102   :  { %3997 = vrot.lane.b32.xlu0 %v7579_v46, %s7866_s7 }
0x5174   :  { %v3998_v7 = vpop.permute.xlu0 %3997 }
0x5175   :  { %v4000_v21 = vmul.f32 %v3998_v7, %v3983_v48 }
0x5177   :  { %4002 = vrot.lane.b32.xlu0 %v4000_v21, %s7867_s18 }
0x51c4   :  { %v4336_v32 = vpop.f32.mrb[42].mxu1 }
0x51c5   :  { %v4340_v27 = vadd.f32 %v4336_v32, %v4128_v22  ;;  %v6904_v29 = vpop.f32.mrb[43].mxu1  ;;  %v4143_v22 = vadd.f32 %v8744_v10, %v8708_v38 }
0x51c7   :  { %v4341_v55 = vmul.f32 %v4340_v27, %v8076_v23 }
0x51c9   :  { %7580 = vtanh.f32 %v4341_v55 }
0x51d3   :  { %v7581_v34 = vpop.eup %7580 }
0x51d4   :  { %v4343_v36 = vmul.f32 %v7581_v34, %v8076_v23 }
0x51d6   :  { %v4344_v58 = vadd.f32 %v4343_v36, %v8081_v30 }
0x51d8   :  { %4347 = vrot.lane.b32.xlu1 %v4344_v58, %s7866_s7  ;;  %v4345_v47 = vmul.f32 %v4344_v58, %v4255_v13  ;;  %v4138_v13 = vadd.f32 %v8701_v25, %v8744_v10 }
0x51e9   :  { %v4003_v40 = vpop.permute.xlu0 %4002 }
0x51ea   :  { %4005 = vst.msk [vmem:[#allocation3 + $0x38] sm:$0xff] %vm301_vm4, %v4003_v40 }
0x51f1   :  { %v4025_v42 = vld [vmem:[#allocation3 + $0x38] sm:$0xff] }
0x51f2   :  { %6881 = vmatmul.mubr.msk.f32.gmra.mrb[62].mxu0 %vm301_vm4, %v4025_v42 }
0x51f3   :  { %6913 = vmatprep.mubr.msk.f32.mxu0 %vm7863_vm0, %v7864_v1 }
0x524a   :  { %v4348_v24 = vpop.permute.xlu1 %4347 }
0x524b   :  { %v4350_v63 = vmul.f32 %v4348_v24, %v4344_v58 }
0x524d   :  { %4352 = vrot.lane.b32.xlu1 %v4350_v63, %s7867_s18 }
0x52bf   :  { %v4353_v49 = vpop.permute.xlu1 %4352 }
0x52c0   :  { %v4355_v9 = vadd.f32 %v4353_v49, %v4345_v47 }
0x52c2   :  { %7582 = vtanh.f32 %v4355_v9 }
0x52c5   :  { %v8781_v45 = vpop.f32.mrb[62].mxu0 }
0x52c6   :  { %v8783_v52 = vpop.f32.mrb[63].mxu0 }
0x52cc   :  { %v7583_v53 = vpop.eup %7582 }
0x52cd   :  { %4358 = vrot.lane.b32.xlu1 %v7583_v53, %s7866_s7 }
0x533f   :  { %v4359_v56 = vpop.permute.xlu1 %4358 }
0x5340   :  { %v4361_v60 = vmul.f32 %v4359_v56, %v4344_v58  ;;  %v4148_v56 = vadd.f32 %v8705_v28, %v8744_v10 }
0x5342   :  { %4363 = vrot.lane.b32.xlu1 %v4361_v60, %s7867_s18 }
0x53b4   :  { %v4364_v2 = vpop.permute.xlu1 %4363 }
0x53b5   :  { %4366 = vst.msk [vmem:[#allocation3 + $0x8] sm:$0xff] %vm301_vm4, %v4364_v2  ;;  %6914 = vmatmul.mubr.msk.f32.vlgmr.msra.gmra.mrb[64].mxu0 %vm301_vm4, %v4364_v2 }
0x53b6   :  { %7344 = vmatpush3.bf16.msra.mxu0 %v8717_v31  ;;  %6935 = vmatprep.mubr.msk.f32.mxu0 %vm7863_vm0, %v7864_v1 }
0x53b7   :  { %7345 = vmatprep.subr.bf16.mxu0 %v7862_v0 }
0x53ba   :  { %7347 = vmatpush3.bf16.msra.mxu0 %v8721_v51 }
0x53bb   :  { %7354 = vmatprep.subr.bf16.mxu0 %v7862_v0 }
0x5488   :  { %v4436_v4 = vpop.f32.mrb[64].mxu0 }
0x5489   :  { %v4440_v6 = vadd.f32 %v4436_v4, %v4133_v3  ;;  %v6915_v37 = vpop.f32.mrb[65].mxu0 }
0x548b   :  { %v4441_v43 = vmul.f32 %v4440_v6, %v8076_v23 }
0x548d   :  { %7584 = vtanh.f32 %v4441_v43 }
0x5497   :  { %v7585_v59 = vpop.eup %7584 }
0x5498   :  { %v4443_v54 = vmul.f32 %v7585_v59, %v8076_v23 }
0x549a   :  { %v4444_v8 = vadd.f32 %v4443_v54, %v8081_v30 }
0x549c   :  { %4447 = vrot.lane.b32.xlu0 %v4444_v8, %s7866_s7  ;;  %v4445_v15 = vmul.f32 %v4444_v8, %v4355_v9 }
0x550e   :  { %v4448_v57 = vpop.permute.xlu0 %4447 }
0x550f   :  { %v4450_v35 = vmul.f32 %v4448_v57, %v4444_v8  ;;  %v4969_v57 = vld [vmem:[#allocation9 + $0x88] sm:$0xff] }
0x5511   :  { %4452 = vrot.lane.b32.xlu1 %v4450_v35, %s7867_s18 }
0x5583   :  { %v4453_v11 = vpop.permute.xlu1 %4452 }
0x5584   :  { %v4455_v26 = vadd.f32 %v4453_v11, %v4445_v15 }
0x5586   :  { %7586 = vtanh.f32 %v4455_v26 }
0x5590   :  { %v7587_v44 = vpop.eup %7586 }
0x5591   :  { %4458 = vrot.lane.b32.xlu0 %v7587_v44, %s7866_s7  ;;  %v4970_v44 = vld [vmem:[#allocation9 + $0x90] sm:$0xff] }
0x5603   :  { %v4459_v62 = vpop.permute.xlu0 %4458 }
0x5604   :  { %v4461_v41 = vmul.f32 %v4459_v62, %v4444_v8  ;;  %v4968_v8 = vld [vmem:[#allocation9 + $0x80] sm:$0xff]  ;;  %v4971_v62 = vld [vmem:[#allocation9 + $0x98] sm:$0xff] }
0x5605   :  { %v7366_v35 = vpack.c.bf16 %v4969_v57, %v4968_v8 }
0x5606   :  { %4463 = vrot.lane.b32.xlu1 %v4461_v41, %s7867_s18  ;;  %v7370_v41 = vpack.c.bf16 %v4971_v62, %v4970_v44 }
0x5678   :  { %v4464_v16 = vpop.permute.xlu1 %4463 }
0x5679   :  { %4466 = vst.msk [vmem:[#allocation3 + $0x10] sm:$0xff] %vm301_vm4, %v4464_v16  ;;  %6925 = vmatmul.mubr.msk.f32.vlgmr.msra.gmra.mrb[44].mxu1 %vm301_vm4, %v4464_v16 }
0x567a   :  { %7350 = vmatpush3.bf16.msra.mxu1 %v8717_v31  ;;  %6946 = vmatprep.mubr.msk.f32.mxu1 %vm7863_vm0, %v7864_v1 }
0x567b   :  { %7351 = vmatprep.subr.bf16.mxu1 %v7862_v0 }
0x567e   :  { %7353 = vmatpush3.bf16.msra.mxu1 %v8721_v51 }
0x567f   :  { %7360 = vmatprep.subr.bf16.mxu1 %v7862_v0 }
0x574c   :  { %v4536_v33 = vpop.f32.mrb[44].mxu1 }
0x574d   :  { %v4540_v50 = vadd.f32 %v4536_v33, %v4138_v13  ;;  %v6926_v12 = vpop.f32.mrb[45].mxu1  ;;  %v4979_v13 = vld [vmem:[#allocation3] sm:$0xff]  ;;  %v4980_v33 = vld [vmem:[#allocation3 + $0x8] sm:$0xff] }
0x574f   :  { %v4541_v48 = vmul.f32 %v4540_v50, %v8076_v23  ;;  %v4981_v50 = vld [vmem:[#allocation3 + $0x10] sm:$0xff] }
0x5751   :  { %7588 = vtanh.f32 %v4541_v48 }
0x575b   :  { %v7589_v18 = vpop.eup %7588 }
0x575c   :  { %v4543_v14 = vmul.f32 %v7589_v18, %v8076_v23 }
0x575e   :  { %v4544_v39 = vadd.f32 %v4543_v14, %v8081_v30  ;;  %v4153_v14 = vadd.f32 %v8744_v10, %v8783_v52 }
0x5760   :  { %4547 = vrot.lane.b32.xlu0 %v4544_v39, %s7866_s7  ;;  %v4545_v5 = vmul.f32 %v4544_v39, %v4455_v26 }
0x57d2   :  { %v4548_v61 = vpop.permute.xlu0 %4547 }
0x57d3   :  { %v4550_v19 = vmul.f32 %v4548_v61, %v4544_v39 }
0x57d5   :  { %4552 = vrot.lane.b32.xlu1 %v4550_v19, %s7867_s18 }
0x5847   :  { %v4553_v20 = vpop.permute.xlu1 %4552 }
0x5848   :  { %v4555_v25 = vadd.f32 %v4553_v20, %v4545_v5 }
0x584a   :  { %7590 = vtanh.f32 %v4555_v25 }
0x5854   :  { %v7591_v17 = vpop.eup %7590 }
0x5855   :  { %4558 = vrot.lane.b32.xlu0 %v7591_v17, %s7866_s7 }
0x58c7   :  { %v4559_v46 = vpop.permute.xlu0 %4558 }
0x58c8   :  { %v4561_v7 = vmul.f32 %v4559_v46, %v4544_v39 }
0x58ca   :  { %4563 = vrot.lane.b32.xlu1 %v4561_v7, %s7867_s18 }
0x593c   :  { %v4564_v21 = vpop.permute.xlu1 %4563 }
0x593d   :  { %4566 = vst.msk [vmem:[#allocation3 + $0x18] sm:$0xff] %vm301_vm4, %v4564_v21  ;;  %6936 = vmatmul.mubr.msk.f32.vlgmr.msra.gmra.mrb[66].mxu0 %vm301_vm4, %v4564_v21 }
0x593e   :  { %7356 = vmatpush3.bf16.msra.mxu0 %v8717_v31  ;;  %6957 = vmatprep.mubr.msk.f32.mxu0 %vm7863_vm0, %v7864_v1 }
0x593f   :  { %7357 = vmatprep.subr.bf16.mxu0 %v7862_v0 }
0x5942   :  { %7359 = vmatpush3.bf16.msra.mxu0 %v8721_v51 }
0x5943   :  { %7367 = vmatprep.subr.bf16.mxu0 %v7366_v35 }
0x5944   :  { %v4982_v12 = vld [vmem:[#allocation3 + $0x18] sm:$0xff] }
0x5a10   :  { %v4636_v32 = vpop.f32.mrb[66].mxu0 }
0x5a11   :  { %v4640_v27 = vadd.f32 %v4636_v32, %v4143_v22  ;;  %v6937_v29 = vpop.f32.mrb[67].mxu0 }
0x5a13   :  { %v4641_v55 = vmul.f32 %v4640_v27, %v8076_v23 }
0x5a15   :  { %7592 = vtanh.f32 %v4641_v55 }
0x5a1f   :  { %v7593_v34 = vpop.eup %7592 }
0x5a20   :  { %v4643_v36 = vmul.f32 %v7593_v34, %v8076_v23 }
0x5a22   :  { %v4644_v58 = vadd.f32 %v4643_v36, %v8081_v30 }
0x5a24   :  { %4647 = vrot.lane.b32.xlu0 %v4644_v58, %s7866_s7  ;;  %v4645_v24 = vmul.f32 %v4644_v58, %v4555_v25 }
0x5a96   :  { %v4648_v40 = vpop.permute.xlu0 %4647 }
0x5a97   :  { %v4650_v42 = vmul.f32 %v4648_v40, %v4644_v58  ;;  %v4973_v40 = vld [vmem:[#allocation10 + $0xa0] sm:$0xff] }
0x5a99   :  { %4652 = vrot.lane.b32.xlu1 %v4650_v42, %s7867_s18  ;;  %v4974_v42 = vld [vmem:[#allocation10 + $0xa8] sm:$0xff] }
0x5b0b   :  { %v4653_v63 = vpop.permute.xlu1 %4652 }
0x5b0c   :  { %v4655_v38 = vadd.f32 %v4653_v63, %v4645_v24  ;;  %v8884_v24 = vpack.c.bf16 %v4974_v42, %v4973_v40  ;;  %v4975_v63 = vld [vmem:[#allocation10 + $0xb0] sm:$0xff] }
0x5b0e   :  { %7594 = vtanh.f32 %v4655_v38 }
0x5b18   :  { %v7595_v47 = vpop.eup %7594 }
0x5b19   :  { %4658 = vrot.lane.b32.xlu0 %v7595_v47, %s7866_s7 }
0x5b8b   :  { %v4659_v49 = vpop.permute.xlu0 %4658 }
0x5b8c   :  { %v4661_v9 = vmul.f32 %v4659_v49, %v4644_v58 }
0x5b8e   :  { %4663 = vrot.lane.b32.xlu1 %v4661_v9, %s7867_s18 }
0x5c00   :  { %v4664_v53 = vpop.permute.xlu1 %4663 }
0x5c01   :  { %4666 = vst.msk [vmem:[#allocation3 + $0x20] sm:$0xff] %vm301_vm4, %v4664_v53  ;;  %6947 = vmatmul.mubr.msk.f32.vlgmr.msra.gmra.mrb[46].mxu1 %vm301_vm4, %v4664_v53 }
0x5c02   :  { %7362 = vmatpush3.bf16.msra.mxu1 %v8717_v31  ;;  %6968 = vmatprep.mubr.msk.f32.mxu1 %vm7863_vm0, %v7864_v1 }
0x5c03   :  { %7363 = vmatprep.subr.bf16.mxu1 %v7862_v0 }
0x5c06   :  { %7365 = vmatpush3.bf16.msra.mxu1 %v8721_v51 }
0x5c07   :  { %7374 = vmatprep.subr.bf16.mxu1 %v7862_v0 }
0x5c08   :  { %v4983_v48 = vld [vmem:[#allocation3 + $0x20] sm:$0xff] }
0x5cd4   :  { %v4736_v60 = vpop.f32.mrb[46].mxu1 }
0x5cd5   :  { %v4740_v2 = vadd.f32 %v4736_v60, %v4148_v56  ;;  %v6948_v3 = vpop.f32.mrb[47].mxu1  ;;  %v4158_v60 = vadd.f32 %v8781_v45, %v8744_v10 }
0x5cd7   :  { %v4741_v4 = vmul.f32 %v4740_v2, %v8076_v23 }
0x5cd9   :  { %7596 = vtanh.f32 %v4741_v4 }
0x5ce3   :  { %v7597_v6 = vpop.eup %7596 }
0x5ce4   :  { %v4743_v31 = vmul.f32 %v7597_v6, %v8076_v23  ;;  %v8911_v6 = vld [vmem:[#allocation12 + $0x5] ss:$0 sm:$0xff] }
0x5ce6   :  { %v4744_v37 = vadd.f32 %v4743_v31, %v8081_v30 }
0x5ce8   :  { %4747 = vrot.lane.b32.xlu0 %v4744_v37, %s7866_s7  ;;  %v4745_v59 = vmul.f32 %v4744_v37, %v4655_v38  ;;  %v4976_v38 = vld [vmem:[#allocation10 + $0xb8] sm:$0xff] }
0x5ce9   :  { %v8888_v47 = vpack.c.bf16 %v4976_v38, %v4975_v63 }
0x5d5a   :  { %v4748_v43 = vpop.permute.xlu0 %4747 }
0x5d5b   :  { %v4750_v51 = vmul.f32 %v4748_v43, %v4744_v37 }
0x5d5d   :  { %4752 = vrot.lane.b32.xlu1 %v4750_v51, %s7867_s18 }
0x5dcf   :  { %v4753_v54 = vpop.permute.xlu1 %4752 }
0x5dd0   :  { %v4755_v28 = vadd.f32 %v4753_v54, %v4745_v59 }
0x5dd2   :  { %7598 = vtanh.f32 %v4755_v28 }
0x5ddc   :  { %v7599_v15 = vpop.eup %7598 }
0x5ddd   :  { %4758 = vrot.lane.b32.xlu0 %v7599_v15, %s7866_s7 }
0x5e4f   :  { %v4759_v11 = vpop.permute.xlu0 %4758 }
0x5e50   :  { %v4761_v26 = vmul.f32 %v4759_v11, %v4744_v37 }
0x5e52   :  { %4763 = vrot.lane.b32.xlu1 %v4761_v26, %s7867_s18 }
0x5ec4   :  { %v4764_v16 = vpop.permute.xlu1 %4763 }
0x5ec5   :  { %4766 = vst.msk [vmem:[#allocation3 + $0x28] sm:$0xff] %vm301_vm4, %v4764_v16  ;;  %6958 = vmatmul.mubr.msk.f32.vlgmr.msra.gmra.mrb[68].mxu0 %vm301_vm4, %v4764_v16 }
0x5ec6   :  { %7369 = vmatpush3.bf16.msra.mxu0 %v7366_v35  ;;  %6979 = vmatprep.mubr.msk.f32.mxu0 %vm301_vm4, %v4979_v13 }
0x5ec7   :  { %7371 = vmatprep.subr.bf16.mxu0 %v7370_v41 }
0x5eca   :  { %7373 = vmatpush3.bf16.msra.mxu0 %v7370_v41 }
0x5ecb   :  { %7386 = vmatprep.subr.bf16.mxu0 %v7862_v0 }
0x5ecc   :  { %v4984_v18 = vld [vmem:[#allocation3 + $0x28] sm:$0xff] }
0x5ecd   :  { %6980 = vmatmul.mubr.msk.f32.vlgmr.msra.gmra.mrb[70].mxu0 %vm301_vm4, %v4980_v33 }
0x5ece   :  { %6982 = vmatprep.mubr.msk.f32.mxu0 %vm301_vm4, %v4981_v50  ;;  %7388 = vmatpush3.bf16.msra.mxu0 %v8884_v24 }
0x5ecf   :  { %7389 = vmatprep.subr.bf16.mxu0 %v7862_v0 }
0x5ed1   :  { %6983 = vmatmul.mubr.msk.f32.gmra.mrb[72].mxu0 %vm301_vm4, %v4982_v12 }
0x5ed2   :  { %6985 = vmatprep.mubr.msk.f32.mxu0 %vm301_vm4, %v4983_v48  ;;  %7391 = vmatpush3.bf16.msra.mxu0 %v8888_v47 }
0x5ed3   :  { %7398 = vmatprep.subr.bf16.mxu0 %v7862_v0 }
0x5ed5   :  { %6986 = vmatmul.mubr.msk.f32.gmra.mrb[74].mxu0 %vm301_vm4, %v4984_v18 }
0x5f98   :  { %v4836_v39 = vpop.f32.mrb[68].mxu0 }
0x5f99   :  { %v4840_v61 = vadd.f32 %v4836_v39, %v4153_v14  ;;  %v6959_v19 = vpop.f32.mrb[69].mxu0 }
0x5f9b   :  { %v4841_v5 = vmul.f32 %v4840_v61, %v8076_v23 }
0x5f9d   :  { %7600 = vtanh.f32 %v4841_v5 }
0x5fa0   :  { %v8866_v20 = vpop.f32.mrb[70].mxu0 }
0x5fa1   :  { %v5083_v25 = vpop.f32.mrb[71].mxu0  ;;  %v5089_v5 = vadd.f32 %v8866_v20, %v8911_v6 }
0x5fa2   :  { %v5084_v31 = vadd.f32 %v8911_v6, %v5083_v25 }
0x5fa4   :  { %v8868_v17 = vpop.f32.mrb[72].mxu0 }
0x5fa5   :  { %v8870_v46 = vpop.f32.mrb[73].mxu0 }
0x5fa7   :  { %v7601_v7 = vpop.eup %7600 }
0x5fa8   :  { %v8872_v21 = vpop.f32.mrb[74].mxu0  ;;  %v4843_v22 = vmul.f32 %v7601_v7, %v8076_v23 }
0x5fa9   :  { %v8875_v32 = vpop.f32.mrb[75].mxu0 }
0x5faa   :  { %v4844_v52 = vadd.f32 %v4843_v22, %v8081_v30 }
0x5fac   :  { %4847 = vrot.lane.b32.xlu0 %v4844_v52, %s7866_s7  ;;  %v4845_v55 = vmul.f32 %v4844_v52, %v4755_v28 }
0x601e   :  { %v4848_v27 = vpop.permute.xlu0 %4847 }
0x601f   :  { %v4850_v29 = vmul.f32 %v4848_v27, %v4844_v52 }
0x6021   :  { %4852 = vrot.lane.b32.xlu1 %v4850_v29, %s7867_s18 }
0x6093   :  { %v4853_v34 = vpop.permute.xlu1 %4852 }
0x6094   :  { %v8880_v36 = vadd.f32 %v4853_v34, %v4845_v55 }
0x6096   :  { %7602 = vtanh.f32 %v8880_v36 }
0x60a0   :  { %v7603_v58 = vpop.eup %7602 }
0x60a1   :  { %4858 = vrot.lane.b32.xlu0 %v7603_v58, %s7866_s7 }
0x6113   :  { %v4859_v49 = vpop.permute.xlu0 %4858 }
0x6114   :  { %v4861_v9 = vmul.f32 %v4859_v49, %v4844_v52 }
0x6116   :  { %4863 = vrot.lane.b32.xlu1 %v4861_v9, %s7867_s18 }
0x6188   :  { %v4864_v53 = vpop.permute.xlu1 %4863 }
0x6189   :  { %4866 = vst.msk [vmem:[#allocation3 + $0x30] sm:$0xff] %vm301_vm4, %v4864_v53  ;;  %6969 = vmatmul.mubr.msk.f32.vlgmr.msra.gmra.mrb[48].mxu1 %vm301_vm4, %v4864_v53 }
0x618a   :  { %7376 = vmatpush3.bf16.msra.mxu1 %v8884_v24  ;;  %6999 = vmatprep.mubr.msk.f32.mxu1 %vm7863_vm0, %v7864_v1 }
0x618b   :  { %7377 = vmatprep.subr.bf16.mxu1 %v7862_v0 }
0x618e   :  { %7379 = vmatpush3.bf16.msra.mxu1 %v8888_v47 }
0x618f   :  { %7380 = vmatprep.subr.bf16.mxu1 %v7862_v0 }
0x6190   :  { %v4985_v56 = vld [vmem:[#allocation3 + $0x30] sm:$0xff] }
0x6191   :  { %7000 = vmatmul.mubr.f32.vlgmr.msra.gmra.mrb[50].mxu1 %v7864_v1  ;;  %6988 = vmatprep.mubr.msk.f32.mxu0 %vm301_vm4, %v4985_v56 }
0x6192   :  { %7382 = vmatpush3.bf16.msra.mxu1 %v8884_v24  ;;  %7010 = vmatprep.mubr.msk.f32.mxu1 %vm7863_vm0, %v7864_v1 }
0x6193   :  { %7383 = vmatprep.subr.bf16.mxu1 %v7862_v0 }
0x6196   :  { %7385 = vmatpush3.bf16.msra.mxu1 %v8888_v47 }
0x6197   :  { %7392 = vmatprep.subr.bf16.mxu1 %v7862_v0 }
0x625c   :  { %v4936_v2 = vpop.f32.mrb[48].mxu1 }
0x625d   :  { %v4940_v3 = vadd.f32 %v4936_v2, %v4158_v60  ;;  %v6970_v4 = vpop.f32.mrb[49].mxu1  ;;  %v5094_v2 = vadd.f32 %v8911_v6, %v8870_v46 }
0x625f   :  { %v4941_v57 = vmul.f32 %v4940_v3, %v8076_v23 }
0x6264   :  { %v5197_v37 = vpop.f32.mrb[50].mxu1 }
0x6265   :  { %v5201_v43 = vadd.f32 %v5197_v37, %v5084_v31  ;;  %v7001_v51 = vpop.f32.mrb[51].mxu1 }
0x6267   :  { %v5202_v59 = vmul.f32 %v5201_v43, %v8076_v23 }
0x6269   :  { %7604 = vtanh.f32 %v5202_v59 }
0x626a   :  { %7606 = vtanh.f32 %v4941_v57 }
0x6273   :  { %v7605_v54 = vpop.eup %7604 }
0x6274   :  { %v5204_v28 = vmul.f32 %v7605_v54, %v8076_v23  ;;  %v7607_v26 = vpop.eup %7606 }
0x6275   :  { %v4943_v44 = vmul.f32 %v7607_v26, %v8076_v23 }
0x6276   :  { %v5205_v8 = vadd.f32 %v5204_v28, %v8081_v30 }
0x6277   :  { %v4944_v41 = vadd.f32 %v4943_v44, %v8081_v30 }
0x6278   :  { %5208 = vrot.lane.b32.xlu0 %v5205_v8, %s7866_s7  ;;  %v5206_v35 = vmul.f32 0.0, %v5205_v8 }
0x6279   :  { %v4945_v48 = vmul.f32 %v4944_v41, %v8880_v36 }
0x62ea   :  { %v5209_v10 = vpop.permute.xlu0 %5208 }
0x62eb   :  { %v5211_v45 = vmul.f32 %v5209_v10, %v5205_v8 }
0x62ed   :  { %5213 = vrot.lane.b32.xlu1 %v5211_v45, %s7867_s18 }
0x635f   :  { %v5214_v15 = vpop.permute.xlu1 %5213 }
0x6360   :  { %v5216_v11 = vadd.f32 %v5214_v15, %v5206_v35 }
0x6362   :  { %7608 = vtanh.f32 %v5216_v11 }
0x636c   :  { %v7609_v62 = vpop.eup %7608 }
0x636d   :  { %5219 = vrot.lane.b32.xlu0 %v7609_v62, %s7866_s7 }
0x6371   :  { %4947 = vrot.lane.b32.xlu0 %v4944_v41, %s7866_s7 }
0x63df   :  { %v5220_v16 = vpop.permute.xlu0 %5219 }
0x63e0   :  { %v5222_v13 = vmul.f32 %v5220_v16, %v5205_v8 }
0x63e2   :  { %5225 = vrot.lane.b32.xlu1 %v5222_v13, %s7867_s18 }
0x63e3   :  { %v4948_v33 = vpop.permute.xlu0 %4947 }
0x63e4   :  { %v4950_v50 = vmul.f32 %v4948_v33, %v4944_v41 }
0x63e6   :  { %4952 = vrot.lane.b32.xlu0 %v4950_v50, %s7867_s18 }
0x6454   :  { %v5226_v12 = vpop.permute.xlu1 %5225 }
0x6455   :  { %7011 = vmatmul.mubr.msk.f32.vlgmr.msra.gmra.mrb[52].mxu1 %vm301_vm4, %v5226_v12 }
0x6456   :  { %7394 = vmatpush3.bf16.msra.mxu1 %v8884_v24  ;;  %7032 = vmatprep.mubr.msk.f32.mxu1 %vm7863_vm0, %v7864_v1 }
0x6457   :  { %7395 = vmatprep.subr.bf16.mxu1 %v7862_v0 }
0x6458   :  { %v4953_v18 = vpop.permute.xlu0 %4952 }
0x6459   :  { %v4955_v14 = vadd.f32 %v4953_v18, %v4945_v48 }
0x645a   :  { %7397 = vmatpush3.bf16.msra.mxu1 %v8888_v47 }
0x645b   :  { %7610 = vtanh.f32 %v4955_v14  ;;  %7404 = vmatprep.subr.bf16.mxu1 %v7862_v0 }
0x6465   :  { %v7611_v39 = vpop.eup %7610 }
0x6466   :  { %4958 = vrot.lane.b32.xlu0 %v7611_v39, %s7866_s7 }
0x64d8   :  { %v4959_v61 = vpop.permute.xlu0 %4958 }
0x64d9   :  { %v4961_v19 = vmul.f32 %v4959_v61, %v4944_v41 }
0x64db   :  { %4963 = vrot.lane.b32.xlu0 %v4961_v19, %s7867_s18 }
0x6528   :  { %v5295_v25 = vpop.f32.mrb[52].mxu1 }
0x6529   :  { %v5299_v7 = vadd.f32 %v5295_v25, %v5089_v5  ;;  %v7012_v22 = vpop.f32.mrb[53].mxu1  ;;  %v5104_v5 = vadd.f32 %v8911_v6, %v8875_v32 }
0x652b   :  { %v5300_v52 = vmul.f32 %v5299_v7, %v8076_v23 }
0x652d   :  { %7612 = vtanh.f32 %v5300_v52 }
0x6537   :  { %v7613_v27 = vpop.eup %7612 }
0x6538   :  { %v5302_v29 = vmul.f32 %v7613_v27, %v8076_v23 }
0x653a   :  { %v5303_v55 = vadd.f32 %v5302_v29, %v8081_v30 }
0x653c   :  { %5306 = vrot.lane.b32.xlu1 %v5303_v55, %s7866_s7  ;;  %v5304_v40 = vmul.f32 %v5303_v55, %v5216_v11  ;;  %v5099_v11 = vadd.f32 %v8868_v17, %v8911_v6 }
0x654d   :  { %v4964_v34 = vpop.permute.xlu0 %4963 }
0x654e   :  { %4966 = vst.msk [vmem:[#allocation3 + $0x38] sm:$0xff] %vm301_vm4, %v4964_v34 }
0x6555   :  { %v4986_v36 = vld [vmem:[#allocation3 + $0x38] sm:$0xff] }
0x6556   :  { %6989 = vmatmul.mubr.msk.f32.gmra.mrb[76].mxu0 %vm301_vm4, %v4986_v36 }
0x6557   :  { %7021 = vmatprep.mubr.msk.f32.mxu0 %vm7863_vm0, %v7864_v1 }
0x65ae   :  { %v5307_v20 = vpop.permute.xlu1 %5306 }
0x65af   :  { %v5309_v58 = vmul.f32 %v5307_v20, %v5303_v55 }
0x65b1   :  { %5311 = vrot.lane.b32.xlu1 %v5309_v58, %s7867_s18 }
0x6623   :  { %v5312_v42 = vpop.permute.xlu1 %5311 }
0x6624   :  { %v5314_v63 = vadd.f32 %v5312_v42, %v5304_v40 }
0x6626   :  { %7614 = vtanh.f32 %v5314_v63 }
0x6629   :  { %v8947_v38 = vpop.f32.mrb[76].mxu0 }
0x662a   :  { %v8949_v49 = vpop.f32.mrb[77].mxu0 }
0x6630   :  { %v7615_v9 = vpop.eup %7614 }
0x6631   :  { %5317 = vrot.lane.b32.xlu1 %v7615_v9, %s7866_s7 }
0x66a3   :  { %v5318_v53 = vpop.permute.xlu1 %5317 }
0x66a4   :  { %v5320_v56 = vmul.f32 %v5318_v53, %v5303_v55  ;;  %v5109_v53 = vadd.f32 %v8872_v21, %v8911_v6 }
0x66a6   :  { %5323 = vrot.lane.b32.xlu1 %v5320_v56, %s7867_s18 }
0x6718   :  { %v5324_v60 = vpop.permute.xlu1 %5323 }
0x6719   :  { %7022 = vmatmul.mubr.msk.f32.vlgmr.msra.gmra.mrb[78].mxu0 %vm301_vm4, %v5324_v60 }
0x671a   :  { %7400 = vmatpush3.bf16.msra.mxu0 %v8884_v24  ;;  %7043 = vmatprep.mubr.msk.f32.mxu0 %vm7863_vm0, %v7864_v1 }
0x671b   :  { %7401 = vmatprep.subr.bf16.mxu0 %v7862_v0 }
0x671e   :  { %7403 = vmatpush3.bf16.msra.mxu0 %v8888_v47 }
0x671f   :  { %7410 = vmatprep.subr.bf16.mxu0 %v7862_v0 }
0x67ec   :  { %v5393_v3 = vpop.f32.mrb[78].mxu0 }
0x67ed   :  { %v5397_v4 = vadd.f32 %v5393_v3, %v5094_v2  ;;  %v7023_v31 = vpop.f32.mrb[79].mxu0 }
0x67ef   :  { %v5398_v37 = vmul.f32 %v5397_v4, %v8076_v23 }
0x67f1   :  { %7616 = vtanh.f32 %v5398_v37 }
0x67fb   :  { %v7617_v43 = vpop.eup %7616 }
0x67fc   :  { %v5400_v51 = vmul.f32 %v7617_v43, %v8076_v23 }
0x67fe   :  { %v5401_v59 = vadd.f32 %v5400_v51, %v8081_v30 }
0x6800   :  { %5404 = vrot.lane.b32.xlu0 %v5401_v59, %s7866_s7  ;;  %v5402_v8 = vmul.f32 %v5401_v59, %v5314_v63 }
0x6872   :  { %v5405_v54 = vpop.permute.xlu0 %5404 }
0x6873   :  { %v5407_v28 = vmul.f32 %v5405_v54, %v5401_v59 }
0x6875   :  { %5409 = vrot.lane.b32.xlu1 %v5407_v28, %s7867_s18 }
0x68e7   :  { %v5410_v10 = vpop.permute.xlu1 %5409 }
0x68e8   :  { %v5412_v46 = vadd.f32 %v5410_v10, %v5402_v8  ;;  %v5114_v10 = vadd.f32 %v8911_v6, %v8949_v49 }
0x68ea   :  { %7618 = vtanh.f32 %v5412_v46 }
0x68f4   :  { %v7619_v45 = vpop.eup %7618 }
0x68f5   :  { %5415 = vrot.lane.b32.xlu0 %v7619_v45, %s7866_s7 }
0x6967   :  { %v5416_v57 = vpop.permute.xlu0 %5415 }
0x6968   :  { %v5418_v35 = vmul.f32 %v5416_v57, %v5401_v59 }
0x696a   :  { %5421 = vrot.lane.b32.xlu1 %v5418_v35, %s7867_s18 }
0x69dc   :  { %v5422_v15 = vpop.permute.xlu1 %5421 }
0x69dd   :  { %7033 = vmatmul.mubr.msk.f32.vlgmr.msra.gmra.mrb[54].mxu1 %vm301_vm4, %v5422_v15 }
0x69de   :  { %7406 = vmatpush3.bf16.msra.mxu1 %v8884_v24  ;;  %7054 = vmatprep.mubr.msk.f32.mxu1 %vm7863_vm0, %v7864_v1 }
0x69df   :  { %7407 = vmatprep.subr.bf16.mxu1 %v7862_v0 }
0x69e2   :  { %7409 = vmatpush3.bf16.msra.mxu1 %v8888_v47 }
0x69e3   :  { %7416 = vmatprep.subr.bf16.mxu1 %v7862_v0 }
0x6ab0   :  { %v5491_v26 = vpop.f32.mrb[54].mxu1 }
0x6ab1   :  { %v5495_v44 = vadd.f32 %v5491_v26, %v5099_v11  ;;  %v7034_v62 = vpop.f32.mrb[55].mxu1 }
0x6ab3   :  { %v5496_v41 = vmul.f32 %v5495_v44, %v8076_v23 }
0x6ab5   :  { %7620 = vtanh.f32 %v5496_v41 }
0x6abf   :  { %v7621_v16 = vpop.eup %7620 }
0x6ac0   :  { %v5498_v13 = vmul.f32 %v7621_v16, %v8076_v23 }
0x6ac2   :  { %v5499_v33 = vadd.f32 %v5498_v13, %v8081_v30 }
0x6ac4   :  { %5502 = vrot.lane.b32.xlu0 %v5499_v33, %s7866_s7  ;;  %v5500_v48 = vmul.f32 %v5499_v33, %v5412_v46 }
0x6b36   :  { %v5503_v50 = vpop.permute.xlu0 %5502 }
0x6b37   :  { %v5505_v12 = vmul.f32 %v5503_v50, %v5499_v33 }
0x6b39   :  { %5507 = vrot.lane.b32.xlu1 %v5505_v12, %s7867_s18  ;;  %v5119_v12 = vadd.f32 %v8947_v38, %v8911_v6 }
0x6bab   :  { %v5508_v18 = vpop.permute.xlu1 %5507 }
0x6bac   :  { %v5510_v17 = vadd.f32 %v5508_v18, %v5500_v48 }
0x6bae   :  { %7622 = vtanh.f32 %v5510_v17 }
0x6bb8   :  { %v7623_v14 = vpop.eup %7622 }
0x6bb9   :  { %5513 = vrot.lane.b32.xlu0 %v7623_v14, %s7866_s7 }
0x6c2b   :  { %v5514_v39 = vpop.permute.xlu0 %5513 }
0x6c2c   :  { %v5516_v61 = vmul.f32 %v5514_v39, %v5499_v33 }
0x6c2e   :  { %5519 = vrot.lane.b32.xlu1 %v5516_v61, %s7867_s18 }
0x6ca0   :  { %v5520_v19 = vpop.permute.xlu1 %5519 }
0x6ca1   :  { %7044 = vmatmul.mubr.msk.f32.vlgmr.msra.gmra.mrb[80].mxu0 %vm301_vm4, %v5520_v19 }
0x6ca2   :  { %7412 = vmatpush3.bf16.msra.mxu0 %v8884_v24  ;;  %7065 = vmatprep.mubr.msk.f32.mxu0 %vm7863_vm0, %v7864_v1 }
0x6ca3   :  { %7413 = vmatprep.subr.bf16.mxu0 %v7862_v0 }
0x6ca6   :  { %7415 = vmatpush3.bf16.msra.mxu0 %v8888_v47 }
0x6ca7   :  { %7422 = vmatprep.subr.bf16.mxu0 %v7862_v0 }
0x6d74   :  { %v5589_v25 = vpop.f32.mrb[80].mxu0 }
0x6d75   :  { %v5593_v7 = vadd.f32 %v5589_v25, %v5104_v5  ;;  %v7045_v22 = vpop.f32.mrb[81].mxu0 }
0x6d77   :  { %v5594_v52 = vmul.f32 %v5593_v7, %v8076_v23  ;;  %v5909_v7 = vld [vmem:[#allocation13] sm:$0xff] }
0x6d79   :  { %7624 = vtanh.f32 %v5594_v52  ;;  %v5915_v52 = vld [vmem:[#allocation15] sm:$0xff] }
0x6d83   :  { %v7625_v27 = vpop.eup %7624 }
0x6d84   :  { %v5596_v29 = vmul.f32 %v7625_v27, %v8076_v23  ;;  %v5916_v27 = vld [vmem:[#allocation15 + $0x8] sm:$0xff] }
0x6d86   :  { %v5597_v55 = vadd.f32 %v5596_v29, %v8081_v30  ;;  %v5917_v29 = vld [vmem:[#allocation15 + $0x10] sm:$0xff] }
0x6d88   :  { %5600 = vrot.lane.b32.xlu0 %v5597_v55, %s7866_s7  ;;  %v5598_v20 = vmul.f32 %v5597_v55, %v5510_v17 }
0x6dfa   :  { %v5601_v34 = vpop.permute.xlu0 %5600 }
0x6dfb   :  { %v5603_v36 = vmul.f32 %v5601_v34, %v5597_v55 }
0x6dfd   :  { %5605 = vrot.lane.b32.xlu1 %v5603_v36, %s7867_s18 }
0x6e6f   :  { %v5606_v58 = vpop.permute.xlu1 %5605 }
0x6e70   :  { %v5608_v32 = vadd.f32 %v5606_v58, %v5598_v20 }
0x6e72   :  { %7626 = vtanh.f32 %v5608_v32 }
0x6e7c   :  { %v7627_v40 = vpop.eup %7626 }
0x6e7d   :  { %5611 = vrot.lane.b32.xlu0 %v7627_v40, %s7866_s7 }
0x6eef   :  { %v5612_v42 = vpop.permute.xlu0 %5611 }
0x6ef0   :  { %v5614_v63 = vmul.f32 %v5612_v42, %v5597_v55  ;;  %v7423_v55 = vpack.c.bf16 %v5916_v27, %v5915_v52  ;;  %v6118_v42 = vld [vmem:[#allocation16] ss:$0 sm:$0xff] }
0x6ef2   :  { %5617 = vrot.lane.b32.xlu1 %v5614_v63, %s7867_s18 }
0x6f64   :  { %v5618_v9 = vpop.permute.xlu1 %5617 }
0x6f65   :  { %7055 = vmatmul.mubr.msk.f32.vlgmr.msra.gmra.mrb[56].mxu1 %vm301_vm4, %v5618_v9 }
0x6f66   :  { %7418 = vmatpush3.bf16.msra.mxu1 %v8884_v24  ;;  %7076 = vmatprep.mubr.msk.f32.mxu1 %vm7863_vm0, %v7864_v1 }
0x6f67   :  { %7419 = vmatprep.subr.bf16.mxu1 %v7862_v0 }
0x6f6a   :  { %7421 = vmatpush3.bf16.msra.mxu1 %v8888_v47 }
0x7038   :  { %v5687_v56 = vpop.f32.mrb[56].mxu1 }
0x7039   :  { %v5691_v60 = vadd.f32 %v5687_v56, %v5109_v53  ;;  %v7056_v2 = vpop.f32.mrb[57].mxu1 }
0x703b   :  { %v5692_v3 = vmul.f32 %v5691_v60, %v8076_v23 }
0x703d   :  { %7628 = vtanh.f32 %v5692_v3 }
0x7047   :  { %v7629_v4 = vpop.eup %7628 }
0x7048   :  { %v5694_v31 = vmul.f32 %v7629_v4, %v8076_v23 }
0x704a   :  { %v5695_v24 = vadd.f32 %v5694_v31, %v8081_v30 }
0x704c   :  { %5698 = vrot.lane.b32.xlu0 %v5695_v24, %s7866_s7  ;;  %v5696_v47 = vmul.f32 %v5695_v24, %v5608_v32 }
0x70be   :  { %v5699_v37 = vpop.permute.xlu0 %5698 }
0x70bf   :  { %v5701_v43 = vmul.f32 %v5699_v37, %v5695_v24 }
0x70c1   :  { %5703 = vrot.lane.b32.xlu1 %v5701_v43, %s7867_s18 }
0x7133   :  { %v5704_v51 = vpop.permute.xlu1 %5703 }
0x7134   :  { %v5706_v21 = vadd.f32 %v5704_v51, %v5696_v47 }
0x7136   :  { %7630 = vtanh.f32 %v5706_v21 }
0x7140   :  { %v7631_v59 = vpop.eup %7630 }
0x7141   :  { %5709 = vrot.lane.b32.xlu0 %v7631_v59, %s7866_s7 }
0x71b3   :  { %v5710_v54 = vpop.permute.xlu0 %5709 }
0x71b4   :  { %v5712_v28 = vmul.f32 %v5710_v54, %v5695_v24 }
0x71b6   :  { %5715 = vrot.lane.b32.xlu1 %v5712_v28, %s7867_s18 }
0x7228   :  { %v5716_v8 = vpop.permute.xlu1 %5715 }
0x7229   :  { %7066 = vmatmul.mubr.msk.f32.vlgmr.msra.gmra.mrb[82].mxu0 %vm301_vm4, %v5716_v8 }
0x722a   :  { %7087 = vmatprep.mubr.msk.f32.mxu0 %vm7863_vm0, %v7864_v1  ;;  %7424 = vmatpush3.bf16.msra.mxu0 %v7423_v55 }
0x722b   :  { %7425 = vmatprep.subr.bf16.mxu0 %v7862_v0 }
0x72fc   :  { %v5785_v46 = vpop.f32.mrb[82].mxu0 }
0x72fd   :  { %v5789_v45 = vadd.f32 %v5785_v46, %v5114_v10  ;;  %v7067_v57 = vpop.f32.mrb[83].mxu0 }
0x72ff   :  { %v5790_v35 = vmul.f32 %v5789_v45, %v8076_v23 }
0x7301   :  { %7632 = vtanh.f32 %v5790_v35 }
0x730b   :  { %v7633_v15 = vpop.eup %7632 }
0x730c   :  { %v5792_v11 = vmul.f32 %v7633_v15, %v8076_v23 }
0x730e   :  { %v5793_v26 = vadd.f32 %v5792_v11, %v8081_v30 }
0x7310   :  { %5796 = vrot.lane.b32.xlu0 %v5793_v26, %s7866_s7  ;;  %v5794_v1 = vmul.f32 %v5793_v26, %v5706_v21 }
0x7382   :  { %v5797_v44 = vpop.permute.xlu0 %5796 }
0x7383   :  { %v5799_v62 = vmul.f32 %v5797_v44, %v5793_v26 }
0x7385   :  { %5801 = vrot.lane.b32.xlu1 %v5799_v62, %s7867_s18 }
0x73f7   :  { %v5802_v41 = vpop.permute.xlu1 %5801 }
0x73f8   :  { %v5804_v49 = vadd.f32 %v5802_v41, %v5794_v1 }
0x73fa   :  { %7634 = vtanh.f32 %v5804_v49 }
0x7404   :  { %v7635_v16 = vpop.eup %7634 }
0x7405   :  { %5807 = vrot.lane.b32.xlu0 %v7635_v16, %s7866_s7 }
0x7477   :  { %v5808_v13 = vpop.permute.xlu0 %5807 }
0x7478   :  { %v5810_v33 = vmul.f32 %v5808_v13, %v5793_v26 }
0x747a   :  { %5813 = vrot.lane.b32.xlu1 %v5810_v33, %s7867_s18 }
0x74ec   :  { %v5814_v50 = vpop.permute.xlu1 %5813 }
0x74ed   :  { %7077 = vmatmul.mubr.msk.f32.vlgmr.msra.gmra.mrb[58].mxu1 %vm301_vm4, %v5814_v50 }
0x75c0   :  { %v5883_v48 = vpop.f32.mrb[58].mxu1 }
0x75c1   :  { %v5887_v18 = vadd.f32 %v5883_v48, %v5119_v12  ;;  %v7078_v17 = vpop.f32.mrb[59].mxu1 }
0x75c3   :  { %v5888_v14 = vmul.f32 %v5887_v18, %v8076_v23 }
0x75c5   :  { %7636 = vtanh.f32 %v5888_v14 }
0x75cf   :  { %v7637_v39 = vpop.eup %7636 }
0x75d0   :  { %v5890_v61 = vmul.f32 %v7637_v39, %v8076_v23  ;;  %v5918_v23 = vld [vmem:[#allocation15 + $0x18] sm:$0xff] }
0x75d2   :  { %v5891_v19 = vadd.f32 %v5890_v61, %v8081_v30  ;;  %v7426_v30 = vpack.c.bf16 %v5918_v23, %v5917_v29 }
0x75d4   :  { %5894 = vrot.lane.b32.xlu0 %v5891_v19, %s7866_s7  ;;  %v5892_v6 = vmul.f32 %v5891_v19, %v5804_v49  ;;  %7427 = vmatpush3.bf16.msra.mxu0 %v7426_v30 }
0x7646   :  { %v5895_v5 = vpop.permute.xlu0 %5894 }
0x7647   :  { %v5897_v25 = vmul.f32 %v5895_v5, %v5891_v19 }
0x7649   :  { %5899 = vrot.lane.b32.xlu1 %v5897_v25, %s7867_s18 }
0x764d   :  { %5911 = vrot.lane.b32.xlu1 %v5909_v7, %s7868_s5 }
0x76bb   :  { %v5900_v38 = vpop.permute.xlu1 %5899 }
0x76bc   :  { %v5902_v22 = vadd.f32 %v5900_v38, %v5892_v6 }
0x76be   :  { %7638 = vtanh.f32 %v5902_v22 }
0x76bf   :  { %v5912_v20 = vpop.permute.xlu1 %5911 }
0x76c8   :  { %v7639_v34 = vpop.eup %7638 }
0x76c9   :  { %5905 = vrot.lane.b32.xlu0 %v7639_v34, %s7866_s7 }
0x773b   :  { %v5906_v36 = vpop.permute.xlu0 %5905 }
0x773c   :  { %v5908_v58 = vmul.f32 %v5906_v36, %v5891_v19 }
0x773e   :  { %v5914_v32 = vadd.f32 %v5912_v20, %v5908_v58 }
0x7740   :  { %5927 = vrot.lane.b32.xlu0 %v5914_v32, %s7867_s18 }
0x77b2   :  { %v5928_v40 = vpop.permute.xlu0 %5927 }
0x77b3   :  { %7088 = vmatmul.mubr.msk.f32.vlgmr.msra.gmra.mrb[84].mxu0 %vm301_vm4, %v5928_v40 }
0x7886   :  { %v5997_v63 = vpop.f32.mrb[84].mxu0 }
0x7887   :  { %v5998_v9 = vadd.f32 %v6118_v42, %v5997_v63  ;;  %v7089_v53 = vpop.f32.mrb[85].mxu0 }
0x7889   :  { %v6001_v0 = vmax.f32 %v5998_v9, 0.0 }
0x788b   :  { %6002 = vst [vmem:[#allocation18] sm:$0xff] %v6001_v0 }
0x788c   :  { %7827 = shalt.err (!%p7824_p12)
}
0x788d   :  { %s7828_s16 = scalar_lea.hbm %s9060_s8, 128 }
0x788e   :  { %p7829_p13 = scmp.ne.s32.totalorder %s9060_s8, %s7828_s16  ;;  %p7832_p0 = scmp.lt.u32.totalorder %s7828_s16, %s9060_s8 }
0x7890   :  { %p7834_p1 = pnand %p7832_p0, %p7829_p13 }
0x7892   :  { %7837 = shalt.err (!%p7834_p1)
}
0x7893   :  { %6012 = dma.vmem_to_hbm [thread:$0]  %s6010_s10, 128, %s9060_s8, [#allocation6]  }
0x7894   :  { %7848 = dma.done.wait [#allocation6], 128  }
0x7895   :  { %7849 = vsyncadd [#allocation6], 4294967168 }
0x7896   :  { %6016 = vsyncpa [#allocation5], 1 }
0x7897   :  { %6017 = vsyncpa [#allocation8], 1 }
0x7898   :  { %6018 = vsyncpa [#allocation11], 1 }
0x7899   :  { %6019 = vsyncpa [#allocation14], 1 }
0x789a   :  { %6020 = vsyncpa [#allocation17], 1 }
0x789b   :  { %6021 = vsyncpa [#allocation6], 1 }

</bundles_post_ra>
